<compile_context>
chip_gen: v7x
topology: tpu7x:2x2x1
jax: 0.10.0
libtpu: 0.0.40
codegen_flags: <defaults>
</compile_context>

<pallas_src>
import math
import functools

import numpy as np
import jax
import jax.numpy as jnp
from jax.experimental import pallas as pl
from jax.experimental.pallas import tpu as pltpu

LN_EPS = 1e-5  # PyTorch LayerNorm default


# ----------------------------- Pallas kernel -----------------------------

def _layernorm(y, g, b):
    mean = jnp.mean(y, axis=-1, keepdims=True)
    var = jnp.mean((y - mean) ** 2, axis=-1, keepdims=True)
    return (y - mean) * jax.lax.rsqrt(var + LN_EPS) * g + b


def _decoder_stack_kernel(trg_ref, mem_ref,
                          emb_w_ref, emb_b_ref, pe_ref,
                          sa_in_w_ref, sa_in_b_ref, sa_wo_ref, sa_bo_ref, ln1_g_ref, ln1_b_ref,
                          ca_in_w_ref, ca_in_b_ref, ca_wo_ref, ca_bo_ref, ln2_g_ref, ln2_b_ref,
                          w1_ref, b1_ref, w2_ref, b2_ref, ln3_g_ref, ln3_b_ref,
                          *rest, nhead, num_layers, has_tgt_mask, has_src_mask):
    """One batch element per grid step: embedding + PE + full decoder stack in VMEM."""
    idx = 0
    tgt_mask = None
    src_mask = None
    if has_tgt_mask:
        tgt_mask = rest[idx][...]
        idx += 1
    if has_src_mask:
        src_mask = rest[idx][...]
        idx += 1
    o_ref = rest[idx]

    e = emb_w_ref.shape[1]
    dh = e // nhead

    # Embedding Linear + positional encoding (dropout = identity, eval mode).
    x = (jnp.dot(trg_ref[0], emb_w_ref[...], preferred_element_type=jnp.float32)
         + emb_b_ref[...] + pe_ref[...])                                     # (T, E)
    mem = mem_ref[0]                                                          # (S, E)

    def mha(q, k, v, wo, bo, mask):
        # q: (T, E) (scale already folded into Q weights), k/v: (S, E), wo: (E, E), bo: (1, E)
        acc = None
        for h in range(nhead):
            sl = slice(h * dh, (h + 1) * dh)
            s = jax.lax.dot_general(q[:, sl], k[:, sl], (((1,), (1,)), ((), ())),
                                    preferred_element_type=jnp.float32)      # (T, S)
            if mask is not None:
                s = s + mask
            s = s - jnp.max(s, axis=-1, keepdims=True)
            p = jnp.exp(s)
            p = p * pl.reciprocal(jnp.sum(p, axis=-1, keepdims=True), approx=True)
            oh = jnp.dot(p, v[:, sl], preferred_element_type=jnp.float32)    # (T, dh)
            # accumulate head's contribution through sublane-aligned rows of wo
            contrib = jnp.dot(oh, wo[sl, :], preferred_element_type=jnp.float32)  # (T, E)
            acc = contrib if acc is None else acc + contrib
        return acc + bo

    for l in range(num_layers):
        # ---- self-attention block: fused Q|K|V projection, attn, out-proj, residual, LN1 ----
        qkv = (jnp.dot(x, sa_in_w_ref[l], preferred_element_type=jnp.float32)
               + sa_in_b_ref[l])                                              # (T, 3E)
        q = qkv[:, :e]
        k = qkv[:, e:2 * e]
        v = qkv[:, 2 * e:]
        y = x + mha(q, k, v, sa_wo_ref[l], sa_bo_ref[l], tgt_mask)
        x = _layernorm(y, ln1_g_ref[l], ln1_b_ref[l])

        # ---- cross-attention block: Q from x, fused K|V from memory, residual, LN2 ----
        w_in = ca_in_w_ref[l]                                                 # (E, 3E)
        b_in = ca_in_b_ref[l]                                                 # (1, 3E)
        q = jnp.dot(x, w_in[:, :e], preferred_element_type=jnp.float32) + b_in[:, :e]
        kv = jnp.dot(mem, w_in[:, e:], preferred_element_type=jnp.float32) + b_in[:, e:]  # (S, 2E)
        y = x + mha(q, kv[:, :e], kv[:, e:], ca_wo_ref[l], ca_bo_ref[l], src_mask)
        x = _layernorm(y, ln2_g_ref[l], ln2_b_ref[l])

        # ---- FFN block: linear -> ReLU -> linear, residual, LN3 (hidden stays in VMEM) ----
        h = jnp.maximum(
            jnp.dot(x, w1_ref[l], preferred_element_type=jnp.float32) + b1_ref[l], 0.0)
        y = x + jnp.dot(h, w2_ref[l], preferred_element_type=jnp.float32) + b2_ref[l]
        x = _layernorm(y, ln3_g_ref[l], ln3_b_ref[l])

    o_ref[0] = x


# ----------------------------- Kernel wrapper -----------------------------

def _full(shape):
    n = len(shape)
    return pl.BlockSpec(shape, lambda *args, n=n: (0,) * n)


def decoder_stack_pallas(trg_bt, mem_bt, params, trg_mask, src_mask, *, nhead, num_layers):
    """trg_bt: (B, T, in_dim), mem_bt: (B, S, E) -> (B, T, E) after the full decoder stack."""
    bsz, t, in_dim = trg_bt.shape
    _, s_len, d = mem_bt.shape
    L = num_layers
    f = params["w1"].shape[-1]

    has_tgt = trg_mask is not None
    has_src = src_mask is not None
    kernel = functools.partial(_decoder_stack_kernel, nhead=nhead, num_layers=L,
                               has_tgt_mask=has_tgt, has_src_mask=has_src)

    pe_t = jax.lax.slice_in_dim(params["pe"], 0, t, axis=0)   # (T, E)

    args = [trg_bt, mem_bt,
            params["emb_w"], params["emb_b"], pe_t,
            params["sa_in_w"], params["sa_in_b"], params["sa_wo"], params["sa_bo"],
            params["ln1_g"], params["ln1_b"],
            params["ca_in_w"], params["ca_in_b"], params["ca_wo"], params["ca_bo"],
            params["ln2_g"], params["ln2_b"],
            params["w1"], params["b1"], params["w2"], params["b2"],
            params["ln3_g"], params["ln3_b"]]
    in_specs = [
        pl.BlockSpec((1, t, in_dim), lambda i: (i, 0, 0)),
        pl.BlockSpec((1, s_len, d), lambda i: (i, 0, 0)),
        _full((in_dim, d)), _full((1, d)), _full((t, d)),
        _full((L, d, 3 * d)), _full((L, 1, 3 * d)), _full((L, d, d)), _full((L, 1, d)),
        _full((L, 1, d)), _full((L, 1, d)),
        _full((L, d, 3 * d)), _full((L, 1, 3 * d)), _full((L, d, d)), _full((L, 1, d)),
        _full((L, 1, d)), _full((L, 1, d)),
        _full((L, d, f)), _full((L, 1, f)), _full((L, f, d)), _full((L, 1, d)),
        _full((L, 1, d)), _full((L, 1, d)),
    ]
    if has_tgt:
        args.append(trg_mask)
        in_specs.append(_full((t, t)))
    if has_src:
        args.append(src_mask)
        in_specs.append(_full((t, s_len)))

    return pl.pallas_call(
        kernel,
        out_shape=jax.ShapeDtypeStruct((bsz, t, d), jnp.float32),
        grid=(bsz,),
        in_specs=in_specs,
        out_specs=pl.BlockSpec((1, t, d), lambda i: (i, 0, 0)),
        compiler_params=pltpu.CompilerParams(dimension_semantics=("parallel",)),
    )(*args)


# ----------------------------- Model forward -----------------------------

def transformer_decoder_forward(params, trg, memory, src_mask=None, trg_mask=None,
                                *, nhead, num_layers):
    # One-time layout change to batch-leading (B, T, ...) so every kernel block has
    # lane-/sublane-friendly last two dims (T, E). Transposed back once at the end.
    trg_bt = jnp.transpose(trg, (1, 0, 2))       # (B, T, output_dim)
    mem_bt = jnp.transpose(memory, (1, 0, 2))    # (B, S, d_model)

    x = decoder_stack_pallas(trg_bt, mem_bt, params, trg_mask, src_mask,
                             nhead=nhead, num_layers=num_layers)

    # Final narrow projection (d_model -> output_dim=4) stays in plain XLA (lane-density rule).
    out = jnp.einsum("btd,do->bto", x, params["out_w"]) + params["out_b"]
    return jnp.transpose(out, (1, 0, 2))         # back to (T, B, output_dim)


# ----------------------------- Pure-JAX reference -----------------------------

def reference_forward(params, trg, memory, src_mask=None, trg_mask=None, *, nhead, num_layers):
    d = params["emb_w"].shape[1]
    dh = d // nhead
    x = trg @ params["emb_w"] + params["emb_b"][0]
    x = x + params["pe"][: trg.shape[0], None, :]

    def ln(y, g, b):
        m = y.mean(-1, keepdims=True)
        v = ((y - m) ** 2).mean(-1, keepdims=True)
        return (y - m) / jnp.sqrt(v + LN_EPS) * g + b

    def mha(xq, xkv, w_in, b_in, wo, bo, mask):
        q = xq @ w_in[:, :d] + b_in[0, :d]                 # scale pre-folded into Q columns
        k = xkv @ w_in[:, d:2 * d] + b_in[0, d:2 * d]
        v = xkv @ w_in[:, 2 * d:] + b_in[0, 2 * d:]
        T_, B_, _ = q.shape
        S_ = k.shape[0]
        qh = q.reshape(T_, B_, nhead, dh)
        kh = k.reshape(S_, B_, nhead, dh)
        vh = v.reshape(S_, B_, nhead, dh)
        s = jnp.einsum("tbhd,sbhd->bhts", qh, kh)
        if mask is not None:
            s = s + mask
        p = jax.nn.softmax(s, axis=-1)
        o = jnp.einsum("bhts,sbhd->tbhd", p, vh).reshape(T_, B_, d)
        return o @ wo + bo[0]

    for l in range(num_layers):
        x = ln(x + mha(x, x, params["sa_in_w"][l], params["sa_in_b"][l],
                       params["sa_wo"][l], params["sa_bo"][l], trg_mask),
               params["ln1_g"][l, 0], params["ln1_b"][l, 0])
        x = ln(x + mha(x, memory, params["ca_in_w"][l], params["ca_in_b"][l],
                       params["ca_wo"][l], params["ca_bo"][l], src_mask),
               params["ln2_g"][l, 0], params["ln2_b"][l, 0])
        h = jax.nn.relu(x @ params["w1"][l] + params["b1"][l, 0])
        x = ln(x + h @ params["w2"][l] + params["b2"][l, 0],
               params["ln3_g"][l, 0], params["ln3_b"][l, 0])
    return x @ params["out_w"] + params["out_b"]


# ----------------------------- Parameters -----------------------------

def make_positional_encoding(d_model, max_len=5000):
    pe = np.zeros((max_len, d_model), dtype=np.float32)
    position = np.arange(0, max_len, dtype=np.float32)[:, None]
    div_term = np.exp(np.arange(0, d_model, 2, dtype=np.float32) * (-math.log(10000.0) / d_model))
    pe[:, 0::2] = np.sin(position * div_term)
    pe[:, 1::2] = np.cos(position * div_term)
    return jnp.asarray(pe)   # (max_len, d_model)


def init_params(key, output_dim, d_model, nhead, num_layers, dim_feedforward):
    dh = d_model // nhead
    scale = 1.0 / math.sqrt(dh)

    def dense(k, fan_in, fan_out):
        kw, kb = jax.random.split(k)
        lim = 1.0 / math.sqrt(fan_in)
        w = jax.random.uniform(kw, (fan_in, fan_out), jnp.float32, -lim, lim)
        b = jax.random.uniform(kb, (fan_out,), jnp.float32, -lim, lim)
        return w, b

    keys = jax.random.split(key, 2 + num_layers)
    params = {"pe": make_positional_encoding(d_model)}
    emb_w, emb_b = dense(keys[0], output_dim, d_model)
    out_w, out_b = dense(keys[1], d_model, output_dim)
    params["emb_w"], params["emb_b"] = emb_w, emb_b.reshape(1, d_model)
    params["out_w"], params["out_b"] = out_w, out_b

    def attn_in(ks):
        # packed (E, 3E) in-projection with 1/sqrt(dh) folded into the Q columns
        wq, bq = dense(ks[0], d_model, d_model)
        wk, bk = dense(ks[1], d_model, d_model)
        wv, bv = dense(ks[2], d_model, d_model)
        w_in = jnp.concatenate([wq * scale, wk, wv], axis=1)
        b_in = jnp.concatenate([bq * scale, bk, bv]).reshape(1, 3 * d_model)
        return w_in, b_in

    names = ["sa_in_w", "sa_in_b", "sa_wo", "sa_bo", "ln1_g", "ln1_b",
             "ca_in_w", "ca_in_b", "ca_wo", "ca_bo", "ln2_g", "ln2_b",
             "w1", "b1", "w2", "b2", "ln3_g", "ln3_b"]
    stacked = {k: [] for k in names}
    ones = jnp.ones((1, d_model), jnp.float32)
    zeros = jnp.zeros((1, d_model), jnp.float32)
    for li in range(num_layers):
        lk = jax.random.split(keys[2 + li], 10)
        sa_in_w, sa_in_b = attn_in(lk[0:3])
        sa_wo, sa_bo = dense(lk[3], d_model, d_model)
        ca_in_w, ca_in_b = attn_in(lk[4:7])
        ca_wo, ca_bo = dense(lk[7], d_model, d_model)
        w1, b1 = dense(lk[8], d_model, dim_feedforward)
        w2, b2 = dense(lk[9], dim_feedforward, d_model)
        vals = dict(sa_in_w=sa_in_w, sa_in_b=sa_in_b, sa_wo=sa_wo,
                    sa_bo=sa_bo.reshape(1, d_model), ln1_g=ones, ln1_b=zeros,
                    ca_in_w=ca_in_w, ca_in_b=ca_in_b, ca_wo=ca_wo,
                    ca_bo=ca_bo.reshape(1, d_model), ln2_g=ones, ln2_b=zeros,
                    w1=w1, b1=b1.reshape(1, dim_feedforward),
                    w2=w2, b2=b2.reshape(1, d_model), ln3_g=ones, ln3_b=zeros)
        for k in names:
            stacked[k].append(vals[k])
    for k in names:
        params[k] = jnp.stack(stacked[k], axis=0)
    return params


# ----------------------------- Main -----------------------------

if __name__ == "__main__":
    output_dim = 4
    d_model = 32
    nhead = 4
    num_layers = 2
    dim_feedforward = 64
    T, S, B = 8, 8, 2

    key = jax.random.PRNGKey(0)
    kp, kt, km = jax.random.split(key, 3)

    params = init_params(kp, output_dim, d_model, nhead, num_layers, dim_feedforward)

    trg = jax.random.normal(kt, (T, B, output_dim), jnp.float32)       # (T, B, output_dim)
    memory = jax.random.normal(km, (S, B, d_model), jnp.float32)       # (S, B, d_model)

    # Causal target additive float mask (torch convention); src_mask=None -> mask-free variant.
    trg_mask = jnp.where(
        jnp.triu(jnp.ones((T, T), dtype=bool), k=1), -1e9, 0.0
    ).astype(jnp.float32)

    fwd = jax.jit(functools.partial(transformer_decoder_forward,
                                    nhead=nhead, num_layers=num_layers))
    out = fwd(params, trg, memory, None, trg_mask)
    out = jax.block_until_ready(out)

    assert out.shape == (T, B, output_dim)
    assert bool(jnp.all(jnp.isfinite(out)))

    ref = reference_forward(params, trg, memory, None, trg_mask,
                            nhead=nhead, num_layers=num_layers)
    np.testing.assert_allclose(np.asarray(out), np.asarray(ref), rtol=2e-2, atol=2e-2)

    # TODO(synk): dropout layers are deterministic identity here (eval-mode semantics);
    #             bf16 MXU operands intentionally not applied to keep f32 numerics.
    print("KERNEL_OK")
</pallas_src>

<mosaic_0001>
module attributes {stable_mosaic.version = 11 : i64} {
  func.func @_decoder_stack_kernel(%arg0: i32, %arg1: memref<1x8x4xf32, #tpu.memory_space<vmem>>, %arg2: memref<1x8x32xf32, #tpu.memory_space<vmem>>, %arg3: memref<4x32xf32, #tpu.memory_space<vmem>>, %arg4: memref<1x32xf32, #tpu.memory_space<vmem>>, %arg5: memref<8x32xf32, #tpu.memory_space<vmem>>, %arg6: memref<2x32x96xf32, #tpu.memory_space<vmem>>, %arg7: memref<2x1x96xf32, #tpu.memory_space<vmem>>, %arg8: memref<2x32x32xf32, #tpu.memory_space<vmem>>, %arg9: memref<2x1x32xf32, #tpu.memory_space<vmem>>, %arg10: memref<2x1x32xf32, #tpu.memory_space<vmem>>, %arg11: memref<2x1x32xf32, #tpu.memory_space<vmem>>, %arg12: memref<2x32x96xf32, #tpu.memory_space<vmem>>, %arg13: memref<2x1x96xf32, #tpu.memory_space<vmem>>, %arg14: memref<2x32x32xf32, #tpu.memory_space<vmem>>, %arg15: memref<2x1x32xf32, #tpu.memory_space<vmem>>, %arg16: memref<2x1x32xf32, #tpu.memory_space<vmem>>, %arg17: memref<2x1x32xf32, #tpu.memory_space<vmem>>, %arg18: memref<2x32x64xf32, #tpu.memory_space<vmem>>, %arg19: memref<2x1x64xf32, #tpu.memory_space<vmem>>, %arg20: memref<2x64x32xf32, #tpu.memory_space<vmem>>, %arg21: memref<2x1x32xf32, #tpu.memory_space<vmem>>, %arg22: memref<2x1x32xf32, #tpu.memory_space<vmem>>, %arg23: memref<2x1x32xf32, #tpu.memory_space<vmem>>, %arg24: memref<8x8xf32, #tpu.memory_space<vmem>>, %arg25: memref<1x8x32xf32, #tpu.memory_space<vmem>>) attributes {dimension_semantics = [#tpu.dimension_semantics<parallel>], iteration_bounds = array<i64: 2>, scalar_prefetch = 0 : i64, scratch_operands = 0 : i64, tpu.core_type = #tpu.core_type<tc>, window_params = [{transform_indices = @transform_0, window_bounds = array<i64: 1, 8, 4>}, {transform_indices = @transform_1, window_bounds = array<i64: 1, 8, 32>}, {pipeline_mode = #tpu.pipeline_mode<synchronous>, transform_indices = @transform_2, window_bounds = array<i64: 4, 32>}, {pipeline_mode = #tpu.pipeline_mode<synchronous>, transform_indices = @transform_3, window_bounds = array<i64: 1, 32>}, {pipeline_mode = #tpu.pipeline_mode<synchronous>, transform_indices = @transform_4, window_bounds = array<i64: 8, 32>}, {pipeline_mode = #tpu.pipeline_mode<synchronous>, transform_indices = @transform_5, window_bounds = array<i64: 2, 32, 96>}, {pipeline_mode = #tpu.pipeline_mode<synchronous>, transform_indices = @transform_6, window_bounds = array<i64: 2, 1, 96>}, {pipeline_mode = #tpu.pipeline_mode<synchronous>, transform_indices = @transform_7, window_bounds = array<i64: 2, 32, 32>}, {pipeline_mode = #tpu.pipeline_mode<synchronous>, transform_indices = @transform_8, window_bounds = array<i64: 2, 1, 32>}, {pipeline_mode = #tpu.pipeline_mode<synchronous>, transform_indices = @transform_9, window_bounds = array<i64: 2, 1, 32>}, {pipeline_mode = #tpu.pipeline_mode<synchronous>, transform_indices = @transform_10, window_bounds = array<i64: 2, 1, 32>}, {pipeline_mode = #tpu.pipeline_mode<synchronous>, transform_indices = @transform_11, window_bounds = array<i64: 2, 32, 96>}, {pipeline_mode = #tpu.pipeline_mode<synchronous>, transform_indices = @transform_12, window_bounds = array<i64: 2, 1, 96>}, {pipeline_mode = #tpu.pipeline_mode<synchronous>, transform_indices = @transform_13, window_bounds = array<i64: 2, 32, 32>}, {pipeline_mode = #tpu.pipeline_mode<synchronous>, transform_indices = @transform_14, window_bounds = array<i64: 2, 1, 32>}, {pipeline_mode = #tpu.pipeline_mode<synchronous>, transform_indices = @transform_15, window_bounds = array<i64: 2, 1, 32>}, {pipeline_mode = #tpu.pipeline_mode<synchronous>, transform_indices = @transform_16, window_bounds = array<i64: 2, 1, 32>}, {pipeline_mode = #tpu.pipeline_mode<synchronous>, transform_indices = @transform_17, window_bounds = array<i64: 2, 32, 64>}, {pipeline_mode = #tpu.pipeline_mode<synchronous>, transform_indices = @transform_18, window_bounds = array<i64: 2, 1, 64>}, {pipeline_mode = #tpu.pipeline_mode<synchronous>, transform_indices = @transform_19, window_bounds = array<i64: 2, 64, 32>}, {pipeline_mode = #tpu.pipeline_mode<synchronous>, transform_indices = @transform_20, window_bounds = array<i64: 2, 1, 32>}, {pipeline_mode = #tpu.pipeline_mode<synchronous>, transform_indices = @transform_21, window_bounds = array<i64: 2, 1, 32>}, {pipeline_mode = #tpu.pipeline_mode<synchronous>, transform_indices = @transform_22, window_bounds = array<i64: 2, 1, 32>}, {pipeline_mode = #tpu.pipeline_mode<synchronous>, transform_indices = @transform_23, window_bounds = array<i64: 8, 8>}, {transform_indices = @transform_24, window_bounds = array<i64: 1, 8, 32>}]} {
    %c0 = arith.constant 0 : index
    %c0_0 = arith.constant 0 : index
    %0 = vector.load %arg24[%c0, %c0_0] : memref<8x8xf32, #tpu.memory_space<vmem>>, vector<8x8xf32>
    %c0_1 = arith.constant 0 : index
    %c0_2 = arith.constant 0 : index
    %c0_3 = arith.constant 0 : index
    %1 = vector.load %arg1[%c0_1, %c0_2, %c0_3] : memref<1x8x4xf32, #tpu.memory_space<vmem>>, vector<1x8x4xf32>
    %2 = vector.shape_cast %1 : vector<1x8x4xf32> to vector<8x4xf32>
    %c0_4 = arith.constant 0 : index
    %c0_5 = arith.constant 0 : index
    %3 = vector.load %arg3[%c0_4, %c0_5] : memref<4x32xf32, #tpu.memory_space<vmem>>, vector<4x32xf32>
    %cst = arith.constant dense<0.000000e+00> : vector<8x32xf32>
    %4 = tpu.matmul %2, %3, %cst {dimension_numbers = #tpu.dot_dimension_numbers<[1], [0], [0], [1], [0, 0, 1, 1], [], []>} : vector<8x4xf32>, vector<4x32xf32>, vector<8x32xf32> -> vector<8x32xf32>
    %c0_6 = arith.constant 0 : index
    %c0_7 = arith.constant 0 : index
    %5 = vector.load %arg4[%c0_6, %c0_7] : memref<1x32xf32, #tpu.memory_space<vmem>>, vector<1x32xf32>
    %6 = vector.broadcast %5 : vector<1x32xf32> to vector<8x32xf32>
    %7 = arith.addf %4, %6 : vector<8x32xf32>
    %c0_8 = arith.constant 0 : index
    %c0_9 = arith.constant 0 : index
    %8 = vector.load %arg5[%c0_8, %c0_9] : memref<8x32xf32, #tpu.memory_space<vmem>>, vector<8x32xf32>
    %9 = arith.addf %7, %8 : vector<8x32xf32>
    %c0_10 = arith.constant 0 : index
    %c0_11 = arith.constant 0 : index
    %c0_12 = arith.constant 0 : index
    %10 = vector.load %arg2[%c0_10, %c0_11, %c0_12] : memref<1x8x32xf32, #tpu.memory_space<vmem>>, vector<1x8x32xf32>
    %11 = vector.shape_cast %10 : vector<1x8x32xf32> to vector<8x32xf32>
    %c0_13 = arith.constant 0 : index
    %c0_14 = arith.constant 0 : index
    %c0_15 = arith.constant 0 : index
    %12 = vector.load %arg6[%c0_13, %c0_14, %c0_15] : memref<2x32x96xf32, #tpu.memory_space<vmem>>, vector<1x32x96xf32>
    %13 = vector.shape_cast %12 : vector<1x32x96xf32> to vector<32x96xf32>
    %cst_16 = arith.constant dense<0.000000e+00> : vector<8x96xf32>
    %14 = tpu.matmul %9, %13, %cst_16 {dimension_numbers = #tpu.dot_dimension_numbers<[1], [0], [0], [1], [0, 0, 1, 1], [], []>} : vector<8x32xf32>, vector<32x96xf32>, vector<8x96xf32> -> vector<8x96xf32>
    %c0_17 = arith.constant 0 : index
    %c0_18 = arith.constant 0 : index
    %c0_19 = arith.constant 0 : index
    %15 = vector.load %arg7[%c0_17, %c0_18, %c0_19] : memref<2x1x96xf32, #tpu.memory_space<vmem>>, vector<1x1x96xf32>
    %16 = vector.shape_cast %15 : vector<1x1x96xf32> to vector<1x96xf32>
    %17 = vector.broadcast %16 : vector<1x96xf32> to vector<8x96xf32>
    %18 = arith.addf %14, %17 : vector<8x96xf32>
    %19 = vector.extract_strided_slice %18 {offsets = [0, 0], sizes = [8, 32], strides = [1, 1]} : vector<8x96xf32> to vector<8x32xf32>
    %20 = vector.extract_strided_slice %18 {offsets = [0, 32], sizes = [8, 32], strides = [1, 1]} : vector<8x96xf32> to vector<8x32xf32>
    %21 = vector.extract_strided_slice %18 {offsets = [0, 64], sizes = [8, 32], strides = [1, 1]} : vector<8x96xf32> to vector<8x32xf32>
    %c0_20 = arith.constant 0 : index
    %c0_21 = arith.constant 0 : index
    %c0_22 = arith.constant 0 : index
    %22 = vector.load %arg8[%c0_20, %c0_21, %c0_22] : memref<2x32x32xf32, #tpu.memory_space<vmem>>, vector<1x32x32xf32>
    %23 = vector.shape_cast %22 : vector<1x32x32xf32> to vector<32x32xf32>
    %c0_23 = arith.constant 0 : index
    %c0_24 = arith.constant 0 : index
    %c0_25 = arith.constant 0 : index
    %24 = vector.load %arg9[%c0_23, %c0_24, %c0_25] : memref<2x1x32xf32, #tpu.memory_space<vmem>>, vector<1x1x32xf32>
    %25 = vector.shape_cast %24 : vector<1x1x32xf32> to vector<1x32xf32>
    %26 = vector.extract_strided_slice %19 {offsets = [0, 0], sizes = [8, 8], strides = [1, 1]} : vector<8x32xf32> to vector<8x8xf32>
    %27 = vector.extract_strided_slice %20 {offsets = [0, 0], sizes = [8, 8], strides = [1, 1]} : vector<8x32xf32> to vector<8x8xf32>
    %cst_26 = arith.constant dense<0.000000e+00> : vector<8x8xf32>
    %28 = tpu.matmul %26, %27, %cst_26 {dimension_numbers = #tpu.dot_dimension_numbers<[1], [1], [0], [0], [0, 0, 1, 0], [], []>} : vector<8x8xf32>, vector<8x8xf32>, vector<8x8xf32> -> vector<8x8xf32>
    %29 = arith.addf %28, %0 : vector<8x8xf32>
    %cst_27 = arith.constant dense<0xFF800000> : vector<8xf32>
    %30 = vector.multi_reduction <maximumf>, %29, %cst_27 [1] : vector<8x8xf32> to vector<8xf32>
    %31 = vector.shape_cast %30 : vector<8xf32> to vector<8x1xf32>
    %32 = vector.broadcast %31 : vector<8x1xf32> to vector<8x8xf32>
    %33 = arith.subf %29, %32 : vector<8x8xf32>
    %34 = math.exp %33 : vector<8x8xf32>
    %cst_28 = arith.constant dense<0.000000e+00> : vector<8xf32>
    %35 = vector.multi_reduction <add>, %34, %cst_28 [1] : vector<8x8xf32> to vector<8xf32>
    %36 = vector.shape_cast %35 : vector<8xf32> to vector<8x1xf32>
    %37 = tpu.reciprocal %36 {approx = true} : vector<8x1xf32> -> vector<8x1xf32>
    %38 = vector.broadcast %37 : vector<8x1xf32> to vector<8x8xf32>
    %39 = arith.mulf %34, %38 : vector<8x8xf32>
    %40 = vector.extract_strided_slice %21 {offsets = [0, 0], sizes = [8, 8], strides = [1, 1]} : vector<8x32xf32> to vector<8x8xf32>
    %cst_29 = arith.constant dense<0.000000e+00> : vector<8x8xf32>
    %41 = tpu.matmul %39, %40, %cst_29 {dimension_numbers = #tpu.dot_dimension_numbers<[1], [0], [0], [1], [0, 0, 1, 1], [], []>} : vector<8x8xf32>, vector<8x8xf32>, vector<8x8xf32> -> vector<8x8xf32>
    %42 = vector.extract_strided_slice %23 {offsets = [0, 0], sizes = [8, 32], strides = [1, 1]} : vector<32x32xf32> to vector<8x32xf32>
    %cst_30 = arith.constant dense<0.000000e+00> : vector<8x32xf32>
    %43 = tpu.matmul %41, %42, %cst_30 {dimension_numbers = #tpu.dot_dimension_numbers<[1], [0], [0], [1], [0, 0, 1, 1], [], []>} : vector<8x8xf32>, vector<8x32xf32>, vector<8x32xf32> -> vector<8x32xf32>
    %44 = vector.extract_strided_slice %19 {offsets = [0, 8], sizes = [8, 8], strides = [1, 1]} : vector<8x32xf32> to vector<8x8xf32>
    %45 = vector.extract_strided_slice %20 {offsets = [0, 8], sizes = [8, 8], strides = [1, 1]} : vector<8x32xf32> to vector<8x8xf32>
    %cst_31 = arith.constant dense<0.000000e+00> : vector<8x8xf32>
    %46 = tpu.matmul %44, %45, %cst_31 {dimension_numbers = #tpu.dot_dimension_numbers<[1], [1], [0], [0], [0, 0, 1, 0], [], []>} : vector<8x8xf32>, vector<8x8xf32>, vector<8x8xf32> -> vector<8x8xf32>
    %47 = arith.addf %46, %0 : vector<8x8xf32>
    %cst_32 = arith.constant dense<0xFF800000> : vector<8xf32>
    %48 = vector.multi_reduction <maximumf>, %47, %cst_32 [1] : vector<8x8xf32> to vector<8xf32>
    %49 = vector.shape_cast %48 : vector<8xf32> to vector<8x1xf32>
    %50 = vector.broadcast %49 : vector<8x1xf32> to vector<8x8xf32>
    %51 = arith.subf %47, %50 : vector<8x8xf32>
    %52 = math.exp %51 : vector<8x8xf32>
    %cst_33 = arith.constant dense<0.000000e+00> : vector<8xf32>
    %53 = vector.multi_reduction <add>, %52, %cst_33 [1] : vector<8x8xf32> to vector<8xf32>
    %54 = vector.shape_cast %53 : vector<8xf32> to vector<8x1xf32>
    %55 = tpu.reciprocal %54 {approx = true} : vector<8x1xf32> -> vector<8x1xf32>
    %56 = vector.broadcast %55 : vector<8x1xf32> to vector<8x8xf32>
    %57 = arith.mulf %52, %56 : vector<8x8xf32>
    %58 = vector.extract_strided_slice %21 {offsets = [0, 8], sizes = [8, 8], strides = [1, 1]} : vector<8x32xf32> to vector<8x8xf32>
    %cst_34 = arith.constant dense<0.000000e+00> : vector<8x8xf32>
    %59 = tpu.matmul %57, %58, %cst_34 {dimension_numbers = #tpu.dot_dimension_numbers<[1], [0], [0], [1], [0, 0, 1, 1], [], []>} : vector<8x8xf32>, vector<8x8xf32>, vector<8x8xf32> -> vector<8x8xf32>
    %60 = vector.extract_strided_slice %23 {offsets = [8, 0], sizes = [8, 32], strides = [1, 1]} : vector<32x32xf32> to vector<8x32xf32>
    %cst_35 = arith.constant dense<0.000000e+00> : vector<8x32xf32>
    %61 = tpu.matmul %59, %60, %cst_35 {dimension_numbers = #tpu.dot_dimension_numbers<[1], [0], [0], [1], [0, 0, 1, 1], [], []>} : vector<8x8xf32>, vector<8x32xf32>, vector<8x32xf32> -> vector<8x32xf32>
    %62 = arith.addf %43, %61 : vector<8x32xf32>
    %63 = vector.extract_strided_slice %19 {offsets = [0, 16], sizes = [8, 8], strides = [1, 1]} : vector<8x32xf32> to vector<8x8xf32>
    %64 = vector.extract_strided_slice %20 {offsets = [0, 16], sizes = [8, 8], strides = [1, 1]} : vector<8x32xf32> to vector<8x8xf32>
    %cst_36 = arith.constant dense<0.000000e+00> : vector<8x8xf32>
    %65 = tpu.matmul %63, %64, %cst_36 {dimension_numbers = #tpu.dot_dimension_numbers<[1], [1], [0], [0], [0, 0, 1, 0], [], []>} : vector<8x8xf32>, vector<8x8xf32>, vector<8x8xf32> -> vector<8x8xf32>
    %66 = arith.addf %65, %0 : vector<8x8xf32>
    %cst_37 = arith.constant dense<0xFF800000> : vector<8xf32>
    %67 = vector.multi_reduction <maximumf>, %66, %cst_37 [1] : vector<8x8xf32> to vector<8xf32>
    %68 = vector.shape_cast %67 : vector<8xf32> to vector<8x1xf32>
    %69 = vector.broadcast %68 : vector<8x1xf32> to vector<8x8xf32>
    %70 = arith.subf %66, %69 : vector<8x8xf32>
    %71 = math.exp %70 : vector<8x8xf32>
    %cst_38 = arith.constant dense<0.000000e+00> : vector<8xf32>
    %72 = vector.multi_reduction <add>, %71, %cst_38 [1] : vector<8x8xf32> to vector<8xf32>
    %73 = vector.shape_cast %72 : vector<8xf32> to vector<8x1xf32>
    %74 = tpu.reciprocal %73 {approx = true} : vector<8x1xf32> -> vector<8x1xf32>
    %75 = vector.broadcast %74 : vector<8x1xf32> to vector<8x8xf32>
    %76 = arith.mulf %71, %75 : vector<8x8xf32>
    %77 = vector.extract_strided_slice %21 {offsets = [0, 16], sizes = [8, 8], strides = [1, 1]} : vector<8x32xf32> to vector<8x8xf32>
    %cst_39 = arith.constant dense<0.000000e+00> : vector<8x8xf32>
    %78 = tpu.matmul %76, %77, %cst_39 {dimension_numbers = #tpu.dot_dimension_numbers<[1], [0], [0], [1], [0, 0, 1, 1], [], []>} : vector<8x8xf32>, vector<8x8xf32>, vector<8x8xf32> -> vector<8x8xf32>
    %79 = vector.extract_strided_slice %23 {offsets = [16, 0], sizes = [8, 32], strides = [1, 1]} : vector<32x32xf32> to vector<8x32xf32>
    %cst_40 = arith.constant dense<0.000000e+00> : vector<8x32xf32>
    %80 = tpu.matmul %78, %79, %cst_40 {dimension_numbers = #tpu.dot_dimension_numbers<[1], [0], [0], [1], [0, 0, 1, 1], [], []>} : vector<8x8xf32>, vector<8x32xf32>, vector<8x32xf32> -> vector<8x32xf32>
    %81 = arith.addf %62, %80 : vector<8x32xf32>
    %82 = vector.extract_strided_slice %19 {offsets = [0, 24], sizes = [8, 8], strides = [1, 1]} : vector<8x32xf32> to vector<8x8xf32>
    %83 = vector.extract_strided_slice %20 {offsets = [0, 24], sizes = [8, 8], strides = [1, 1]} : vector<8x32xf32> to vector<8x8xf32>
    %cst_41 = arith.constant dense<0.000000e+00> : vector<8x8xf32>
    %84 = tpu.matmul %82, %83, %cst_41 {dimension_numbers = #tpu.dot_dimension_numbers<[1], [1], [0], [0], [0, 0, 1, 0], [], []>} : vector<8x8xf32>, vector<8x8xf32>, vector<8x8xf32> -> vector<8x8xf32>
    %85 = arith.addf %84, %0 : vector<8x8xf32>
    %cst_42 = arith.constant dense<0xFF800000> : vector<8xf32>
    %86 = vector.multi_reduction <maximumf>, %85, %cst_42 [1] : vector<8x8xf32> to vector<8xf32>
    %87 = vector.shape_cast %86 : vector<8xf32> to vector<8x1xf32>
    %88 = vector.broadcast %87 : vector<8x1xf32> to vector<8x8xf32>
    %89 = arith.subf %85, %88 : vector<8x8xf32>
    %90 = math.exp %89 : vector<8x8xf32>
    %cst_43 = arith.constant dense<0.000000e+00> : vector<8xf32>
    %91 = vector.multi_reduction <add>, %90, %cst_43 [1] : vector<8x8xf32> to vector<8xf32>
    %92 = vector.shape_cast %91 : vector<8xf32> to vector<8x1xf32>
    %93 = tpu.reciprocal %92 {approx = true} : vector<8x1xf32> -> vector<8x1xf32>
    %94 = vector.broadcast %93 : vector<8x1xf32> to vector<8x8xf32>
    %95 = arith.mulf %90, %94 : vector<8x8xf32>
    %96 = vector.extract_strided_slice %21 {offsets = [0, 24], sizes = [8, 8], strides = [1, 1]} : vector<8x32xf32> to vector<8x8xf32>
    %cst_44 = arith.constant dense<0.000000e+00> : vector<8x8xf32>
    %97 = tpu.matmul %95, %96, %cst_44 {dimension_numbers = #tpu.dot_dimension_numbers<[1], [0], [0], [1], [0, 0, 1, 1], [], []>} : vector<8x8xf32>, vector<8x8xf32>, vector<8x8xf32> -> vector<8x8xf32>
    %98 = vector.extract_strided_slice %23 {offsets = [24, 0], sizes = [8, 32], strides = [1, 1]} : vector<32x32xf32> to vector<8x32xf32>
    %cst_45 = arith.constant dense<0.000000e+00> : vector<8x32xf32>
    %99 = tpu.matmul %97, %98, %cst_45 {dimension_numbers = #tpu.dot_dimension_numbers<[1], [0], [0], [1], [0, 0, 1, 1], [], []>} : vector<8x8xf32>, vector<8x32xf32>, vector<8x32xf32> -> vector<8x32xf32>
    %100 = arith.addf %81, %99 : vector<8x32xf32>
    %101 = vector.broadcast %25 : vector<1x32xf32> to vector<8x32xf32>
    %102 = arith.addf %100, %101 : vector<8x32xf32>
    %103 = arith.addf %9, %102 : vector<8x32xf32>
    %c0_46 = arith.constant 0 : index
    %c0_47 = arith.constant 0 : index
    %c0_48 = arith.constant 0 : index
    %104 = vector.load %arg10[%c0_46, %c0_47, %c0_48] : memref<2x1x32xf32, #tpu.memory_space<vmem>>, vector<1x1x32xf32>
    %105 = vector.shape_cast %104 : vector<1x1x32xf32> to vector<1x32xf32>
    %c0_49 = arith.constant 0 : index
    %c0_50 = arith.constant 0 : index
    %c0_51 = arith.constant 0 : index
    %106 = vector.load %arg11[%c0_49, %c0_50, %c0_51] : memref<2x1x32xf32, #tpu.memory_space<vmem>>, vector<1x1x32xf32>
    %107 = vector.shape_cast %106 : vector<1x1x32xf32> to vector<1x32xf32>
    %cst_52 = arith.constant dense<0.000000e+00> : vector<8xf32>
    %108 = vector.multi_reduction <add>, %103, %cst_52 [1] : vector<8x32xf32> to vector<8xf32>
    %109 = vector.shape_cast %108 : vector<8xf32> to vector<8x1xf32>
    %cst_53 = arith.constant 3.200000e+01 : f32
    %110 = vector.broadcast %cst_53 : f32 to vector<8x1xf32>
    %111 = arith.divf %109, %110 : vector<8x1xf32>
    %112 = vector.broadcast %111 : vector<8x1xf32> to vector<8x32xf32>
    %113 = arith.subf %103, %112 : vector<8x32xf32>
    %114 = arith.mulf %113, %113 : vector<8x32xf32>
    %cst_54 = arith.constant dense<0.000000e+00> : vector<8xf32>
    %115 = vector.multi_reduction <add>, %114, %cst_54 [1] : vector<8x32xf32> to vector<8xf32>
    %116 = vector.shape_cast %115 : vector<8xf32> to vector<8x1xf32>
    %cst_55 = arith.constant 3.200000e+01 : f32
    %117 = vector.broadcast %cst_55 : f32 to vector<8x1xf32>
    %118 = arith.divf %116, %117 : vector<8x1xf32>
    %119 = vector.broadcast %111 : vector<8x1xf32> to vector<8x32xf32>
    %120 = arith.subf %103, %119 : vector<8x32xf32>
    %cst_56 = arith.constant 9.99999974E-6 : f32
    %121 = vector.broadcast %cst_56 : f32 to vector<8x1xf32>
    %122 = arith.addf %118, %121 : vector<8x1xf32>
    %123 = math.rsqrt %122 : vector<8x1xf32>
    %124 = vector.broadcast %123 : vector<8x1xf32> to vector<8x32xf32>
    %125 = arith.mulf %120, %124 : vector<8x32xf32>
    %126 = vector.broadcast %105 : vector<1x32xf32> to vector<8x32xf32>
    %127 = arith.mulf %125, %126 : vector<8x32xf32>
    %128 = vector.broadcast %107 : vector<1x32xf32> to vector<8x32xf32>
    %129 = arith.addf %127, %128 : vector<8x32xf32>
    %c0_57 = arith.constant 0 : index
    %c0_58 = arith.constant 0 : index
    %c0_59 = arith.constant 0 : index
    %130 = vector.load %arg12[%c0_57, %c0_58, %c0_59] : memref<2x32x96xf32, #tpu.memory_space<vmem>>, vector<1x32x96xf32>
    %131 = vector.shape_cast %130 : vector<1x32x96xf32> to vector<32x96xf32>
    %c0_60 = arith.constant 0 : index
    %c0_61 = arith.constant 0 : index
    %c0_62 = arith.constant 0 : index
    %132 = vector.load %arg13[%c0_60, %c0_61, %c0_62] : memref<2x1x96xf32, #tpu.memory_space<vmem>>, vector<1x1x96xf32>
    %133 = vector.shape_cast %132 : vector<1x1x96xf32> to vector<1x96xf32>
    %134 = vector.extract_strided_slice %131 {offsets = [0, 0], sizes = [32, 32], strides = [1, 1]} : vector<32x96xf32> to vector<32x32xf32>
    %cst_63 = arith.constant dense<0.000000e+00> : vector<8x32xf32>
    %135 = tpu.matmul %129, %134, %cst_63 {dimension_numbers = #tpu.dot_dimension_numbers<[1], [0], [0], [1], [0, 0, 1, 1], [], []>} : vector<8x32xf32>, vector<32x32xf32>, vector<8x32xf32> -> vector<8x32xf32>
    %136 = vector.extract_strided_slice %133 {offsets = [0, 0], sizes = [1, 32], strides = [1, 1]} : vector<1x96xf32> to vector<1x32xf32>
    %137 = vector.broadcast %136 : vector<1x32xf32> to vector<8x32xf32>
    %138 = arith.addf %135, %137 : vector<8x32xf32>
    %139 = vector.extract_strided_slice %131 {offsets = [0, 32], sizes = [32, 64], strides = [1, 1]} : vector<32x96xf32> to vector<32x64xf32>
    %cst_64 = arith.constant dense<0.000000e+00> : vector<8x64xf32>
    %140 = tpu.matmul %11, %139, %cst_64 {dimension_numbers = #tpu.dot_dimension_numbers<[1], [0], [0], [1], [0, 0, 1, 1], [], []>} : vector<8x32xf32>, vector<32x64xf32>, vector<8x64xf32> -> vector<8x64xf32>
    %141 = vector.extract_strided_slice %133 {offsets = [0, 32], sizes = [1, 64], strides = [1, 1]} : vector<1x96xf32> to vector<1x64xf32>
    %142 = vector.broadcast %141 : vector<1x64xf32> to vector<8x64xf32>
    %143 = arith.addf %140, %142 : vector<8x64xf32>
    %144 = vector.extract_strided_slice %143 {offsets = [0, 0], sizes = [8, 32], strides = [1, 1]} : vector<8x64xf32> to vector<8x32xf32>
    %145 = vector.extract_strided_slice %143 {offsets = [0, 32], sizes = [8, 32], strides = [1, 1]} : vector<8x64xf32> to vector<8x32xf32>
    %c0_65 = arith.constant 0 : index
    %c0_66 = arith.constant 0 : index
    %c0_67 = arith.constant 0 : index
    %146 = vector.load %arg14[%c0_65, %c0_66, %c0_67] : memref<2x32x32xf32, #tpu.memory_space<vmem>>, vector<1x32x32xf32>
    %147 = vector.shape_cast %146 : vector<1x32x32xf32> to vector<32x32xf32>
    %c0_68 = arith.constant 0 : index
    %c0_69 = arith.constant 0 : index
    %c0_70 = arith.constant 0 : index
    %148 = vector.load %arg15[%c0_68, %c0_69, %c0_70] : memref<2x1x32xf32, #tpu.memory_space<vmem>>, vector<1x1x32xf32>
    %149 = vector.shape_cast %148 : vector<1x1x32xf32> to vector<1x32xf32>
    %150 = vector.extract_strided_slice %138 {offsets = [0, 0], sizes = [8, 8], strides = [1, 1]} : vector<8x32xf32> to vector<8x8xf32>
    %151 = vector.extract_strided_slice %144 {offsets = [0, 0], sizes = [8, 8], strides = [1, 1]} : vector<8x32xf32> to vector<8x8xf32>
    %cst_71 = arith.constant dense<0.000000e+00> : vector<8x8xf32>
    %152 = tpu.matmul %150, %151, %cst_71 {dimension_numbers = #tpu.dot_dimension_numbers<[1], [1], [0], [0], [0, 0, 1, 0], [], []>} : vector<8x8xf32>, vector<8x8xf32>, vector<8x8xf32> -> vector<8x8xf32>
    %cst_72 = arith.constant dense<0xFF800000> : vector<8xf32>
    %153 = vector.multi_reduction <maximumf>, %152, %cst_72 [1] : vector<8x8xf32> to vector<8xf32>
    %154 = vector.shape_cast %153 : vector<8xf32> to vector<8x1xf32>
    %155 = vector.broadcast %154 : vector<8x1xf32> to vector<8x8xf32>
    %156 = arith.subf %152, %155 : vector<8x8xf32>
    %157 = math.exp %156 : vector<8x8xf32>
    %cst_73 = arith.constant dense<0.000000e+00> : vector<8xf32>
    %158 = vector.multi_reduction <add>, %157, %cst_73 [1] : vector<8x8xf32> to vector<8xf32>
    %159 = vector.shape_cast %158 : vector<8xf32> to vector<8x1xf32>
    %160 = tpu.reciprocal %159 {approx = true} : vector<8x1xf32> -> vector<8x1xf32>
    %161 = vector.broadcast %160 : vector<8x1xf32> to vector<8x8xf32>
    %162 = arith.mulf %157, %161 : vector<8x8xf32>
    %163 = vector.extract_strided_slice %145 {offsets = [0, 0], sizes = [8, 8], strides = [1, 1]} : vector<8x32xf32> to vector<8x8xf32>
    %cst_74 = arith.constant dense<0.000000e+00> : vector<8x8xf32>
    %164 = tpu.matmul %162, %163, %cst_74 {dimension_numbers = #tpu.dot_dimension_numbers<[1], [0], [0], [1], [0, 0, 1, 1], [], []>} : vector<8x8xf32>, vector<8x8xf32>, vector<8x8xf32> -> vector<8x8xf32>
    %165 = vector.extract_strided_slice %147 {offsets = [0, 0], sizes = [8, 32], strides = [1, 1]} : vector<32x32xf32> to vector<8x32xf32>
    %cst_75 = arith.constant dense<0.000000e+00> : vector<8x32xf32>
    %166 = tpu.matmul %164, %165, %cst_75 {dimension_numbers = #tpu.dot_dimension_numbers<[1], [0], [0], [1], [0, 0, 1, 1], [], []>} : vector<8x8xf32>, vector<8x32xf32>, vector<8x32xf32> -> vector<8x32xf32>
    %167 = vector.extract_strided_slice %138 {offsets = [0, 8], sizes = [8, 8], strides = [1, 1]} : vector<8x32xf32> to vector<8x8xf32>
    %168 = vector.extract_strided_slice %144 {offsets = [0, 8], sizes = [8, 8], strides = [1, 1]} : vector<8x32xf32> to vector<8x8xf32>
    %cst_76 = arith.constant dense<0.000000e+00> : vector<8x8xf32>
    %169 = tpu.matmul %167, %168, %cst_76 {dimension_numbers = #tpu.dot_dimension_numbers<[1], [1], [0], [0], [0, 0, 1, 0], [], []>} : vector<8x8xf32>, vector<8x8xf32>, vector<8x8xf32> -> vector<8x8xf32>
    %cst_77 = arith.constant dense<0xFF800000> : vector<8xf32>
    %170 = vector.multi_reduction <maximumf>, %169, %cst_77 [1] : vector<8x8xf32> to vector<8xf32>
    %171 = vector.shape_cast %170 : vector<8xf32> to vector<8x1xf32>
    %172 = vector.broadcast %171 : vector<8x1xf32> to vector<8x8xf32>
    %173 = arith.subf %169, %172 : vector<8x8xf32>
    %174 = math.exp %173 : vector<8x8xf32>
    %cst_78 = arith.constant dense<0.000000e+00> : vector<8xf32>
    %175 = vector.multi_reduction <add>, %174, %cst_78 [1] : vector<8x8xf32> to vector<8xf32>
    %176 = vector.shape_cast %175 : vector<8xf32> to vector<8x1xf32>
    %177 = tpu.reciprocal %176 {approx = true} : vector<8x1xf32> -> vector<8x1xf32>
    %178 = vector.broadcast %177 : vector<8x1xf32> to vector<8x8xf32>
    %179 = arith.mulf %174, %178 : vector<8x8xf32>
    %180 = vector.extract_strided_slice %145 {offsets = [0, 8], sizes = [8, 8], strides = [1, 1]} : vector<8x32xf32> to vector<8x8xf32>
    %cst_79 = arith.constant dense<0.000000e+00> : vector<8x8xf32>
    %181 = tpu.matmul %179, %180, %cst_79 {dimension_numbers = #tpu.dot_dimension_numbers<[1], [0], [0], [1], [0, 0, 1, 1], [], []>} : vector<8x8xf32>, vector<8x8xf32>, vector<8x8xf32> -> vector<8x8xf32>
    %182 = vector.extract_strided_slice %147 {offsets = [8, 0], sizes = [8, 32], strides = [1, 1]} : vector<32x32xf32> to vector<8x32xf32>
    %cst_80 = arith.constant dense<0.000000e+00> : vector<8x32xf32>
    %183 = tpu.matmul %181, %182, %cst_80 {dimension_numbers = #tpu.dot_dimension_numbers<[1], [0], [0], [1], [0, 0, 1, 1], [], []>} : vector<8x8xf32>, vector<8x32xf32>, vector<8x32xf32> -> vector<8x32xf32>
    %184 = arith.addf %166, %183 : vector<8x32xf32>
    %185 = vector.extract_strided_slice %138 {offsets = [0, 16], sizes = [8, 8], strides = [1, 1]} : vector<8x32xf32> to vector<8x8xf32>
    %186 = vector.extract_strided_slice %144 {offsets = [0, 16], sizes = [8, 8], strides = [1, 1]} : vector<8x32xf32> to vector<8x8xf32>
    %cst_81 = arith.constant dense<0.000000e+00> : vector<8x8xf32>
    %187 = tpu.matmul %185, %186, %cst_81 {dimension_numbers = #tpu.dot_dimension_numbers<[1], [1], [0], [0], [0, 0, 1, 0], [], []>} : vector<8x8xf32>, vector<8x8xf32>, vector<8x8xf32> -> vector<8x8xf32>
    %cst_82 = arith.constant dense<0xFF800000> : vector<8xf32>
    %188 = vector.multi_reduction <maximumf>, %187, %cst_82 [1] : vector<8x8xf32> to vector<8xf32>
    %189 = vector.shape_cast %188 : vector<8xf32> to vector<8x1xf32>
    %190 = vector.broadcast %189 : vector<8x1xf32> to vector<8x8xf32>
    %191 = arith.subf %187, %190 : vector<8x8xf32>
    %192 = math.exp %191 : vector<8x8xf32>
    %cst_83 = arith.constant dense<0.000000e+00> : vector<8xf32>
    %193 = vector.multi_reduction <add>, %192, %cst_83 [1] : vector<8x8xf32> to vector<8xf32>
    %194 = vector.shape_cast %193 : vector<8xf32> to vector<8x1xf32>
    %195 = tpu.reciprocal %194 {approx = true} : vector<8x1xf32> -> vector<8x1xf32>
    %196 = vector.broadcast %195 : vector<8x1xf32> to vector<8x8xf32>
    %197 = arith.mulf %192, %196 : vector<8x8xf32>
    %198 = vector.extract_strided_slice %145 {offsets = [0, 16], sizes = [8, 8], strides = [1, 1]} : vector<8x32xf32> to vector<8x8xf32>
    %cst_84 = arith.constant dense<0.000000e+00> : vector<8x8xf32>
    %199 = tpu.matmul %197, %198, %cst_84 {dimension_numbers = #tpu.dot_dimension_numbers<[1], [0], [0], [1], [0, 0, 1, 1], [], []>} : vector<8x8xf32>, vector<8x8xf32>, vector<8x8xf32> -> vector<8x8xf32>
    %200 = vector.extract_strided_slice %147 {offsets = [16, 0], sizes = [8, 32], strides = [1, 1]} : vector<32x32xf32> to vector<8x32xf32>
    %cst_85 = arith.constant dense<0.000000e+00> : vector<8x32xf32>
    %201 = tpu.matmul %199, %200, %cst_85 {dimension_numbers = #tpu.dot_dimension_numbers<[1], [0], [0], [1], [0, 0, 1, 1], [], []>} : vector<8x8xf32>, vector<8x32xf32>, vector<8x32xf32> -> vector<8x32xf32>
    %202 = arith.addf %184, %201 : vector<8x32xf32>
    %203 = vector.extract_strided_slice %138 {offsets = [0, 24], sizes = [8, 8], strides = [1, 1]} : vector<8x32xf32> to vector<8x8xf32>
    %204 = vector.extract_strided_slice %144 {offsets = [0, 24], sizes = [8, 8], strides = [1, 1]} : vector<8x32xf32> to vector<8x8xf32>
    %cst_86 = arith.constant dense<0.000000e+00> : vector<8x8xf32>
    %205 = tpu.matmul %203, %204, %cst_86 {dimension_numbers = #tpu.dot_dimension_numbers<[1], [1], [0], [0], [0, 0, 1, 0], [], []>} : vector<8x8xf32>, vector<8x8xf32>, vector<8x8xf32> -> vector<8x8xf32>
    %cst_87 = arith.constant dense<0xFF800000> : vector<8xf32>
    %206 = vector.multi_reduction <maximumf>, %205, %cst_87 [1] : vector<8x8xf32> to vector<8xf32>
    %207 = vector.shape_cast %206 : vector<8xf32> to vector<8x1xf32>
    %208 = vector.broadcast %207 : vector<8x1xf32> to vector<8x8xf32>
    %209 = arith.subf %205, %208 : vector<8x8xf32>
    %210 = math.exp %209 : vector<8x8xf32>
    %cst_88 = arith.constant dense<0.000000e+00> : vector<8xf32>
    %211 = vector.multi_reduction <add>, %210, %cst_88 [1] : vector<8x8xf32> to vector<8xf32>
    %212 = vector.shape_cast %211 : vector<8xf32> to vector<8x1xf32>
    %213 = tpu.reciprocal %212 {approx = true} : vector<8x1xf32> -> vector<8x1xf32>
    %214 = vector.broadcast %213 : vector<8x1xf32> to vector<8x8xf32>
    %215 = arith.mulf %210, %214 : vector<8x8xf32>
    %216 = vector.extract_strided_slice %145 {offsets = [0, 24], sizes = [8, 8], strides = [1, 1]} : vector<8x32xf32> to vector<8x8xf32>
    %cst_89 = arith.constant dense<0.000000e+00> : vector<8x8xf32>
    %217 = tpu.matmul %215, %216, %cst_89 {dimension_numbers = #tpu.dot_dimension_numbers<[1], [0], [0], [1], [0, 0, 1, 1], [], []>} : vector<8x8xf32>, vector<8x8xf32>, vector<8x8xf32> -> vector<8x8xf32>
    %218 = vector.extract_strided_slice %147 {offsets = [24, 0], sizes = [8, 32], strides = [1, 1]} : vector<32x32xf32> to vector<8x32xf32>
    %cst_90 = arith.constant dense<0.000000e+00> : vector<8x32xf32>
    %219 = tpu.matmul %217, %218, %cst_90 {dimension_numbers = #tpu.dot_dimension_numbers<[1], [0], [0], [1], [0, 0, 1, 1], [], []>} : vector<8x8xf32>, vector<8x32xf32>, vector<8x32xf32> -> vector<8x32xf32>
    %220 = arith.addf %202, %219 : vector<8x32xf32>
    %221 = vector.broadcast %149 : vector<1x32xf32> to vector<8x32xf32>
    %222 = arith.addf %220, %221 : vector<8x32xf32>
    %223 = arith.addf %129, %222 : vector<8x32xf32>
    %c0_91 = arith.constant 0 : index
    %c0_92 = arith.constant 0 : index
    %c0_93 = arith.constant 0 : index
    %224 = vector.load %arg16[%c0_91, %c0_92, %c0_93] : memref<2x1x32xf32, #tpu.memory_space<vmem>>, vector<1x1x32xf32>
    %225 = vector.shape_cast %224 : vector<1x1x32xf32> to vector<1x32xf32>
    %c0_94 = arith.constant 0 : index
    %c0_95 = arith.constant 0 : index
    %c0_96 = arith.constant 0 : index
    %226 = vector.load %arg17[%c0_94, %c0_95, %c0_96] : memref<2x1x32xf32, #tpu.memory_space<vmem>>, vector<1x1x32xf32>
    %227 = vector.shape_cast %226 : vector<1x1x32xf32> to vector<1x32xf32>
    %cst_97 = arith.constant dense<0.000000e+00> : vector<8xf32>
    %228 = vector.multi_reduction <add>, %223, %cst_97 [1] : vector<8x32xf32> to vector<8xf32>
    %229 = vector.shape_cast %228 : vector<8xf32> to vector<8x1xf32>
    %cst_98 = arith.constant 3.200000e+01 : f32
    %230 = vector.broadcast %cst_98 : f32 to vector<8x1xf32>
    %231 = arith.divf %229, %230 : vector<8x1xf32>
    %232 = vector.broadcast %231 : vector<8x1xf32> to vector<8x32xf32>
    %233 = arith.subf %223, %232 : vector<8x32xf32>
    %234 = arith.mulf %233, %233 : vector<8x32xf32>
    %cst_99 = arith.constant dense<0.000000e+00> : vector<8xf32>
    %235 = vector.multi_reduction <add>, %234, %cst_99 [1] : vector<8x32xf32> to vector<8xf32>
    %236 = vector.shape_cast %235 : vector<8xf32> to vector<8x1xf32>
    %cst_100 = arith.constant 3.200000e+01 : f32
    %237 = vector.broadcast %cst_100 : f32 to vector<8x1xf32>
    %238 = arith.divf %236, %237 : vector<8x1xf32>
    %239 = vector.broadcast %231 : vector<8x1xf32> to vector<8x32xf32>
    %240 = arith.subf %223, %239 : vector<8x32xf32>
    %cst_101 = arith.constant 9.99999974E-6 : f32
    %241 = vector.broadcast %cst_101 : f32 to vector<8x1xf32>
    %242 = arith.addf %238, %241 : vector<8x1xf32>
    %243 = math.rsqrt %242 : vector<8x1xf32>
    %244 = vector.broadcast %243 : vector<8x1xf32> to vector<8x32xf32>
    %245 = arith.mulf %240, %244 : vector<8x32xf32>
    %246 = vector.broadcast %225 : vector<1x32xf32> to vector<8x32xf32>
    %247 = arith.mulf %245, %246 : vector<8x32xf32>
    %248 = vector.broadcast %227 : vector<1x32xf32> to vector<8x32xf32>
    %249 = arith.addf %247, %248 : vector<8x32xf32>
    %c0_102 = arith.constant 0 : index
    %c0_103 = arith.constant 0 : index
    %c0_104 = arith.constant 0 : index
    %250 = vector.load %arg18[%c0_102, %c0_103, %c0_104] : memref<2x32x64xf32, #tpu.memory_space<vmem>>, vector<1x32x64xf32>
    %251 = vector.shape_cast %250 : vector<1x32x64xf32> to vector<32x64xf32>
    %cst_105 = arith.constant dense<0.000000e+00> : vector<8x64xf32>
    %252 = tpu.matmul %249, %251, %cst_105 {dimension_numbers = #tpu.dot_dimension_numbers<[1], [0], [0], [1], [0, 0, 1, 1], [], []>} : vector<8x32xf32>, vector<32x64xf32>, vector<8x64xf32> -> vector<8x64xf32>
    %c0_106 = arith.constant 0 : index
    %c0_107 = arith.constant 0 : index
    %c0_108 = arith.constant 0 : index
    %253 = vector.load %arg19[%c0_106, %c0_107, %c0_108] : memref<2x1x64xf32, #tpu.memory_space<vmem>>, vector<1x1x64xf32>
    %254 = vector.shape_cast %253 : vector<1x1x64xf32> to vector<1x64xf32>
    %255 = vector.broadcast %254 : vector<1x64xf32> to vector<8x64xf32>
    %256 = arith.addf %252, %255 : vector<8x64xf32>
    %cst_109 = arith.constant 0.000000e+00 : f32
    %257 = vector.broadcast %cst_109 : f32 to vector<8x64xf32>
    %258 = arith.maximumf %256, %257 : vector<8x64xf32>
    %c0_110 = arith.constant 0 : index
    %c0_111 = arith.constant 0 : index
    %c0_112 = arith.constant 0 : index
    %259 = vector.load %arg20[%c0_110, %c0_111, %c0_112] : memref<2x64x32xf32, #tpu.memory_space<vmem>>, vector<1x64x32xf32>
    %260 = vector.shape_cast %259 : vector<1x64x32xf32> to vector<64x32xf32>
    %cst_113 = arith.constant dense<0.000000e+00> : vector<8x32xf32>
    %261 = tpu.matmul %258, %260, %cst_113 {dimension_numbers = #tpu.dot_dimension_numbers<[1], [0], [0], [1], [0, 0, 1, 1], [], []>} : vector<8x64xf32>, vector<64x32xf32>, vector<8x32xf32> -> vector<8x32xf32>
    %262 = arith.addf %249, %261 : vector<8x32xf32>
    %c0_114 = arith.constant 0 : index
    %c0_115 = arith.constant 0 : index
    %c0_116 = arith.constant 0 : index
    %263 = vector.load %arg21[%c0_114, %c0_115, %c0_116] : memref<2x1x32xf32, #tpu.memory_space<vmem>>, vector<1x1x32xf32>
    %264 = vector.shape_cast %263 : vector<1x1x32xf32> to vector<1x32xf32>
    %265 = vector.broadcast %264 : vector<1x32xf32> to vector<8x32xf32>
    %266 = arith.addf %262, %265 : vector<8x32xf32>
    %c0_117 = arith.constant 0 : index
    %c0_118 = arith.constant 0 : index
    %c0_119 = arith.constant 0 : index
    %267 = vector.load %arg22[%c0_117, %c0_118, %c0_119] : memref<2x1x32xf32, #tpu.memory_space<vmem>>, vector<1x1x32xf32>
    %268 = vector.shape_cast %267 : vector<1x1x32xf32> to vector<1x32xf32>
    %c0_120 = arith.constant 0 : index
    %c0_121 = arith.constant 0 : index
    %c0_122 = arith.constant 0 : index
    %269 = vector.load %arg23[%c0_120, %c0_121, %c0_122] : memref<2x1x32xf32, #tpu.memory_space<vmem>>, vector<1x1x32xf32>
    %270 = vector.shape_cast %269 : vector<1x1x32xf32> to vector<1x32xf32>
    %cst_123 = arith.constant dense<0.000000e+00> : vector<8xf32>
    %271 = vector.multi_reduction <add>, %266, %cst_123 [1] : vector<8x32xf32> to vector<8xf32>
    %272 = vector.shape_cast %271 : vector<8xf32> to vector<8x1xf32>
    %cst_124 = arith.constant 3.200000e+01 : f32
    %273 = vector.broadcast %cst_124 : f32 to vector<8x1xf32>
    %274 = arith.divf %272, %273 : vector<8x1xf32>
    %275 = vector.broadcast %274 : vector<8x1xf32> to vector<8x32xf32>
    %276 = arith.subf %266, %275 : vector<8x32xf32>
    %277 = arith.mulf %276, %276 : vector<8x32xf32>
    %cst_125 = arith.constant dense<0.000000e+00> : vector<8xf32>
    %278 = vector.multi_reduction <add>, %277, %cst_125 [1] : vector<8x32xf32> to vector<8xf32>
    %279 = vector.shape_cast %278 : vector<8xf32> to vector<8x1xf32>
    %cst_126 = arith.constant 3.200000e+01 : f32
    %280 = vector.broadcast %cst_126 : f32 to vector<8x1xf32>
    %281 = arith.divf %279, %280 : vector<8x1xf32>
    %282 = vector.broadcast %274 : vector<8x1xf32> to vector<8x32xf32>
    %283 = arith.subf %266, %282 : vector<8x32xf32>
    %cst_127 = arith.constant 9.99999974E-6 : f32
    %284 = vector.broadcast %cst_127 : f32 to vector<8x1xf32>
    %285 = arith.addf %281, %284 : vector<8x1xf32>
    %286 = math.rsqrt %285 : vector<8x1xf32>
    %287 = vector.broadcast %286 : vector<8x1xf32> to vector<8x32xf32>
    %288 = arith.mulf %283, %287 : vector<8x32xf32>
    %289 = vector.broadcast %268 : vector<1x32xf32> to vector<8x32xf32>
    %290 = arith.mulf %288, %289 : vector<8x32xf32>
    %291 = vector.broadcast %270 : vector<1x32xf32> to vector<8x32xf32>
    %292 = arith.addf %290, %291 : vector<8x32xf32>
    %c1 = arith.constant 1 : index
    %c0_128 = arith.constant 0 : index
    %c0_129 = arith.constant 0 : index
    %293 = vector.load %arg6[%c1, %c0_128, %c0_129] : memref<2x32x96xf32, #tpu.memory_space<vmem>>, vector<1x32x96xf32>
    %294 = vector.shape_cast %293 : vector<1x32x96xf32> to vector<32x96xf32>
    %cst_130 = arith.constant dense<0.000000e+00> : vector<8x96xf32>
    %295 = tpu.matmul %292, %294, %cst_130 {dimension_numbers = #tpu.dot_dimension_numbers<[1], [0], [0], [1], [0, 0, 1, 1], [], []>} : vector<8x32xf32>, vector<32x96xf32>, vector<8x96xf32> -> vector<8x96xf32>
    %c1_131 = arith.constant 1 : index
    %c0_132 = arith.constant 0 : index
    %c0_133 = arith.constant 0 : index
    %296 = vector.load %arg7[%c1_131, %c0_132, %c0_133] : memref<2x1x96xf32, #tpu.memory_space<vmem>>, vector<1x1x96xf32>
    %297 = vector.shape_cast %296 : vector<1x1x96xf32> to vector<1x96xf32>
    %298 = vector.broadcast %297 : vector<1x96xf32> to vector<8x96xf32>
    %299 = arith.addf %295, %298 : vector<8x96xf32>
    %300 = vector.extract_strided_slice %299 {offsets = [0, 0], sizes = [8, 32], strides = [1, 1]} : vector<8x96xf32> to vector<8x32xf32>
    %301 = vector.extract_strided_slice %299 {offsets = [0, 32], sizes = [8, 32], strides = [1, 1]} : vector<8x96xf32> to vector<8x32xf32>
    %302 = vector.extract_strided_slice %299 {offsets = [0, 64], sizes = [8, 32], strides = [1, 1]} : vector<8x96xf32> to vector<8x32xf32>
    %c1_134 = arith.constant 1 : index
    %c0_135 = arith.constant 0 : index
    %c0_136 = arith.constant 0 : index
    %303 = vector.load %arg8[%c1_134, %c0_135, %c0_136] : memref<2x32x32xf32, #tpu.memory_space<vmem>>, vector<1x32x32xf32>
    %304 = vector.shape_cast %303 : vector<1x32x32xf32> to vector<32x32xf32>
    %c1_137 = arith.constant 1 : index
    %c0_138 = arith.constant 0 : index
    %c0_139 = arith.constant 0 : index
    %305 = vector.load %arg9[%c1_137, %c0_138, %c0_139] : memref<2x1x32xf32, #tpu.memory_space<vmem>>, vector<1x1x32xf32>
    %306 = vector.shape_cast %305 : vector<1x1x32xf32> to vector<1x32xf32>
    %307 = vector.extract_strided_slice %300 {offsets = [0, 0], sizes = [8, 8], strides = [1, 1]} : vector<8x32xf32> to vector<8x8xf32>
    %308 = vector.extract_strided_slice %301 {offsets = [0, 0], sizes = [8, 8], strides = [1, 1]} : vector<8x32xf32> to vector<8x8xf32>
    %cst_140 = arith.constant dense<0.000000e+00> : vector<8x8xf32>
    %309 = tpu.matmul %307, %308, %cst_140 {dimension_numbers = #tpu.dot_dimension_numbers<[1], [1], [0], [0], [0, 0, 1, 0], [], []>} : vector<8x8xf32>, vector<8x8xf32>, vector<8x8xf32> -> vector<8x8xf32>
    %310 = arith.addf %309, %0 : vector<8x8xf32>
    %cst_141 = arith.constant dense<0xFF800000> : vector<8xf32>
    %311 = vector.multi_reduction <maximumf>, %310, %cst_141 [1] : vector<8x8xf32> to vector<8xf32>
    %312 = vector.shape_cast %311 : vector<8xf32> to vector<8x1xf32>
    %313 = vector.broadcast %312 : vector<8x1xf32> to vector<8x8xf32>
    %314 = arith.subf %310, %313 : vector<8x8xf32>
    %315 = math.exp %314 : vector<8x8xf32>
    %cst_142 = arith.constant dense<0.000000e+00> : vector<8xf32>
    %316 = vector.multi_reduction <add>, %315, %cst_142 [1] : vector<8x8xf32> to vector<8xf32>
    %317 = vector.shape_cast %316 : vector<8xf32> to vector<8x1xf32>
    %318 = tpu.reciprocal %317 {approx = true} : vector<8x1xf32> -> vector<8x1xf32>
    %319 = vector.broadcast %318 : vector<8x1xf32> to vector<8x8xf32>
    %320 = arith.mulf %315, %319 : vector<8x8xf32>
    %321 = vector.extract_strided_slice %302 {offsets = [0, 0], sizes = [8, 8], strides = [1, 1]} : vector<8x32xf32> to vector<8x8xf32>
    %cst_143 = arith.constant dense<0.000000e+00> : vector<8x8xf32>
    %322 = tpu.matmul %320, %321, %cst_143 {dimension_numbers = #tpu.dot_dimension_numbers<[1], [0], [0], [1], [0, 0, 1, 1], [], []>} : vector<8x8xf32>, vector<8x8xf32>, vector<8x8xf32> -> vector<8x8xf32>
    %323 = vector.extract_strided_slice %304 {offsets = [0, 0], sizes = [8, 32], strides = [1, 1]} : vector<32x32xf32> to vector<8x32xf32>
    %cst_144 = arith.constant dense<0.000000e+00> : vector<8x32xf32>
    %324 = tpu.matmul %322, %323, %cst_144 {dimension_numbers = #tpu.dot_dimension_numbers<[1], [0], [0], [1], [0, 0, 1, 1], [], []>} : vector<8x8xf32>, vector<8x32xf32>, vector<8x32xf32> -> vector<8x32xf32>
    %325 = vector.extract_strided_slice %300 {offsets = [0, 8], sizes = [8, 8], strides = [1, 1]} : vector<8x32xf32> to vector<8x8xf32>
    %326 = vector.extract_strided_slice %301 {offsets = [0, 8], sizes = [8, 8], strides = [1, 1]} : vector<8x32xf32> to vector<8x8xf32>
    %cst_145 = arith.constant dense<0.000000e+00> : vector<8x8xf32>
    %327 = tpu.matmul %325, %326, %cst_145 {dimension_numbers = #tpu.dot_dimension_numbers<[1], [1], [0], [0], [0, 0, 1, 0], [], []>} : vector<8x8xf32>, vector<8x8xf32>, vector<8x8xf32> -> vector<8x8xf32>
    %328 = arith.addf %327, %0 : vector<8x8xf32>
    %cst_146 = arith.constant dense<0xFF800000> : vector<8xf32>
    %329 = vector.multi_reduction <maximumf>, %328, %cst_146 [1] : vector<8x8xf32> to vector<8xf32>
    %330 = vector.shape_cast %329 : vector<8xf32> to vector<8x1xf32>
    %331 = vector.broadcast %330 : vector<8x1xf32> to vector<8x8xf32>
    %332 = arith.subf %328, %331 : vector<8x8xf32>
    %333 = math.exp %332 : vector<8x8xf32>
    %cst_147 = arith.constant dense<0.000000e+00> : vector<8xf32>
    %334 = vector.multi_reduction <add>, %333, %cst_147 [1] : vector<8x8xf32> to vector<8xf32>
    %335 = vector.shape_cast %334 : vector<8xf32> to vector<8x1xf32>
    %336 = tpu.reciprocal %335 {approx = true} : vector<8x1xf32> -> vector<8x1xf32>
    %337 = vector.broadcast %336 : vector<8x1xf32> to vector<8x8xf32>
    %338 = arith.mulf %333, %337 : vector<8x8xf32>
    %339 = vector.extract_strided_slice %302 {offsets = [0, 8], sizes = [8, 8], strides = [1, 1]} : vector<8x32xf32> to vector<8x8xf32>
    %cst_148 = arith.constant dense<0.000000e+00> : vector<8x8xf32>
    %340 = tpu.matmul %338, %339, %cst_148 {dimension_numbers = #tpu.dot_dimension_numbers<[1], [0], [0], [1], [0, 0, 1, 1], [], []>} : vector<8x8xf32>, vector<8x8xf32>, vector<8x8xf32> -> vector<8x8xf32>
    %341 = vector.extract_strided_slice %304 {offsets = [8, 0], sizes = [8, 32], strides = [1, 1]} : vector<32x32xf32> to vector<8x32xf32>
    %cst_149 = arith.constant dense<0.000000e+00> : vector<8x32xf32>
    %342 = tpu.matmul %340, %341, %cst_149 {dimension_numbers = #tpu.dot_dimension_numbers<[1], [0], [0], [1], [0, 0, 1, 1], [], []>} : vector<8x8xf32>, vector<8x32xf32>, vector<8x32xf32> -> vector<8x32xf32>
    %343 = arith.addf %324, %342 : vector<8x32xf32>
    %344 = vector.extract_strided_slice %300 {offsets = [0, 16], sizes = [8, 8], strides = [1, 1]} : vector<8x32xf32> to vector<8x8xf32>
    %345 = vector.extract_strided_slice %301 {offsets = [0, 16], sizes = [8, 8], strides = [1, 1]} : vector<8x32xf32> to vector<8x8xf32>
    %cst_150 = arith.constant dense<0.000000e+00> : vector<8x8xf32>
    %346 = tpu.matmul %344, %345, %cst_150 {dimension_numbers = #tpu.dot_dimension_numbers<[1], [1], [0], [0], [0, 0, 1, 0], [], []>} : vector<8x8xf32>, vector<8x8xf32>, vector<8x8xf32> -> vector<8x8xf32>
    %347 = arith.addf %346, %0 : vector<8x8xf32>
    %cst_151 = arith.constant dense<0xFF800000> : vector<8xf32>
    %348 = vector.multi_reduction <maximumf>, %347, %cst_151 [1] : vector<8x8xf32> to vector<8xf32>
    %349 = vector.shape_cast %348 : vector<8xf32> to vector<8x1xf32>
    %350 = vector.broadcast %349 : vector<8x1xf32> to vector<8x8xf32>
    %351 = arith.subf %347, %350 : vector<8x8xf32>
    %352 = math.exp %351 : vector<8x8xf32>
    %cst_152 = arith.constant dense<0.000000e+00> : vector<8xf32>
    %353 = vector.multi_reduction <add>, %352, %cst_152 [1] : vector<8x8xf32> to vector<8xf32>
    %354 = vector.shape_cast %353 : vector<8xf32> to vector<8x1xf32>
    %355 = tpu.reciprocal %354 {approx = true} : vector<8x1xf32> -> vector<8x1xf32>
    %356 = vector.broadcast %355 : vector<8x1xf32> to vector<8x8xf32>
    %357 = arith.mulf %352, %356 : vector<8x8xf32>
    %358 = vector.extract_strided_slice %302 {offsets = [0, 16], sizes = [8, 8], strides = [1, 1]} : vector<8x32xf32> to vector<8x8xf32>
    %cst_153 = arith.constant dense<0.000000e+00> : vector<8x8xf32>
    %359 = tpu.matmul %357, %358, %cst_153 {dimension_numbers = #tpu.dot_dimension_numbers<[1], [0], [0], [1], [0, 0, 1, 1], [], []>} : vector<8x8xf32>, vector<8x8xf32>, vector<8x8xf32> -> vector<8x8xf32>
    %360 = vector.extract_strided_slice %304 {offsets = [16, 0], sizes = [8, 32], strides = [1, 1]} : vector<32x32xf32> to vector<8x32xf32>
    %cst_154 = arith.constant dense<0.000000e+00> : vector<8x32xf32>
    %361 = tpu.matmul %359, %360, %cst_154 {dimension_numbers = #tpu.dot_dimension_numbers<[1], [0], [0], [1], [0, 0, 1, 1], [], []>} : vector<8x8xf32>, vector<8x32xf32>, vector<8x32xf32> -> vector<8x32xf32>
    %362 = arith.addf %343, %361 : vector<8x32xf32>
    %363 = vector.extract_strided_slice %300 {offsets = [0, 24], sizes = [8, 8], strides = [1, 1]} : vector<8x32xf32> to vector<8x8xf32>
    %364 = vector.extract_strided_slice %301 {offsets = [0, 24], sizes = [8, 8], strides = [1, 1]} : vector<8x32xf32> to vector<8x8xf32>
    %cst_155 = arith.constant dense<0.000000e+00> : vector<8x8xf32>
    %365 = tpu.matmul %363, %364, %cst_155 {dimension_numbers = #tpu.dot_dimension_numbers<[1], [1], [0], [0], [0, 0, 1, 0], [], []>} : vector<8x8xf32>, vector<8x8xf32>, vector<8x8xf32> -> vector<8x8xf32>
    %366 = arith.addf %365, %0 : vector<8x8xf32>
    %cst_156 = arith.constant dense<0xFF800000> : vector<8xf32>
    %367 = vector.multi_reduction <maximumf>, %366, %cst_156 [1] : vector<8x8xf32> to vector<8xf32>
    %368 = vector.shape_cast %367 : vector<8xf32> to vector<8x1xf32>
    %369 = vector.broadcast %368 : vector<8x1xf32> to vector<8x8xf32>
    %370 = arith.subf %366, %369 : vector<8x8xf32>
    %371 = math.exp %370 : vector<8x8xf32>
    %cst_157 = arith.constant dense<0.000000e+00> : vector<8xf32>
    %372 = vector.multi_reduction <add>, %371, %cst_157 [1] : vector<8x8xf32> to vector<8xf32>
    %373 = vector.shape_cast %372 : vector<8xf32> to vector<8x1xf32>
    %374 = tpu.reciprocal %373 {approx = true} : vector<8x1xf32> -> vector<8x1xf32>
    %375 = vector.broadcast %374 : vector<8x1xf32> to vector<8x8xf32>
    %376 = arith.mulf %371, %375 : vector<8x8xf32>
    %377 = vector.extract_strided_slice %302 {offsets = [0, 24], sizes = [8, 8], strides = [1, 1]} : vector<8x32xf32> to vector<8x8xf32>
    %cst_158 = arith.constant dense<0.000000e+00> : vector<8x8xf32>
    %378 = tpu.matmul %376, %377, %cst_158 {dimension_numbers = #tpu.dot_dimension_numbers<[1], [0], [0], [1], [0, 0, 1, 1], [], []>} : vector<8x8xf32>, vector<8x8xf32>, vector<8x8xf32> -> vector<8x8xf32>
    %379 = vector.extract_strided_slice %304 {offsets = [24, 0], sizes = [8, 32], strides = [1, 1]} : vector<32x32xf32> to vector<8x32xf32>
    %cst_159 = arith.constant dense<0.000000e+00> : vector<8x32xf32>
    %380 = tpu.matmul %378, %379, %cst_159 {dimension_numbers = #tpu.dot_dimension_numbers<[1], [0], [0], [1], [0, 0, 1, 1], [], []>} : vector<8x8xf32>, vector<8x32xf32>, vector<8x32xf32> -> vector<8x32xf32>
    %381 = arith.addf %362, %380 : vector<8x32xf32>
    %382 = vector.broadcast %306 : vector<1x32xf32> to vector<8x32xf32>
    %383 = arith.addf %381, %382 : vector<8x32xf32>
    %384 = arith.addf %292, %383 : vector<8x32xf32>
    %c1_160 = arith.constant 1 : index
    %c0_161 = arith.constant 0 : index
    %c0_162 = arith.constant 0 : index
    %385 = vector.load %arg10[%c1_160, %c0_161, %c0_162] : memref<2x1x32xf32, #tpu.memory_space<vmem>>, vector<1x1x32xf32>
    %386 = vector.shape_cast %385 : vector<1x1x32xf32> to vector<1x32xf32>
    %c1_163 = arith.constant 1 : index
    %c0_164 = arith.constant 0 : index
    %c0_165 = arith.constant 0 : index
    %387 = vector.load %arg11[%c1_163, %c0_164, %c0_165] : memref<2x1x32xf32, #tpu.memory_space<vmem>>, vector<1x1x32xf32>
    %388 = vector.shape_cast %387 : vector<1x1x32xf32> to vector<1x32xf32>
    %cst_166 = arith.constant dense<0.000000e+00> : vector<8xf32>
    %389 = vector.multi_reduction <add>, %384, %cst_166 [1] : vector<8x32xf32> to vector<8xf32>
    %390 = vector.shape_cast %389 : vector<8xf32> to vector<8x1xf32>
    %cst_167 = arith.constant 3.200000e+01 : f32
    %391 = vector.broadcast %cst_167 : f32 to vector<8x1xf32>
    %392 = arith.divf %390, %391 : vector<8x1xf32>
    %393 = vector.broadcast %392 : vector<8x1xf32> to vector<8x32xf32>
    %394 = arith.subf %384, %393 : vector<8x32xf32>
    %395 = arith.mulf %394, %394 : vector<8x32xf32>
    %cst_168 = arith.constant dense<0.000000e+00> : vector<8xf32>
    %396 = vector.multi_reduction <add>, %395, %cst_168 [1] : vector<8x32xf32> to vector<8xf32>
    %397 = vector.shape_cast %396 : vector<8xf32> to vector<8x1xf32>
    %cst_169 = arith.constant 3.200000e+01 : f32
    %398 = vector.broadcast %cst_169 : f32 to vector<8x1xf32>
    %399 = arith.divf %397, %398 : vector<8x1xf32>
    %400 = vector.broadcast %392 : vector<8x1xf32> to vector<8x32xf32>
    %401 = arith.subf %384, %400 : vector<8x32xf32>
    %cst_170 = arith.constant 9.99999974E-6 : f32
    %402 = vector.broadcast %cst_170 : f32 to vector<8x1xf32>
    %403 = arith.addf %399, %402 : vector<8x1xf32>
    %404 = math.rsqrt %403 : vector<8x1xf32>
    %405 = vector.broadcast %404 : vector<8x1xf32> to vector<8x32xf32>
    %406 = arith.mulf %401, %405 : vector<8x32xf32>
    %407 = vector.broadcast %386 : vector<1x32xf32> to vector<8x32xf32>
    %408 = arith.mulf %406, %407 : vector<8x32xf32>
    %409 = vector.broadcast %388 : vector<1x32xf32> to vector<8x32xf32>
    %410 = arith.addf %408, %409 : vector<8x32xf32>
    %c1_171 = arith.constant 1 : index
    %c0_172 = arith.constant 0 : index
    %c0_173 = arith.constant 0 : index
    %411 = vector.load %arg12[%c1_171, %c0_172, %c0_173] : memref<2x32x96xf32, #tpu.memory_space<vmem>>, vector<1x32x96xf32>
    %412 = vector.shape_cast %411 : vector<1x32x96xf32> to vector<32x96xf32>
    %c1_174 = arith.constant 1 : index
    %c0_175 = arith.constant 0 : index
    %c0_176 = arith.constant 0 : index
    %413 = vector.load %arg13[%c1_174, %c0_175, %c0_176] : memref<2x1x96xf32, #tpu.memory_space<vmem>>, vector<1x1x96xf32>
    %414 = vector.shape_cast %413 : vector<1x1x96xf32> to vector<1x96xf32>
    %415 = vector.extract_strided_slice %412 {offsets = [0, 0], sizes = [32, 32], strides = [1, 1]} : vector<32x96xf32> to vector<32x32xf32>
    %cst_177 = arith.constant dense<0.000000e+00> : vector<8x32xf32>
    %416 = tpu.matmul %410, %415, %cst_177 {dimension_numbers = #tpu.dot_dimension_numbers<[1], [0], [0], [1], [0, 0, 1, 1], [], []>} : vector<8x32xf32>, vector<32x32xf32>, vector<8x32xf32> -> vector<8x32xf32>
    %417 = vector.extract_strided_slice %414 {offsets = [0, 0], sizes = [1, 32], strides = [1, 1]} : vector<1x96xf32> to vector<1x32xf32>
    %418 = vector.broadcast %417 : vector<1x32xf32> to vector<8x32xf32>
    %419 = arith.addf %416, %418 : vector<8x32xf32>
    %420 = vector.extract_strided_slice %412 {offsets = [0, 32], sizes = [32, 64], strides = [1, 1]} : vector<32x96xf32> to vector<32x64xf32>
    %cst_178 = arith.constant dense<0.000000e+00> : vector<8x64xf32>
    %421 = tpu.matmul %11, %420, %cst_178 {dimension_numbers = #tpu.dot_dimension_numbers<[1], [0], [0], [1], [0, 0, 1, 1], [], []>} : vector<8x32xf32>, vector<32x64xf32>, vector<8x64xf32> -> vector<8x64xf32>
    %422 = vector.extract_strided_slice %414 {offsets = [0, 32], sizes = [1, 64], strides = [1, 1]} : vector<1x96xf32> to vector<1x64xf32>
    %423 = vector.broadcast %422 : vector<1x64xf32> to vector<8x64xf32>
    %424 = arith.addf %421, %423 : vector<8x64xf32>
    %425 = vector.extract_strided_slice %424 {offsets = [0, 0], sizes = [8, 32], strides = [1, 1]} : vector<8x64xf32> to vector<8x32xf32>
    %426 = vector.extract_strided_slice %424 {offsets = [0, 32], sizes = [8, 32], strides = [1, 1]} : vector<8x64xf32> to vector<8x32xf32>
    %c1_179 = arith.constant 1 : index
    %c0_180 = arith.constant 0 : index
    %c0_181 = arith.constant 0 : index
    %427 = vector.load %arg14[%c1_179, %c0_180, %c0_181] : memref<2x32x32xf32, #tpu.memory_space<vmem>>, vector<1x32x32xf32>
    %428 = vector.shape_cast %427 : vector<1x32x32xf32> to vector<32x32xf32>
    %c1_182 = arith.constant 1 : index
    %c0_183 = arith.constant 0 : index
    %c0_184 = arith.constant 0 : index
    %429 = vector.load %arg15[%c1_182, %c0_183, %c0_184] : memref<2x1x32xf32, #tpu.memory_space<vmem>>, vector<1x1x32xf32>
    %430 = vector.shape_cast %429 : vector<1x1x32xf32> to vector<1x32xf32>
    %431 = vector.extract_strided_slice %419 {offsets = [0, 0], sizes = [8, 8], strides = [1, 1]} : vector<8x32xf32> to vector<8x8xf32>
    %432 = vector.extract_strided_slice %425 {offsets = [0, 0], sizes = [8, 8], strides = [1, 1]} : vector<8x32xf32> to vector<8x8xf32>
    %cst_185 = arith.constant dense<0.000000e+00> : vector<8x8xf32>
    %433 = tpu.matmul %431, %432, %cst_185 {dimension_numbers = #tpu.dot_dimension_numbers<[1], [1], [0], [0], [0, 0, 1, 0], [], []>} : vector<8x8xf32>, vector<8x8xf32>, vector<8x8xf32> -> vector<8x8xf32>
    %cst_186 = arith.constant dense<0xFF800000> : vector<8xf32>
    %434 = vector.multi_reduction <maximumf>, %433, %cst_186 [1] : vector<8x8xf32> to vector<8xf32>
    %435 = vector.shape_cast %434 : vector<8xf32> to vector<8x1xf32>
    %436 = vector.broadcast %435 : vector<8x1xf32> to vector<8x8xf32>
    %437 = arith.subf %433, %436 : vector<8x8xf32>
    %438 = math.exp %437 : vector<8x8xf32>
    %cst_187 = arith.constant dense<0.000000e+00> : vector<8xf32>
    %439 = vector.multi_reduction <add>, %438, %cst_187 [1] : vector<8x8xf32> to vector<8xf32>
    %440 = vector.shape_cast %439 : vector<8xf32> to vector<8x1xf32>
    %441 = tpu.reciprocal %440 {approx = true} : vector<8x1xf32> -> vector<8x1xf32>
    %442 = vector.broadcast %441 : vector<8x1xf32> to vector<8x8xf32>
    %443 = arith.mulf %438, %442 : vector<8x8xf32>
    %444 = vector.extract_strided_slice %426 {offsets = [0, 0], sizes = [8, 8], strides = [1, 1]} : vector<8x32xf32> to vector<8x8xf32>
    %cst_188 = arith.constant dense<0.000000e+00> : vector<8x8xf32>
    %445 = tpu.matmul %443, %444, %cst_188 {dimension_numbers = #tpu.dot_dimension_numbers<[1], [0], [0], [1], [0, 0, 1, 1], [], []>} : vector<8x8xf32>, vector<8x8xf32>, vector<8x8xf32> -> vector<8x8xf32>
    %446 = vector.extract_strided_slice %428 {offsets = [0, 0], sizes = [8, 32], strides = [1, 1]} : vector<32x32xf32> to vector<8x32xf32>
    %cst_189 = arith.constant dense<0.000000e+00> : vector<8x32xf32>
    %447 = tpu.matmul %445, %446, %cst_189 {dimension_numbers = #tpu.dot_dimension_numbers<[1], [0], [0], [1], [0, 0, 1, 1], [], []>} : vector<8x8xf32>, vector<8x32xf32>, vector<8x32xf32> -> vector<8x32xf32>
    %448 = vector.extract_strided_slice %419 {offsets = [0, 8], sizes = [8, 8], strides = [1, 1]} : vector<8x32xf32> to vector<8x8xf32>
    %449 = vector.extract_strided_slice %425 {offsets = [0, 8], sizes = [8, 8], strides = [1, 1]} : vector<8x32xf32> to vector<8x8xf32>
    %cst_190 = arith.constant dense<0.000000e+00> : vector<8x8xf32>
    %450 = tpu.matmul %448, %449, %cst_190 {dimension_numbers = #tpu.dot_dimension_numbers<[1], [1], [0], [0], [0, 0, 1, 0], [], []>} : vector<8x8xf32>, vector<8x8xf32>, vector<8x8xf32> -> vector<8x8xf32>
    %cst_191 = arith.constant dense<0xFF800000> : vector<8xf32>
    %451 = vector.multi_reduction <maximumf>, %450, %cst_191 [1] : vector<8x8xf32> to vector<8xf32>
    %452 = vector.shape_cast %451 : vector<8xf32> to vector<8x1xf32>
    %453 = vector.broadcast %452 : vector<8x1xf32> to vector<8x8xf32>
    %454 = arith.subf %450, %453 : vector<8x8xf32>
    %455 = math.exp %454 : vector<8x8xf32>
    %cst_192 = arith.constant dense<0.000000e+00> : vector<8xf32>
    %456 = vector.multi_reduction <add>, %455, %cst_192 [1] : vector<8x8xf32> to vector<8xf32>
    %457 = vector.shape_cast %456 : vector<8xf32> to vector<8x1xf32>
    %458 = tpu.reciprocal %457 {approx = true} : vector<8x1xf32> -> vector<8x1xf32>
    %459 = vector.broadcast %458 : vector<8x1xf32> to vector<8x8xf32>
    %460 = arith.mulf %455, %459 : vector<8x8xf32>
    %461 = vector.extract_strided_slice %426 {offsets = [0, 8], sizes = [8, 8], strides = [1, 1]} : vector<8x32xf32> to vector<8x8xf32>
    %cst_193 = arith.constant dense<0.000000e+00> : vector<8x8xf32>
    %462 = tpu.matmul %460, %461, %cst_193 {dimension_numbers = #tpu.dot_dimension_numbers<[1], [0], [0], [1], [0, 0, 1, 1], [], []>} : vector<8x8xf32>, vector<8x8xf32>, vector<8x8xf32> -> vector<8x8xf32>
    %463 = vector.extract_strided_slice %428 {offsets = [8, 0], sizes = [8, 32], strides = [1, 1]} : vector<32x32xf32> to vector<8x32xf32>
    %cst_194 = arith.constant dense<0.000000e+00> : vector<8x32xf32>
    %464 = tpu.matmul %462, %463, %cst_194 {dimension_numbers = #tpu.dot_dimension_numbers<[1], [0], [0], [1], [0, 0, 1, 1], [], []>} : vector<8x8xf32>, vector<8x32xf32>, vector<8x32xf32> -> vector<8x32xf32>
    %465 = arith.addf %447, %464 : vector<8x32xf32>
    %466 = vector.extract_strided_slice %419 {offsets = [0, 16], sizes = [8, 8], strides = [1, 1]} : vector<8x32xf32> to vector<8x8xf32>
    %467 = vector.extract_strided_slice %425 {offsets = [0, 16], sizes = [8, 8], strides = [1, 1]} : vector<8x32xf32> to vector<8x8xf32>
    %cst_195 = arith.constant dense<0.000000e+00> : vector<8x8xf32>
    %468 = tpu.matmul %466, %467, %cst_195 {dimension_numbers = #tpu.dot_dimension_numbers<[1], [1], [0], [0], [0, 0, 1, 0], [], []>} : vector<8x8xf32>, vector<8x8xf32>, vector<8x8xf32> -> vector<8x8xf32>
    %cst_196 = arith.constant dense<0xFF800000> : vector<8xf32>
    %469 = vector.multi_reduction <maximumf>, %468, %cst_196 [1] : vector<8x8xf32> to vector<8xf32>
    %470 = vector.shape_cast %469 : vector<8xf32> to vector<8x1xf32>
    %471 = vector.broadcast %470 : vector<8x1xf32> to vector<8x8xf32>
    %472 = arith.subf %468, %471 : vector<8x8xf32>
    %473 = math.exp %472 : vector<8x8xf32>
    %cst_197 = arith.constant dense<0.000000e+00> : vector<8xf32>
    %474 = vector.multi_reduction <add>, %473, %cst_197 [1] : vector<8x8xf32> to vector<8xf32>
    %475 = vector.shape_cast %474 : vector<8xf32> to vector<8x1xf32>
    %476 = tpu.reciprocal %475 {approx = true} : vector<8x1xf32> -> vector<8x1xf32>
    %477 = vector.broadcast %476 : vector<8x1xf32> to vector<8x8xf32>
    %478 = arith.mulf %473, %477 : vector<8x8xf32>
    %479 = vector.extract_strided_slice %426 {offsets = [0, 16], sizes = [8, 8], strides = [1, 1]} : vector<8x32xf32> to vector<8x8xf32>
    %cst_198 = arith.constant dense<0.000000e+00> : vector<8x8xf32>
    %480 = tpu.matmul %478, %479, %cst_198 {dimension_numbers = #tpu.dot_dimension_numbers<[1], [0], [0], [1], [0, 0, 1, 1], [], []>} : vector<8x8xf32>, vector<8x8xf32>, vector<8x8xf32> -> vector<8x8xf32>
    %481 = vector.extract_strided_slice %428 {offsets = [16, 0], sizes = [8, 32], strides = [1, 1]} : vector<32x32xf32> to vector<8x32xf32>
    %cst_199 = arith.constant dense<0.000000e+00> : vector<8x32xf32>
    %482 = tpu.matmul %480, %481, %cst_199 {dimension_numbers = #tpu.dot_dimension_numbers<[1], [0], [0], [1], [0, 0, 1, 1], [], []>} : vector<8x8xf32>, vector<8x32xf32>, vector<8x32xf32> -> vector<8x32xf32>
    %483 = arith.addf %465, %482 : vector<8x32xf32>
    %484 = vector.extract_strided_slice %419 {offsets = [0, 24], sizes = [8, 8], strides = [1, 1]} : vector<8x32xf32> to vector<8x8xf32>
    %485 = vector.extract_strided_slice %425 {offsets = [0, 24], sizes = [8, 8], strides = [1, 1]} : vector<8x32xf32> to vector<8x8xf32>
    %cst_200 = arith.constant dense<0.000000e+00> : vector<8x8xf32>
    %486 = tpu.matmul %484, %485, %cst_200 {dimension_numbers = #tpu.dot_dimension_numbers<[1], [1], [0], [0], [0, 0, 1, 0], [], []>} : vector<8x8xf32>, vector<8x8xf32>, vector<8x8xf32> -> vector<8x8xf32>
    %cst_201 = arith.constant dense<0xFF800000> : vector<8xf32>
    %487 = vector.multi_reduction <maximumf>, %486, %cst_201 [1] : vector<8x8xf32> to vector<8xf32>
    %488 = vector.shape_cast %487 : vector<8xf32> to vector<8x1xf32>
    %489 = vector.broadcast %488 : vector<8x1xf32> to vector<8x8xf32>
    %490 = arith.subf %486, %489 : vector<8x8xf32>
    %491 = math.exp %490 : vector<8x8xf32>
    %cst_202 = arith.constant dense<0.000000e+00> : vector<8xf32>
    %492 = vector.multi_reduction <add>, %491, %cst_202 [1] : vector<8x8xf32> to vector<8xf32>
    %493 = vector.shape_cast %492 : vector<8xf32> to vector<8x1xf32>
    %494 = tpu.reciprocal %493 {approx = true} : vector<8x1xf32> -> vector<8x1xf32>
    %495 = vector.broadcast %494 : vector<8x1xf32> to vector<8x8xf32>
    %496 = arith.mulf %491, %495 : vector<8x8xf32>
    %497 = vector.extract_strided_slice %426 {offsets = [0, 24], sizes = [8, 8], strides = [1, 1]} : vector<8x32xf32> to vector<8x8xf32>
    %cst_203 = arith.constant dense<0.000000e+00> : vector<8x8xf32>
    %498 = tpu.matmul %496, %497, %cst_203 {dimension_numbers = #tpu.dot_dimension_numbers<[1], [0], [0], [1], [0, 0, 1, 1], [], []>} : vector<8x8xf32>, vector<8x8xf32>, vector<8x8xf32> -> vector<8x8xf32>
    %499 = vector.extract_strided_slice %428 {offsets = [24, 0], sizes = [8, 32], strides = [1, 1]} : vector<32x32xf32> to vector<8x32xf32>
    %cst_204 = arith.constant dense<0.000000e+00> : vector<8x32xf32>
    %500 = tpu.matmul %498, %499, %cst_204 {dimension_numbers = #tpu.dot_dimension_numbers<[1], [0], [0], [1], [0, 0, 1, 1], [], []>} : vector<8x8xf32>, vector<8x32xf32>, vector<8x32xf32> -> vector<8x32xf32>
    %501 = arith.addf %483, %500 : vector<8x32xf32>
    %502 = vector.broadcast %430 : vector<1x32xf32> to vector<8x32xf32>
    %503 = arith.addf %501, %502 : vector<8x32xf32>
    %504 = arith.addf %410, %503 : vector<8x32xf32>
    %c1_205 = arith.constant 1 : index
    %c0_206 = arith.constant 0 : index
    %c0_207 = arith.constant 0 : index
    %505 = vector.load %arg16[%c1_205, %c0_206, %c0_207] : memref<2x1x32xf32, #tpu.memory_space<vmem>>, vector<1x1x32xf32>
    %506 = vector.shape_cast %505 : vector<1x1x32xf32> to vector<1x32xf32>
    %c1_208 = arith.constant 1 : index
    %c0_209 = arith.constant 0 : index
    %c0_210 = arith.constant 0 : index
    %507 = vector.load %arg17[%c1_208, %c0_209, %c0_210] : memref<2x1x32xf32, #tpu.memory_space<vmem>>, vector<1x1x32xf32>
    %508 = vector.shape_cast %507 : vector<1x1x32xf32> to vector<1x32xf32>
    %cst_211 = arith.constant dense<0.000000e+00> : vector<8xf32>
    %509 = vector.multi_reduction <add>, %504, %cst_211 [1] : vector<8x32xf32> to vector<8xf32>
    %510 = vector.shape_cast %509 : vector<8xf32> to vector<8x1xf32>
    %cst_212 = arith.constant 3.200000e+01 : f32
    %511 = vector.broadcast %cst_212 : f32 to vector<8x1xf32>
    %512 = arith.divf %510, %511 : vector<8x1xf32>
    %513 = vector.broadcast %512 : vector<8x1xf32> to vector<8x32xf32>
    %514 = arith.subf %504, %513 : vector<8x32xf32>
    %515 = arith.mulf %514, %514 : vector<8x32xf32>
    %cst_213 = arith.constant dense<0.000000e+00> : vector<8xf32>
    %516 = vector.multi_reduction <add>, %515, %cst_213 [1] : vector<8x32xf32> to vector<8xf32>
    %517 = vector.shape_cast %516 : vector<8xf32> to vector<8x1xf32>
    %cst_214 = arith.constant 3.200000e+01 : f32
    %518 = vector.broadcast %cst_214 : f32 to vector<8x1xf32>
    %519 = arith.divf %517, %518 : vector<8x1xf32>
    %520 = vector.broadcast %512 : vector<8x1xf32> to vector<8x32xf32>
    %521 = arith.subf %504, %520 : vector<8x32xf32>
    %cst_215 = arith.constant 9.99999974E-6 : f32
    %522 = vector.broadcast %cst_215 : f32 to vector<8x1xf32>
    %523 = arith.addf %519, %522 : vector<8x1xf32>
    %524 = math.rsqrt %523 : vector<8x1xf32>
    %525 = vector.broadcast %524 : vector<8x1xf32> to vector<8x32xf32>
    %526 = arith.mulf %521, %525 : vector<8x32xf32>
    %527 = vector.broadcast %506 : vector<1x32xf32> to vector<8x32xf32>
    %528 = arith.mulf %526, %527 : vector<8x32xf32>
    %529 = vector.broadcast %508 : vector<1x32xf32> to vector<8x32xf32>
    %530 = arith.addf %528, %529 : vector<8x32xf32>
    %c1_216 = arith.constant 1 : index
    %c0_217 = arith.constant 0 : index
    %c0_218 = arith.constant 0 : index
    %531 = vector.load %arg18[%c1_216, %c0_217, %c0_218] : memref<2x32x64xf32, #tpu.memory_space<vmem>>, vector<1x32x64xf32>
    %532 = vector.shape_cast %531 : vector<1x32x64xf32> to vector<32x64xf32>
    %cst_219 = arith.constant dense<0.000000e+00> : vector<8x64xf32>
    %533 = tpu.matmul %530, %532, %cst_219 {dimension_numbers = #tpu.dot_dimension_numbers<[1], [0], [0], [1], [0, 0, 1, 1], [], []>} : vector<8x32xf32>, vector<32x64xf32>, vector<8x64xf32> -> vector<8x64xf32>
    %c1_220 = arith.constant 1 : index
    %c0_221 = arith.constant 0 : index
    %c0_222 = arith.constant 0 : index
    %534 = vector.load %arg19[%c1_220, %c0_221, %c0_222] : memref<2x1x64xf32, #tpu.memory_space<vmem>>, vector<1x1x64xf32>
    %535 = vector.shape_cast %534 : vector<1x1x64xf32> to vector<1x64xf32>
    %536 = vector.broadcast %535 : vector<1x64xf32> to vector<8x64xf32>
    %537 = arith.addf %533, %536 : vector<8x64xf32>
    %cst_223 = arith.constant 0.000000e+00 : f32
    %538 = vector.broadcast %cst_223 : f32 to vector<8x64xf32>
    %539 = arith.maximumf %537, %538 : vector<8x64xf32>
    %c1_224 = arith.constant 1 : index
    %c0_225 = arith.constant 0 : index
    %c0_226 = arith.constant 0 : index
    %540 = vector.load %arg20[%c1_224, %c0_225, %c0_226] : memref<2x64x32xf32, #tpu.memory_space<vmem>>, vector<1x64x32xf32>
    %541 = vector.shape_cast %540 : vector<1x64x32xf32> to vector<64x32xf32>
    %cst_227 = arith.constant dense<0.000000e+00> : vector<8x32xf32>
    %542 = tpu.matmul %539, %541, %cst_227 {dimension_numbers = #tpu.dot_dimension_numbers<[1], [0], [0], [1], [0, 0, 1, 1], [], []>} : vector<8x64xf32>, vector<64x32xf32>, vector<8x32xf32> -> vector<8x32xf32>
    %543 = arith.addf %530, %542 : vector<8x32xf32>
    %c1_228 = arith.constant 1 : index
    %c0_229 = arith.constant 0 : index
    %c0_230 = arith.constant 0 : index
    %544 = vector.load %arg21[%c1_228, %c0_229, %c0_230] : memref<2x1x32xf32, #tpu.memory_space<vmem>>, vector<1x1x32xf32>
    %545 = vector.shape_cast %544 : vector<1x1x32xf32> to vector<1x32xf32>
    %546 = vector.broadcast %545 : vector<1x32xf32> to vector<8x32xf32>
    %547 = arith.addf %543, %546 : vector<8x32xf32>
    %c1_231 = arith.constant 1 : index
    %c0_232 = arith.constant 0 : index
    %c0_233 = arith.constant 0 : index
    %548 = vector.load %arg22[%c1_231, %c0_232, %c0_233] : memref<2x1x32xf32, #tpu.memory_space<vmem>>, vector<1x1x32xf32>
    %549 = vector.shape_cast %548 : vector<1x1x32xf32> to vector<1x32xf32>
    %c1_234 = arith.constant 1 : index
    %c0_235 = arith.constant 0 : index
    %c0_236 = arith.constant 0 : index
    %550 = vector.load %arg23[%c1_234, %c0_235, %c0_236] : memref<2x1x32xf32, #tpu.memory_space<vmem>>, vector<1x1x32xf32>
    %551 = vector.shape_cast %550 : vector<1x1x32xf32> to vector<1x32xf32>
    %cst_237 = arith.constant dense<0.000000e+00> : vector<8xf32>
    %552 = vector.multi_reduction <add>, %547, %cst_237 [1] : vector<8x32xf32> to vector<8xf32>
    %553 = vector.shape_cast %552 : vector<8xf32> to vector<8x1xf32>
    %cst_238 = arith.constant 3.200000e+01 : f32
    %554 = vector.broadcast %cst_238 : f32 to vector<8x1xf32>
    %555 = arith.divf %553, %554 : vector<8x1xf32>
    %556 = vector.broadcast %555 : vector<8x1xf32> to vector<8x32xf32>
    %557 = arith.subf %547, %556 : vector<8x32xf32>
    %558 = arith.mulf %557, %557 : vector<8x32xf32>
    %cst_239 = arith.constant dense<0.000000e+00> : vector<8xf32>
    %559 = vector.multi_reduction <add>, %558, %cst_239 [1] : vector<8x32xf32> to vector<8xf32>
    %560 = vector.shape_cast %559 : vector<8xf32> to vector<8x1xf32>
    %cst_240 = arith.constant 3.200000e+01 : f32
    %561 = vector.broadcast %cst_240 : f32 to vector<8x1xf32>
    %562 = arith.divf %560, %561 : vector<8x1xf32>
    %563 = vector.broadcast %555 : vector<8x1xf32> to vector<8x32xf32>
    %564 = arith.subf %547, %563 : vector<8x32xf32>
    %cst_241 = arith.constant 9.99999974E-6 : f32
    %565 = vector.broadcast %cst_241 : f32 to vector<8x1xf32>
    %566 = arith.addf %562, %565 : vector<8x1xf32>
    %567 = math.rsqrt %566 : vector<8x1xf32>
    %568 = vector.broadcast %567 : vector<8x1xf32> to vector<8x32xf32>
    %569 = arith.mulf %564, %568 : vector<8x32xf32>
    %570 = vector.broadcast %549 : vector<1x32xf32> to vector<8x32xf32>
    %571 = arith.mulf %569, %570 : vector<8x32xf32>
    %572 = vector.broadcast %551 : vector<1x32xf32> to vector<8x32xf32>
    %573 = arith.addf %571, %572 : vector<8x32xf32>
    %c0_242 = arith.constant 0 : index
    %c0_243 = arith.constant 0 : index
    %c0_244 = arith.constant 0 : index
    %574 = vector.load %arg25[%c0_242, %c0_243, %c0_244] : memref<1x8x32xf32, #tpu.memory_space<vmem>>, vector<1x8x32xf32>
    %575 = vector.shape_cast %574 : vector<1x8x32xf32> to vector<8x32xf32>
    %576 = vector.shape_cast %573 : vector<8x32xf32> to vector<1x8x32xf32>
    tpu.vector_store %arg25[%c0_242, %c0_243, %c0_244], %576 {strides = array<i32>} : memref<1x8x32xf32, #tpu.memory_space<vmem>>, vector<1x8x32xf32>,
    return
  }
  func.func @transform_0(%arg0: i32) -> (i32, i32, i32) {
    %c0_i32 = arith.constant 0 : i32
    %c0_i32_0 = arith.constant 0 : i32
    %c0_i32_1 = arith.constant 0 : i32
    return %arg0, %c0_i32, %c0_i32_0 : i32, i32, i32
  }
  func.func @transform_1(%arg0: i32) -> (i32, i32, i32) {
    %c0_i32 = arith.constant 0 : i32
    %c0_i32_0 = arith.constant 0 : i32
    %c0_i32_1 = arith.constant 0 : i32
    return %arg0, %c0_i32, %c0_i32_0 : i32, i32, i32
  }
  func.func @transform_2(%arg0: i32) -> (i32, i32) {
    %c0_i32 = arith.constant 0 : i32
    %c0_i32_0 = arith.constant 0 : i32
    %c0_i32_1 = arith.constant 0 : i32
    return %c0_i32, %c0_i32_0 : i32, i32
  }
  func.func @transform_3(%arg0: i32) -> (i32, i32) {
    %c0_i32 = arith.constant 0 : i32
    %c0_i32_0 = arith.constant 0 : i32
    %c0_i32_1 = arith.constant 0 : i32
    return %c0_i32, %c0_i32_0 : i32, i32
  }
  func.func @transform_4(%arg0: i32) -> (i32, i32) {
    %c0_i32 = arith.constant 0 : i32
    %c0_i32_0 = arith.constant 0 : i32
    %c0_i32_1 = arith.constant 0 : i32
    return %c0_i32, %c0_i32_0 : i32, i32
  }
  func.func @transform_5(%arg0: i32) -> (i32, i32, i32) {
    %c0_i32 = arith.constant 0 : i32
    %c0_i32_0 = arith.constant 0 : i32
    %c0_i32_1 = arith.constant 0 : i32
    %c0_i32_2 = arith.constant 0 : i32
    return %c0_i32, %c0_i32_0, %c0_i32_1 : i32, i32, i32
  }
  func.func @transform_6(%arg0: i32) -> (i32, i32, i32) {
    %c0_i32 = arith.constant 0 : i32
    %c0_i32_0 = arith.constant 0 : i32
    %c0_i32_1 = arith.constant 0 : i32
    %c0_i32_2 = arith.constant 0 : i32
    return %c0_i32, %c0_i32_0, %c0_i32_1 : i32, i32, i32
  }
  func.func @transform_7(%arg0: i32) -> (i32, i32, i32) {
    %c0_i32 = arith.constant 0 : i32
    %c0_i32_0 = arith.constant 0 : i32
    %c0_i32_1 = arith.constant 0 : i32
    %c0_i32_2 = arith.constant 0 : i32
    return %c0_i32, %c0_i32_0, %c0_i32_1 : i32, i32, i32
  }
  func.func @transform_8(%arg0: i32) -> (i32, i32, i32) {
    %c0_i32 = arith.constant 0 : i32
    %c0_i32_0 = arith.constant 0 : i32
    %c0_i32_1 = arith.constant 0 : i32
    %c0_i32_2 = arith.constant 0 : i32
    return %c0_i32, %c0_i32_0, %c0_i32_1 : i32, i32, i32
  }
  func.func @transform_9(%arg0: i32) -> (i32, i32, i32) {
    %c0_i32 = arith.constant 0 : i32
    %c0_i32_0 = arith.constant 0 : i32
    %c0_i32_1 = arith.constant 0 : i32
    %c0_i32_2 = arith.constant 0 : i32
    return %c0_i32, %c0_i32_0, %c0_i32_1 : i32, i32, i32
  }
  func.func @transform_10(%arg0: i32) -> (i32, i32, i32) {
    %c0_i32 = arith.constant 0 : i32
    %c0_i32_0 = arith.constant 0 : i32
    %c0_i32_1 = arith.constant 0 : i32
    %c0_i32_2 = arith.constant 0 : i32
    return %c0_i32, %c0_i32_0, %c0_i32_1 : i32, i32, i32
  }
  func.func @transform_11(%arg0: i32) -> (i32, i32, i32) {
    %c0_i32 = arith.constant 0 : i32
    %c0_i32_0 = arith.constant 0 : i32
    %c0_i32_1 = arith.constant 0 : i32
    %c0_i32_2 = arith.constant 0 : i32
    return %c0_i32, %c0_i32_0, %c0_i32_1 : i32, i32, i32
  }
  func.func @transform_12(%arg0: i32) -> (i32, i32, i32) {
    %c0_i32 = arith.constant 0 : i32
    %c0_i32_0 = arith.constant 0 : i32
    %c0_i32_1 = arith.constant 0 : i32
    %c0_i32_2 = arith.constant 0 : i32
    return %c0_i32, %c0_i32_0, %c0_i32_1 : i32, i32, i32
  }
  func.func @transform_13(%arg0: i32) -> (i32, i32, i32) {
    %c0_i32 = arith.constant 0 : i32
    %c0_i32_0 = arith.constant 0 : i32
    %c0_i32_1 = arith.constant 0 : i32
    %c0_i32_2 = arith.constant 0 : i32
    return %c0_i32, %c0_i32_0, %c0_i32_1 : i32, i32, i32
  }
  func.func @transform_14(%arg0: i32) -> (i32, i32, i32) {
    %c0_i32 = arith.constant 0 : i32
    %c0_i32_0 = arith.constant 0 : i32
    %c0_i32_1 = arith.constant 0 : i32
    %c0_i32_2 = arith.constant 0 : i32
    return %c0_i32, %c0_i32_0, %c0_i32_1 : i32, i32, i32
  }
  func.func @transform_15(%arg0: i32) -> (i32, i32, i32) {
    %c0_i32 = arith.constant 0 : i32
    %c0_i32_0 = arith.constant 0 : i32
    %c0_i32_1 = arith.constant 0 : i32
    %c0_i32_2 = arith.constant 0 : i32
    return %c0_i32, %c0_i32_0, %c0_i32_1 : i32, i32, i32
  }
  func.func @transform_16(%arg0: i32) -> (i32, i32, i32) {
    %c0_i32 = arith.constant 0 : i32
    %c0_i32_0 = arith.constant 0 : i32
    %c0_i32_1 = arith.constant 0 : i32
    %c0_i32_2 = arith.constant 0 : i32
    return %c0_i32, %c0_i32_0, %c0_i32_1 : i32, i32, i32
  }
  func.func @transform_17(%arg0: i32) -> (i32, i32, i32) {
    %c0_i32 = arith.constant 0 : i32
    %c0_i32_0 = arith.constant 0 : i32
    %c0_i32_1 = arith.constant 0 : i32
    %c0_i32_2 = arith.constant 0 : i32
    return %c0_i32, %c0_i32_0, %c0_i32_1 : i32, i32, i32
  }
  func.func @transform_18(%arg0: i32) -> (i32, i32, i32) {
    %c0_i32 = arith.constant 0 : i32
    %c0_i32_0 = arith.constant 0 : i32
    %c0_i32_1 = arith.constant 0 : i32
    %c0_i32_2 = arith.constant 0 : i32
    return %c0_i32, %c0_i32_0, %c0_i32_1 : i32, i32, i32
  }
  func.func @transform_19(%arg0: i32) -> (i32, i32, i32) {
    %c0_i32 = arith.constant 0 : i32
    %c0_i32_0 = arith.constant 0 : i32
    %c0_i32_1 = arith.constant 0 : i32
    %c0_i32_2 = arith.constant 0 : i32
    return %c0_i32, %c0_i32_0, %c0_i32_1 : i32, i32, i32
  }
  func.func @transform_20(%arg0: i32) -> (i32, i32, i32) {
    %c0_i32 = arith.constant 0 : i32
    %c0_i32_0 = arith.constant 0 : i32
    %c0_i32_1 = arith.constant 0 : i32
    %c0_i32_2 = arith.constant 0 : i32
    return %c0_i32, %c0_i32_0, %c0_i32_1 : i32, i32, i32
  }
  func.func @transform_21(%arg0: i32) -> (i32, i32, i32) {
    %c0_i32 = arith.constant 0 : i32
    %c0_i32_0 = arith.constant 0 : i32
    %c0_i32_1 = arith.constant 0 : i32
    %c0_i32_2 = arith.constant 0 : i32
    return %c0_i32, %c0_i32_0, %c0_i32_1 : i32, i32, i32
  }
  func.func @transform_22(%arg0: i32) -> (i32, i32, i32) {
    %c0_i32 = arith.constant 0 : i32
    %c0_i32_0 = arith.constant 0 : i32
    %c0_i32_1 = arith.constant 0 : i32
    %c0_i32_2 = arith.constant 0 : i32
    return %c0_i32, %c0_i32_0, %c0_i32_1 : i32, i32, i32
  }
  func.func @transform_23(%arg0: i32) -> (i32, i32) {
    %c0_i32 = arith.constant 0 : i32
    %c0_i32_0 = arith.constant 0 : i32
    %c0_i32_1 = arith.constant 0 : i32
    return %c0_i32, %c0_i32_0 : i32, i32
  }
  func.func @transform_24(%arg0: i32) -> (i32, i32, i32) {
    %c0_i32 = arith.constant 0 : i32
    %c0_i32_0 = arith.constant 0 : i32
    %c0_i32_1 = arith.constant 0 : i32
    return %arg0, %c0_i32, %c0_i32_0 : i32, i32, i32
  }
}

</mosaic_0001>

<bundles_post_ra>
// kernel: transformer_decoder_forward.1
= control target key start
LH: loop header
LB: loop body
LE: loop exit
PB: predicated region body
PF: predicated region fallthrough
CT: control target
= control target key end

     0   :  { %s7665_s0 = inlined_call_operand.vmem [shape: f32[2,8,4], index: 0, kind: input, shape index: {}]   ;;  %s7666_s1 = inlined_call_operand.vmem [shape: f32[2,8,32], index: 1, kind: input, shape index: {}]   ;;  %s7667_s2 = inlined_call_operand.vmem [shape: f32[4,32], index: 2, kind: input, shape index: {}]   ;;  %s7668_s3 = inlined_call_operand.vmem [shape: f32[1,32], index: 3, kind: input, shape index: {}]   ;;  %s7669_s4 = inlined_call_operand.vmem [shape: f32[8,32], index: 4, kind: input, shape index: {}]   ;;  %s7670_s5 = inlined_call_operand.vmem [shape: f32[2,32,96], index: 5, kind: input, shape index: {}]   ;;  %s7671_s6 = inlined_call_operand.vmem [shape: f32[2,1,96], index: 6, kind: input, shape index: {}]   ;;  %s7672_s7 = inlined_call_operand.vmem [shape: f32[2,32,32], index: 7, kind: input, shape index: {}]   ;;  %s7673_s8 = inlined_call_operand.vmem [shape: f32[2,1,32], index: 8, kind: input, shape index: {}]   ;;  %s7674_s9 = inlined_call_operand.vmem [shape: f32[2,1,32], index: 9, kind: input, shape index: {}]   ;;  %s7675_s10 = inlined_call_operand.vmem [shape: f32[2,1,32], index: 10, kind: input, shape index: {}]   ;;  %s7676_s11 = inlined_call_operand.vmem [shape: f32[2,32,96], index: 11, kind: input, shape index: {}]   ;;  %s7677_s12 = inlined_call_operand.vmem [shape: f32[2,1,96], index: 12, kind: input, shape index: {}]   ;;  %s7678_s13 = inlined_call_operand.hbm [shape: f32[2,32,32], index: 13, kind: input, shape index: {}]   ;;  %s7679_s14 = inlined_call_operand.vmem [shape: f32[2,1,32], index: 14, kind: input, shape index: {}]   ;;  %s7680_s15 = inlined_call_operand.vmem [shape: f32[2,1,32], index: 15, kind: input, shape index: {}]   ;;  %s7681_s16 = inlined_call_operand.vmem [shape: f32[2,1,32], index: 16, kind: input, shape index: {}]   ;;  %s7682_s17 = inlined_call_operand.vmem [shape: f32[2,32,64], index: 17, kind: input, shape index: {}]   ;;  %s7683_s18 = inlined_call_operand.vmem [shape: f32[2,1,64], index: 18, kind: input, shape index: {}]   ;;  %s7684_s19 = inlined_call_operand.vmem [shape: f32[2,64,32], index: 19, kind: input, shape index: {}]   ;;  %s7685_s20 = inlined_call_operand.vmem [shape: f32[2,1,32], index: 20, kind: input, shape index: {}]   ;;  %s7686_s21 = inlined_call_operand.vmem [shape: f32[2,1,32], index: 21, kind: input, shape index: {}]   ;;  %s7687_s22 = inlined_call_operand.vmem [shape: f32[2,1,32], index: 22, kind: input, shape index: {}]   ;;  %s7688_s23 = inlined_call_operand.vmem [shape: f32[8,8], index: 23, kind: input, shape index: {}]   ;;  %s7689_s24 = inlined_call_operand.vmem [shape: f32[2,8,32], index: 24, kind: output, shape index: {}]  }
   0x1   :  { %7717 = sst [smem:[#allocation7_spill]] %s7665_s0 }
   0x2   :  { %7718 = sst [smem:[#allocation8_spill]] %s7666_s1 }
   0x3   :  { %7719 = sst [smem:[#allocation9_spill]] %s7667_s2 }
   0x4   :  { %7720 = sst [smem:[#allocation10_spill]] %s7668_s3 }
   0x5   :  { %7721 = sst [smem:[#allocation11_spill]] %s7669_s4 }
   0x6   :  { %7722 = sst [smem:[#allocation12_spill]] %s7670_s5 }
   0x7   :  { %7723 = sst [smem:[#allocation13_spill]] %s7671_s6 }
   0x8   :  { %7724 = sst [smem:[#allocation14_spill]] %s7672_s7 }
   0x9   :  { %7725 = sst [smem:[#allocation15_spill]] %s7673_s8 }
   0xa   :  { %7726 = sst [smem:[#allocation16_spill]] %s7678_s13 }
   0xb   :  { %7727 = sst [smem:[#allocation17_spill]] %s7679_s14 }
   0xc   :  { %7728 = sst [smem:[#allocation18_spill]] %s7682_s17 }
   0xd   :  { %7729 = sst [smem:[#allocation19_spill]] %s7689_s24 }
   0xe   :  { %29 = vsyncpa [#allocation3], 0  ;;  %s6921_s5 = smov 0  }
   0xf LB: > { %7730 = sst [smem:[#allocation5_spill]] %s6777_s5  ;;  %s6927_s26 = sadd.s32 4294967295, %s6777_s5   ;;  %s6777_s5 = sphi %s6921_s5, %s35_s5  }
  0x10   : > { %p5861_p0 = scmp.ge.s32.totalorder %s6777_s5, 1  ;;  %p580_p1 = scmp.lt.s32.totalorder %s6777_s5, 3 }
  0x11   : > { %s6779_s27 = smov [#allocation2]   ;;  %p7694_p3 = scmp.eq.s32.totalorder %s6927_s26, 0 }
  0x12   : > { %s625_s28 = sshll.u32 %s6779_s27, 4  ;;  %p6931_p2 = pnand %p5861_p0, %p580_p1  ;;  %s626_s28 = int_to_ptr.vmem [resolvable:$true] %s625_s28 }
  0x13   : > { %s7733_s13 = sld [smem:[#allocation16_spill]] }
  0x14   : > { %s7731_s6 = scalar_select %p6931_p2, 1, 0 }
  0x15   : > { %p6611_p4 = pneg %p6931_p2 }
  0x17   : > { %p6940_p5 = pnand %p7694_p3, %p6611_p4 }
  0x19   : > { %s6739_s7 = scalar_lea.hbm %s7733_s13, 1024  ;;  %p6741_p7 = pneg %p6940_p5 }
  0x1a   : > { %p6740_p6 = scmp.ne.s32.totalorder %s7733_s13, %s6739_s7  ;;  %p6746_p10 = scmp.lt.u32.totalorder %s6739_s7, %s7733_s13 }
  0x1c   : > { %p6742_p8 = pnand %p6741_p7, %p6740_p6 }
  0x1e   : > { %p6743_p9 = pneg %p6742_p8 }
  0x20   : > { %p6748_p11 = pnand %p6746_p10, %p6743_p9 }
  0x22   : > { %6751 = shalt.err (!%p6748_p11)
}
  0x23   : > { %s6752_s4 = scalar_lea.vmem %s626_s28, 1024  ;;  %p6760_p1 = scmp.lt.s32.totalorder %s626_s28, %s626_s28 }
  0x24   : > { %p6753_p12 = scmp.ne.s32.totalorder %s626_s28, %s6752_s4  ;;  %p6761_p4 = scmp.lt.s32.totalorder %s6752_s4, %s6752_s4 }
  0x26   : > { %p6755_p13 = pnand %p6753_p12, %p6741_p7  ;;  %p6762_p3 = por %p6761_p4, %p6760_p1 }
  0x28   : > { %p6756_p0 = pneg %p6755_p13 }
  0x2a   : > { %p6763_p2 = pnand %p6762_p3, %p6756_p0 }
  0x2c   : > { %6766 = shalt.err (!%p6763_p2)
}
  0x2d   : > { %s6780_s1 = smov 128   ;;  %s6781_s27 = smov 8  }
  0x2e   : > { %6614 = dma.hbm_to_vmem [thread:$0]  (!%p6940_p5), %s7733_s13, 1024, %s626_s28, [#allocation3], %s6780_s1, %s6780_s1, %s6781_s27  }
  0x2f   : > { %p7734_p6 = scmp.ne.s32.totalorder %s7731_s6, 0 }
  0x31   : > { %685 = sbr.rel (%p7734_p6) target bundleno = 13281 (0x33e1), region = 116 }
  0x38   : > { %p7735_p8 = scmp.eq.s32.totalorder %s6927_s26, 0 }
  0x3a   : > { %6772 = dma.done.wait (%p7735_p8), [#allocation3], 1024   ;;  %p7736_p7 = pmov %p7735_p8 }
  0x3b   : > { %p753_p2 = scmp.lt.s32.totalorder %s6927_s26, 1  ;;  %v6782_v0 = vmov 0.0   ;;  %vm6783_vm0 = vmmov 0   ;;  %v6784_v1 = vmov 0.0|0.0   ;;  %vm779_vm1 = vcmask 1043456   ;;  %s7738_s7 = sld [smem:[#allocation7_spill]] }
  0x3c   : > { %6774 = vsyncadd (%p7736_p7), [#allocation3], 4294966272  ;;  %6164 = vmatprep.subr.mxu0 %v6782_v0  ;;  %6166 = vmatprep.mubr.msk.f32.mxu0 %vm6783_vm0, %v6782_v0  ;;  %vm775_vm2 = vcmask 31744   ;;  %s7739_s8 = sld [smem:[#allocation9_spill]]  ;;  %s7740_s27 = sld [smem:[#allocation12_spill]]  ;;  %vm867_vm3 = vcmask 261120  }
  0x3d   : > { %s7766_s26 = smov (!%p753_p2, %s6927_s26), 1  ;;  %6535 = vmatprep.subr.bf16.mxu1 %v6784_v1  ;;  %6177 = vmatprep.mubr.msk.f32.mxu1 %vm6783_vm0, %v6782_v0  ;;  %s7741_s25 = sld [smem:[#allocation10_spill]]  ;;  %vm949_vm4 = vcmask 64512   ;;  %v7037_v23 = vld [vmem:[%s7688_s23] sm:$0xff]  ;;  %vm3201_vm5 = vcmask 523264  }
  0x3e   : > { %s6974_s28 = sshll.u32 %s7766_s26, 3  ;;  %s7742_s1 = sld [smem:[#allocation11_spill]] }
  0x3f   : > { %7737 = sst [smem:[#allocation6_spill]] %s6974_s28  ;;  %s7710_s6 = smov 120  }
  0x40   : > { %s7743_s0 = sld [smem:[#allocation13_spill]]  ;;  %s7712_s2 = smov 96  }
  0x41   : > { %s756_s30 = scalar_lea.vmem %s7738_s7, %s6974_s28  ;;  %s7706_s7 = smov 88  }
  0x42   : > { %v767_v2 = vld [vmem:[%s7739_s8] sm:$0xf]  ;;  %v857_v5 = vld [vmem:[%s7740_s27 + $0x8] sm:$0xff]  ;;  %v858_v7 = vld [vmem:[%s7740_s27 + $0x10] sm:$0xff]  ;;  %s7697_s8 = smov 64   ;;  %s7704_s4 = smov 80  }
  0x43   : > { %v766_v3 = vld [vmem:[%s756_s30] sm:$0xff]  ;;  %6165 = vmatpush3.msk.msra.mxu0 %vm779_vm1, %v767_v2  ;;  %v859_v8 = vld [vmem:[%s7740_s27 + $0x18] sm:$0xff]  ;;  %s7744_s30 = sld [smem:[#allocation14_spill]]  ;;  %s7700_s26 = smov 72  }
  0x44   : > { %v856_v4 = vld [vmem:[%s7740_s27] sm:$0xff]  ;;  %6167 = vmatmul.mubr.msk.f32.vlgmr.msra.gmra.mrb[0].mxu0 %vm775_vm2, %v766_v3  ;;  %6185 = vmatprep.subr.mxu0 %v6782_v0  ;;  %v6539_v9 = vpack.c.bf16 %v859_v8, %v858_v7  ;;  %s7702_s3 = smov 104   ;;  %s7696_s29 = smov 48  }
  0x45   : > { %v6536_v6 = vpack.c.bf16 %v857_v5, %v856_v4  ;;  %6187 = vmatprep.mubr.msk.f32.mxu0 %vm6783_vm0, %v6782_v0  ;;  %v5869_v10 = vld [vmem:[%s7741_s25] ss:$0 sm:$0xff]  ;;  %s7698_s25 = smov 56   ;;  %s7753_s14 = sld [smem:[#allocation17_spill]] }
  0x46   : > { %v853_v12 = vld [vmem:[%s7742_s1] sm:$0xff]  ;;  %s7708_s1 = smov 112   ;;  %s7754_s17 = sld [smem:[#allocation18_spill]] }
  0x47   : > { %6537 = vmatpush3.bf16.msra.mxu1 %v6536_v6  ;;  %v5872_v16 = vld [vmem:[%s7743_s0] ss:$0 sm:$0xff]  ;;  %s7757_s24 = smov 64   ;;  %s7759_s5 = smov 40  }
  0x48   : > { %6538 = vmatprep.subr.bf16.mxu1 %v6784_v1 }
  0x49   : > { %v942_v42 = vld [vmem:[%s7744_s30 + $0x8] sm:$0xff]  ;;  %v941_v51 = vld [vmem:[%s7744_s30] sm:$0xff] }
  0x4b   : > { %6540 = vmatpush3.bf16.msra.mxu1 %v6539_v9 }
  0x4c   : > { %6180 = vmatprep.subr.mxu1 %v6782_v0 }
 0x117   : > { %v849_v11 = vpop.f32.mrb[0].mxu0 }
 0x118   : > { %v850_v13 = vadd.f32 %v5869_v10, %v849_v11  ;;  %v6168_v14 = vpop.f32.mrb[1].mxu0 }
 0x11a   : > { %v7006_v15 = vadd.f32 %v853_v12, %v850_v13 }
 0x11c   : > { %6178 = vmatmul.mubr.msk.f32.vlgmr.msra.gmra.mrb[0].mxu1 %vm867_vm3, %v7006_v15 }
 0x11d   : > { %6182 = vmatprep.mubr.msk.f32.mxu1 %vm6783_vm0, %v6782_v0 }
 0x1ef   : > { %v937_v17 = vpop.f32.mrb[0].mxu1 }
 0x1f0   : > { %v7015_v18 = vadd.f32 %v5872_v16, %v937_v17  ;;  %v6179_v19 = vpop.f32.mrb[1].mxu1  ;;  %v943_v17 = vld [vmem:[%s7744_s30 + $0x10] sm:$0xff] }
 0x1f2   : > { %1111 = vrot.lane.b32.xlu1 %v7015_v18, %s7710_s6  ;;  %947 = vrot.lane.b32.xlu0 %v7015_v18, %s7712_s2  ;;  %s7747_s6 = smov 120  }
 0x1f6   : > { %1113 = vrot.lane.b32.xlu0 %v7015_v18, %s7706_s7  ;;  %s7755_s7 = smov 96  }
 0x264   : > { %v948_v20 = vpop.permute.xlu0 %947  ;;  %v1112_v22 = vpop.permute.xlu1 %1111 }
 0x265   : > { %6181 = vmatpush3.xpose.msk.msra.mxu1 %vm949_vm4, %v948_v20 }
 0x266   : > { %6190 = vmatprep.subr.mxu1 %v6782_v0 }
 0x268   : > { %6183 = vmatmul.mubr.msk.f32.vlgmr.msra.gmra.mrb[2].mxu1 %vm949_vm4, %v7015_v18  ;;  %v1114_v21 = vpop.permute.xlu0 %1113 }
 0x269   : > { %6191 = vmatpush3.xpose.msk.msra.mxu1 %vm949_vm4, %v1114_v21  ;;  %6192 = vmatprep.mubr.msk.f32.mxu1 %vm6783_vm0, %v6782_v0 }
 0x26a   : > { %6200 = vmatprep.subr.mxu1 %v6782_v0 }
 0x26c   : > { %6193 = vmatmul.mubr.msk.f32.vlgmr.msra.gmra.mrb[4].mxu1 %vm949_vm4, %v1112_v22 }
 0x26d   : > { %6202 = vmatprep.mubr.msk.f32.mxu1 %vm6783_vm0, %v6782_v0  ;;  %6201 = vmatpush3.msra.mxu1 %v942_v42 }
 0x26e   : > { %6210 = vmatprep.subr.mxu1 %v6782_v0 }
 0x33b   : > { %v1020_v24 = vpop.f32.mrb[2].mxu1 }
 0x33c   : > { %v1021_v25 = vadd.f32 %v1020_v24, %v7037_v23  ;;  %v6184_v26 = vpop.f32.mrb[3].mxu1 }
 0x33e   : > { %v1024_v27 = vsel %vm949_vm4, %v1021_v25, -inf }
 0x33f   : > { %v1185_v28 = vpop.f32.mrb[4].mxu1  ;;  %1025 = vmax.xlane.f32.xlu1 %v1024_v27 }
 0x340   : > { %v1186_v29 = vadd.f32 %v1185_v28, %v7037_v23  ;;  %v6194_v30 = vpop.f32.mrb[5].mxu1 }
 0x342   : > { %v1189_v31 = vsel %vm949_vm4, %v1186_v29, -inf }
 0x343   : > { %1190 = vmax.xlane.f32.xlu0 %v1189_v31 }
 0x3cc   : > { %v1026_v32 = vpop.xlane.xlu1 %1025 }
 0x3cd   : > { %v1027_v33 = vsub.f32 %v1021_v25, %v1026_v32  ;;  %v944_v32 = vld [vmem:[%s7744_s30 + $0x18] sm:$0xff] }
 0x3cf   : > { %v1028_v34 = vmul.f32 1.442695, %v1027_v33 }
 0x3d0   : > { %v1191_v35 = vpop.xlane.xlu0 %1190 }
 0x3d1   : > { %6662 = vpow2.f32 %v1028_v34  ;;  %v1192_v36 = vsub.f32 %v1186_v29, %v1191_v35 }
 0x3d3   : > { %v1193_v37 = vmul.f32 1.442695, %v1192_v36 }
 0x3d5   : > { %6664 = vpow2.f32 %v1193_v37 }
 0x3db   : > { %v6663_v38 = vpop.eup %6662 }
 0x3dc   : > { %v1030_v39 = vsel %vm949_vm4, %v6663_v38, 0.0 }
 0x3dd   : > { %1031 = vadd.xlane.f32.xlu0 %v1030_v39 }
 0x3df   : > { %v6665_v40 = vpop.eup %6664 }
 0x3e0   : > { %v1195_v41 = vsel %vm949_vm4, %v6665_v40, 0.0 }
 0x3e1   : > { %1196 = vadd.xlane.f32.xlu1 %v1195_v41 }
 0x3f2   : > { %1200 = vrot.lane.b32.xlu1 %v7015_v18, %s7698_s25  ;;  %s7699_s25 = smov 40  }
 0x3f3   : > { %1035 = vrot.lane.b32.xlu0 %v7015_v18, %s7697_s8  ;;  %s7751_s8 = smov 104  }
 0x3f6   : > { %1424 = vrot.lane.b32.xlu1 %v7015_v18, %s7704_s4  ;;  %s7756_s4 = smov 56  }
 0x3f7   : > { %1422 = vrot.lane.b32.xlu0 %v7015_v18, %s7708_s1  ;;  %s7748_s1 = smov 112  }
 0x46a   : > { %v1032_v43 = vpop.xlane.xlu0 %1031 }
 0x46b   : > { %6666 = vrcp.f32 %v1032_v43 }
 0x46e   : > { %v1036_v44 = vpop.permute.xlu0 %1035  ;;  %v1197_v45 = vpop.xlane.xlu1 %1196 }
 0x46f   : > { %6668 = vrcp.f32 %v1197_v45  ;;  %6186 = vmatpush3.msra.mxu0 %v1036_v44 }
 0x470   : > { %6195 = vmatprep.subr.mxu0 %v6782_v0 }
 0x472   : > { %v1201_v48 = vpop.permute.xlu1 %1200  ;;  %v1423_v57 = vpop.permute.xlu0 %1422 }
 0x475   : > { %v6667_v46 = vpop.eup %6666 }
 0x476   : > { %v1034_v47 = vmul.f32 %v6667_v46, %v6663_v38  ;;  %v1425_v55 = vpop.permute.xlu1 %1424 }
 0x478   : > { %6188 = vmatmul.mubr.msk.f32.vlgmr.msra.gmra.mrb[2].mxu0 %vm949_vm4, %v1034_v47  ;;  %v1938_v47 = vld [vmem:[%s7676_s11] sm:$0xff] }
 0x479   : > { %v6669_v49 = vpop.eup %6668  ;;  %6196 = vmatpush3.msra.mxu0 %v1201_v48  ;;  %6197 = vmatprep.mubr.msk.f32.mxu0 %vm6783_vm0, %v6782_v0  ;;  %v1939_v48 = vld [vmem:[%s7676_s11 + $0x8] sm:$0xff] }
 0x47a   : > { %v1199_v50 = vmul.f32 %v6669_v49, %v6665_v40  ;;  %6205 = vmatprep.subr.mxu0 %v6782_v0  ;;  %v6642_v49 = vpack.i.bf16 %v1939_v48, %v1938_v47 }
 0x47c   : > { %6198 = vmatmul.mubr.msk.f32.vlgmr.msra.gmra.mrb[4].mxu0 %vm949_vm4, %v1199_v50  ;;  %v6542_v50 = vpack.c.bf16 %v1939_v48, %v1938_v47  ;;  %v2115_v47 = vld [vmem:[#allocation2 + $0x8] sm:$0xff] }
 0x47d   : > { %6207 = vmatprep.mubr.msk.f32.mxu0 %vm6783_vm0, %v6782_v0  ;;  %6206 = vmatpush3.msra.mxu0 %v941_v51  ;;  %v1941_v51 = vld [vmem:[%s7676_s11 + $0x18] sm:$0xff] }
 0x47e   : > { %6215 = vmatprep.subr.mxu0 %v6782_v0 }
 0x54b   : > { %v1107_v52 = vpop.f32.mrb[2].mxu0 }
 0x54c   : > { %v6189_v53 = vpop.f32.mrb[3].mxu0  ;;  %6208 = vmatmul.mubr.msk.f32.vlgmr.msra.gmra.mrb[6].mxu0 %vm949_vm4, %v1107_v52 }
 0x54d   : > { %6217 = vmatprep.mubr.msk.f32.mxu0 %vm6783_vm0, %v6782_v0 }
 0x54f   : > { %v1272_v54 = vpop.f32.mrb[4].mxu0 }
 0x550   : > { %v6199_v56 = vpop.f32.mrb[5].mxu0  ;;  %6203 = vmatmul.mubr.msk.f32.vlgmr.msra.gmra.mrb[6].mxu1 %vm949_vm4, %v1272_v54 }
 0x551   : > { %6211 = vmatpush3.xpose.msk.msra.mxu1 %vm949_vm4, %v1425_v55  ;;  %6212 = vmatprep.mubr.msk.f32.mxu1 %vm6783_vm0, %v6782_v0 }
 0x552   : > { %6220 = vmatprep.subr.mxu1 %v6782_v0 }
 0x554   : > { %6213 = vmatmul.mubr.msk.f32.vlgmr.msra.gmra.mrb[8].mxu1 %vm949_vm4, %v1423_v57 }
 0x555   : > { %6222 = vmatprep.mubr.msk.f32.mxu1 %vm6783_vm0, %v6782_v0  ;;  %6221 = vmatpush3.msra.mxu1 %v943_v17 }
 0x556   : > { %6230 = vmatprep.subr.mxu1 %v6782_v0 }
 0x61f   : > { %v1418_v58 = vpop.f32.mrb[6].mxu0 }
 0x620   : > { %v6209_v59 = vpop.f32.mrb[7].mxu0 }
 0x621   : > { %v5893_v59 = vld [vmem:[%s7677_s12] ss:$0 sm:$0xff] }
 0x623   : > { %v1345_v60 = vpop.f32.mrb[6].mxu1 }
 0x624   : > { %v7080_v61 = vadd.f32 %v1418_v58, %v1345_v60  ;;  %v6204_v62 = vpop.f32.mrb[7].mxu1 }
 0x627   : > { %v1496_v63 = vpop.f32.mrb[8].mxu1 }
 0x628   : > { %v1497_v2 = vadd.f32 %v1496_v63, %v7037_v23  ;;  %v6214_v3 = vpop.f32.mrb[9].mxu1 }
 0x62a   : > { %v1500_v4 = vsel %vm949_vm4, %v1497_v2, -inf }
 0x62b   : > { %1501 = vmax.xlane.f32.xlu1 %v1500_v4 }
 0x63c   : > { %1663 = vrot.lane.b32.xlu1 %v7015_v18, %s7700_s26  ;;  %s7746_s26 = sld [smem:[#allocation8_spill]] }
 0x640   : > { %1661 = vrot.lane.b32.xlu1 %v7015_v18, %s7702_s3 }
 0x642   : > { %s760_s3 = scalar_lea.vmem %s7746_s26, %s6974_s28  ;;  %s7749_s26 = smov 88  }
 0x6b8   : > { %v1502_v5 = vpop.xlane.xlu1 %1501 }
 0x6b9   : > { %v1503_v6 = vsub.f32 %v1497_v2, %v1502_v5 }
 0x6bb   : > { %v1504_v7 = vmul.f32 1.442695, %v1503_v6 }
 0x6bc   : > { %v1664_v13 = vpop.permute.xlu1 %1663 }
 0x6bd   : > { %6670 = vpow2.f32 %v1504_v7 }
 0x6c0   : > { %v1662_v16 = vpop.permute.xlu1 %1661 }
 0x6c7   : > { %v6671_v8 = vpop.eup %6670 }
 0x6c8   : > { %v1506_v9 = vsel %vm949_vm4, %v6671_v8, 0.0 }
 0x6c9   : > { %1507 = vadd.xlane.f32.xlu0 %v1506_v9  ;;  %v7155_v9 = vld [vmem:[%s760_s3] sm:$0xff]  ;;  %s7750_s3 = smov 80  }
 0x6df   : > { %1511 = vrot.lane.b32.xlu0 %v7015_v18, %s7696_s29  ;;  %s7752_s29 = smov 72  }
 0x756   : > { %v1508_v10 = vpop.xlane.xlu0 %1507 }
 0x757   : > { %6672 = vrcp.f32 %v1508_v10 }
 0x75a   : > { %v1512_v11 = vpop.permute.xlu0 %1511 }
 0x75b   : > { %6216 = vmatpush3.msra.mxu0 %v1512_v11  ;;  %v5891_v11 = vld [vmem:[%s7674_s9] ss:$0 sm:$0xff] }
 0x75c   : > { %6225 = vmatprep.subr.mxu0 %v6782_v0 }
 0x761   : > { %v6673_v12 = vpop.eup %6672 }
 0x762   : > { %v1510_v14 = vmul.f32 %v6673_v12, %v6671_v8 }
 0x764   : > { %6218 = vmatmul.mubr.msk.f32.vlgmr.msra.gmra.mrb[8].mxu0 %vm949_vm4, %v1510_v14 }
 0x765   : > { %6226 = vmatpush3.xpose.msk.msra.mxu0 %vm949_vm4, %v1664_v13  ;;  %6227 = vmatprep.mubr.msk.f32.mxu0 %vm6783_vm0, %v6782_v0  ;;  %v5892_v13 = vld [vmem:[%s7675_s10] ss:$0 sm:$0xff] }
 0x766   : > { %6235 = vmatprep.subr.mxu0 %v6782_v0 }
 0x768   : > { %6228 = vmatmul.mubr.msk.f32.vlgmr.msra.gmra.mrb[10].mxu0 %vm949_vm4, %v1662_v16 }
 0x769   : > { %6237 = vmatprep.mubr.msk.f32.mxu0 %vm6783_vm0, %v6782_v0  ;;  %6236 = vmatpush3.msra.mxu0 %v944_v32 }
 0x76a   : > { %6547 = vmatprep.subr.bf16.mxu0 %v6784_v1 }
 0x837   : > { %v1583_v19 = vpop.f32.mrb[8].mxu0 }
 0x838   : > { %v6219_v20 = vpop.f32.mrb[9].mxu0  ;;  %6223 = vmatmul.mubr.msk.f32.vlgmr.msra.gmra.mrb[10].mxu1 %vm949_vm4, %v1583_v19 }
 0x839   : > { %6232 = vmatprep.mubr.msk.f32.mxu1 %vm6783_vm0, %v6782_v0 }
 0x83b   : > { %v1735_v21 = vpop.f32.mrb[10].mxu0 }
 0x83c   : > { %v1736_v22 = vadd.f32 %v1735_v21, %v7037_v23  ;;  %v6229_v24 = vpop.f32.mrb[11].mxu0 }
 0x83e   : > { %v1739_v25 = vsel %vm949_vm4, %v1736_v22, -inf }
 0x83f   : > { %1740 = vmax.xlane.f32.xlu0 %v1739_v25 }
 0x855   : > { %1750 = vrot.lane.b32.xlu0 %v7015_v18, %s7699_s25  ;;  %s7745_s25 = sld [smem:[#allocation15_spill]] }
 0x85b   : > { %v5890_v40 = vld [vmem:[%s7745_s25] ss:$0 sm:$0xff] }
 0x8cc   : > { %v1741_v26 = vpop.xlane.xlu0 %1740 }
 0x8cd   : > { %v1742_v27 = vsub.f32 %v1736_v22, %v1741_v26 }
 0x8cf   : > { %v1743_v28 = vmul.f32 1.442695, %v1742_v27 }
 0x8d0   : > { %v1751_v29 = vpop.permute.xlu0 %1750 }
 0x8d1   : > { %6674 = vpow2.f32 %v1743_v28  ;;  %6231 = vmatpush3.msra.mxu1 %v1751_v29 }
 0x8d2   : > { %6541 = vmatprep.subr.bf16.mxu1 %v6784_v1 }
 0x8db   : > { %v6675_v30 = vpop.eup %6674 }
 0x8dc   : > { %v1745_v31 = vsel %vm949_vm4, %v6675_v30, 0.0 }
 0x8dd   : > { %1746 = vadd.xlane.f32.xlu1 %v1745_v31 }
 0x90b   : > { %v1656_v18 = vpop.f32.mrb[10].mxu1 }
 0x90c   : > { %v1660_v33 = vadd.f32 %v1656_v18, %v7080_v61  ;;  %v6224_v34 = vpop.f32.mrb[11].mxu1 }
 0x96a   : > { %v1747_v35 = vpop.xlane.xlu1 %1746 }
 0x96b   : > { %6676 = vrcp.f32 %v1747_v35 }
 0x975   : > { %v6677_v36 = vpop.eup %6676 }
 0x976   : > { %v1749_v37 = vmul.f32 %v6677_v36, %v6675_v30 }
 0x978   : > { %6233 = vmatmul.mubr.msk.f32.vlgmr.msra.gmra.mrb[12].mxu1 %vm949_vm4, %v1749_v37 }
 0x979   : > { %6248 = vmatprep.mubr.msk.f32.mxu1 %vm6783_vm0, %v6782_v0  ;;  %6543 = vmatpush3.bf16.msra.mxu1 %v6542_v50 }
 0x97a   : > { %6544 = vmatprep.subr.bf16.mxu1 %v6784_v1 }
 0xa4b   : > { %v1822_v38 = vpop.f32.mrb[12].mxu1 }
 0xa4c   : > { %v6234_v39 = vpop.f32.mrb[13].mxu1  ;;  %6238 = vmatmul.mubr.msk.f32.vlgmr.msra.gmra.mrb[12].mxu0 %vm949_vm4, %v1822_v38 }
 0xa4d   : > { %6259 = vmatprep.mubr.msk.f32.mxu0 %vm6783_vm0, %v6782_v0 }
 0xb1f   : > { %v1895_v41 = vpop.f32.mrb[12].mxu0 }
 0xb20   : > { %v1899_v42 = vadd.f32 %v1895_v41, %v1660_v33  ;;  %v6239_v43 = vpop.f32.mrb[13].mxu0 }
 0xb22   : > { %v1906_v44 = vadd.f32 %v5890_v40, %v1899_v42 }
 0xb24   : > { %v1907_v45 = vadd.f32 %v1906_v44, %v7006_v15  ;;  %v1940_v15 = vld [vmem:[%s7676_s11 + $0x10] sm:$0xff] }
 0xb25   : > { %v6647_v52 = vpack.i.bf16 %v1941_v51, %v1940_v15  ;;  %v6545_v53 = vpack.c.bf16 %v1941_v51, %v1940_v15  ;;  %v2114_v51 = vld [vmem:[#allocation2] sm:$0xff] }
 0xb26   : > { %v1910_v46 = vsel %vm867_vm3, %v1907_v45, 0.0 }
 0xb27   : > { %1911 = vadd.xlane.f32.xlu1 %v1910_v46  ;;  %6648 = vrot.lane.b32.xlu0 %v6647_v52, %s7712_s2 }
 0xb28   : > { %6546 = vmatpush3.bf16.msra.mxu1 %v6545_v53 }
 0xb29   : > { %6262 = vmatprep.subr.mxu1 %v6782_v0 }
 0xb2b   : > { %2038 = vrot.lane.b32.xlu0 %v5893_v59, %s7712_s2 }
 0xb99   : > { %v6649_v62 = vpop.permute.xlu0 %6648 }
 0xb9a   : > { %v6651_v3 = vunpack.i.h.bf16 %v6649_v62  ;;  %v6650_v6 = vunpack.i.l.bf16 %v6649_v62 }
 0xb9c   : > { %v6551_v8 = vpack.c.bf16 %v6651_v3, %v6650_v6 }
 0xb9d   : > { %v2039_v17 = vpop.permute.xlu0 %2038 }
 0xbb4   : > { %v1912_v54 = vpop.xlane.xlu1 %1911 }
 0xbb5   : > { %v1914_v55 = vmul.f32 0.03125, %v1912_v54 }
 0xbb7   : > { %v1915_v56 = vsub.f32 %v1907_v45, %v1914_v55 }
 0xbb9   : > { %v1916_v57 = vmul.f32 %v1915_v56, %v1915_v56 }
 0xbbb   : > { %v1917_v58 = vsel %vm867_vm3, %v1916_v57, 0.0 }
 0xbbc   : > { %1918 = vadd.xlane.f32.xlu1 %v1917_v58 }
 0xbcd   : > { %6643 = vrot.lane.b32.xlu1 %v6642_v49, %s7712_s2 }
 0xc49   : > { %v1919_v60 = vpop.xlane.xlu1 %1918 }
 0xc4a   : > { %v1920_v61 = vmul.f32 0.03125, %v1919_v60 }
 0xc4c   : > { %v1921_v63 = vadd.f32 1e-05, %v1920_v61 }
 0xc4d   : > { %v6644_v2 = vpop.permute.xlu1 %6643 }
 0xc4e   : > { %6678 = vrsqrt.f32 %v1921_v63  ;;  %v6646_v4 = vunpack.i.h.bf16 %v6644_v2  ;;  %v6645_v5 = vunpack.i.l.bf16 %v6644_v2 }
 0xc50   : > { %v6548_v7 = vpack.c.bf16 %v6646_v4, %v6645_v5 }
 0xc52   : > { %6549 = vmatpush3.bf16.msra.mxu0 %v6548_v7 }
 0xc53   : > { %6550 = vmatprep.subr.bf16.mxu0 %v6784_v1 }
 0xc56   : > { %6552 = vmatpush3.bf16.msra.mxu0 %v6551_v8 }
 0xc57   : > { %6267 = vmatprep.subr.mxu0 %v6782_v0 }
 0xc58   : > { %v6679_v10 = vpop.eup %6678 }
 0xc59   : > { %v1923_v12 = vmul.f32 %v6679_v10, %v1915_v56  ;;  %6260 = vmatmul.mubr.msk.f32.vlgmr.msra.gmra.mrb[14].mxu0 %vm867_vm3, %v7155_v9 }
 0xc5a   : > { %6269 = vmatprep.mubr.msk.f32.mxu0 %vm6783_vm0, %v6782_v0 }
 0xc5b   : > { %v1930_v14 = vmul.f32 %v5891_v11, %v1923_v12 }
 0xc5d   : > { %v7168_v16 = vadd.f32 %v5892_v13, %v1930_v14 }
 0xc5f   : > { %6249 = vmatmul.mubr.msk.f32.vlgmr.msra.gmra.mrb[14].mxu1 %vm867_vm3, %v7168_v16 }
 0xc60   : > { %6264 = vmatprep.mubr.msk.f32.mxu1 %vm6783_vm0, %v6782_v0 }
 0xd2c   : > { %v2110_v19 = vpop.f32.mrb[14].mxu0 }
 0xd2d   : > { %v7174_v20 = vadd.f32 %v2110_v19, %v2039_v17  ;;  %v6261_v21 = vpop.f32.mrb[15].mxu0  ;;  %v2116_v19 = vld [vmem:[#allocation2 + $0x10] sm:$0xff] }
 0xd2f   : > { %2284 = vrot.lane.b32.xlu0 %v7174_v20, %s7747_s6  ;;  %6263 = vmatpush3.xpose.msk.msra.mxu1 %vm949_vm4, %v7174_v20 }
 0xd30   : > { %6272 = vmatprep.subr.mxu1 %v6782_v0 }
 0xd32   : > { %v2018_v22 = vpop.f32.mrb[14].mxu1 }
 0xd33   : > { %v7181_v24 = vadd.f32 %v5893_v59, %v2018_v22  ;;  %v6250_v25 = vpop.f32.mrb[15].mxu1 }
 0xd35   : > { %2282 = vrot.lane.b32.xlu1 %v7181_v24, %s7747_s6  ;;  %6265 = vmatmul.mubr.msk.f32.vlgmr.msra.gmra.mrb[16].mxu1 %vm949_vm4, %v7181_v24 }
 0xd36   : > { %6274 = vmatprep.mubr.msk.f32.mxu1 %vm6783_vm0, %v6782_v0 }
 0xda1   : > { %v2285_v26 = vpop.permute.xlu0 %2284 }
 0xda2   : > { %6273 = vmatpush3.xpose.msk.msra.mxu1 %vm949_vm4, %v2285_v26 }
 0xda3   : > { %6282 = vmatprep.subr.mxu1 %v6782_v0 }
 0xda7   : > { %v2283_v27 = vpop.permute.xlu1 %2282 }
 0xda8   : > { %6275 = vmatmul.mubr.msk.f32.vlgmr.msra.gmra.mrb[18].mxu1 %vm949_vm4, %v2283_v27 }
 0xda9   : > { %6284 = vmatprep.mubr.msk.f32.mxu1 %vm6783_vm0, %v6782_v0  ;;  %6283 = vmatpush3.msra.mxu1 %v2115_v47 }
 0xdaa   : > { %6292 = vmatprep.subr.mxu1 %v6782_v0 }
 0xe08   : > { %v2191_v28 = vpop.f32.mrb[16].mxu1 }
 0xe09   : > { %v6266_v29 = vpop.f32.mrb[17].mxu1  ;;  %v2195_v30 = vsel %vm949_vm4, %v2191_v28, -inf }
 0xe0a   : > { %2196 = vmax.xlane.f32.xlu0 %v2195_v30 }
 0xe7b   : > { %v2356_v31 = vpop.f32.mrb[18].mxu1 }
 0xe7c   : > { %v6276_v32 = vpop.f32.mrb[19].mxu1  ;;  %v2360_v18 = vsel %vm949_vm4, %v2356_v31, -inf }
 0xe7d   : > { %2361 = vmax.xlane.f32.xlu1 %v2360_v18  ;;  %v2117_v32 = vld [vmem:[#allocation2 + $0x18] sm:$0xff] }
 0xe8e   : > { %2206 = vrot.lane.b32.xlu1 %v7174_v20, %s7712_s2 }
 0xe92   : > { %2595 = vrot.lane.b32.xlu1 %v7174_v20, %s7748_s1 }
 0xe96   : > { %2593 = vrot.lane.b32.xlu1 %v7181_v24, %s7748_s1 }
 0xe97   : > { %v2197_v33 = vpop.xlane.xlu0 %2196 }
 0xe98   : > { %v2198_v34 = vsub.f32 %v2191_v28, %v2197_v33 }
 0xe9a   : > { %v2199_v35 = vmul.f32 1.442695, %v2198_v34 }
 0xe9c   : > { %6680 = vpow2.f32 %v2199_v35 }
 0xea6   : > { %v6681_v36 = vpop.eup %6680 }
 0xea7   : > { %v2201_v37 = vsel %vm949_vm4, %v6681_v36, 0.0 }
 0xea8   : > { %2202 = vadd.xlane.f32.xlu0 %v2201_v37 }
 0xf0a   : > { %v2362_v38 = vpop.xlane.xlu1 %2361 }
 0xf0b   : > { %v2363_v39 = vsub.f32 %v2356_v31, %v2362_v38 }
 0xf0d   : > { %v2364_v40 = vmul.f32 1.442695, %v2363_v39 }
 0xf0e   : > { %v2207_v41 = vpop.permute.xlu1 %2206 }
 0xf0f   : > { %6682 = vpow2.f32 %v2364_v40  ;;  %6268 = vmatpush3.msra.mxu0 %v2207_v41  ;;  %v5912_v40 = vld [vmem:[%s7753_s14] ss:$0 sm:$0xff]  ;;  %s7763_s14 = sld [smem:[#allocation19_spill]] }
 0xf10   : > { %6277 = vmatprep.subr.mxu0 %v6782_v0 }
 0xf12   : > { %v2596_v54 = vpop.permute.xlu1 %2595 }
 0xf16   : > { %v2594_v57 = vpop.permute.xlu1 %2593 }
 0xf19   : > { %v6683_v42 = vpop.eup %6682 }
 0xf1a   : > { %v2366_v43 = vsel %vm949_vm4, %v6683_v42, 0.0 }
 0xf1b   : > { %2367 = vadd.xlane.f32.xlu0 %v2366_v43 }
 0xf31   : > { %2371 = vrot.lane.b32.xlu0 %v7174_v20, %s7749_s26 }
 0xf35   : > { %v2203_v44 = vpop.xlane.xlu0 %2202 }
 0xf36   : > { %6684 = vrcp.f32 %v2203_v44 }
 0xf40   : > { %v6685_v45 = vpop.eup %6684 }
 0xf41   : > { %v2205_v46 = vmul.f32 %v6685_v45, %v6681_v36 }
 0xf43   : > { %6270 = vmatmul.mubr.msk.f32.vlgmr.msra.gmra.mrb[16].mxu0 %vm949_vm4, %v2205_v46 }
 0xf44   : > { %6279 = vmatprep.mubr.msk.f32.mxu0 %vm6783_vm0, %v6782_v0 }
 0xfa8   : > { %v2368_v48 = vpop.xlane.xlu0 %2367 }
 0xfa9   : > { %6686 = vrcp.f32 %v2368_v48 }
 0xfac   : > { %v2372_v49 = vpop.permute.xlu0 %2371 }
 0xfad   : > { %6278 = vmatpush3.msra.mxu0 %v2372_v49 }
 0xfae   : > { %6287 = vmatprep.subr.mxu0 %v6782_v0 }
 0xfb3   : > { %v6687_v50 = vpop.eup %6686 }
 0xfb4   : > { %v2370_v15 = vmul.f32 %v6687_v50, %v6683_v42 }
 0xfb6   : > { %6280 = vmatmul.mubr.msk.f32.vlgmr.msra.gmra.mrb[18].mxu0 %vm949_vm4, %v2370_v15 }
 0xfb7   : > { %6288 = vmatpush3.msra.mxu0 %v2114_v51  ;;  %6289 = vmatprep.mubr.msk.f32.mxu0 %vm6783_vm0, %v6782_v0  ;;  %v3108_v51 = vld [vmem:[%s7754_s17] sm:$0xff] }
 0xfb8   : > { %6297 = vmatprep.subr.mxu0 %v6782_v0 }
0x1016   : > { %v2278_v52 = vpop.f32.mrb[16].mxu0 }
0x1017   : > { %v6271_v53 = vpop.f32.mrb[17].mxu0  ;;  %6290 = vmatmul.mubr.msk.f32.vlgmr.msra.gmra.mrb[20].mxu0 %vm949_vm4, %v2278_v52  ;;  %v3109_v52 = vld [vmem:[%s7754_s17 + $0x8] sm:$0xff] }
0x1018   : > { %6299 = vmatprep.mubr.msk.f32.mxu0 %vm6783_vm0, %v6782_v0  ;;  %v6554_v53 = vpack.c.bf16 %v3109_v52, %v3108_v51 }
0x1089   : > { %v2443_v55 = vpop.f32.mrb[18].mxu0 }
0x108a   : > { %v6281_v56 = vpop.f32.mrb[19].mxu0  ;;  %6285 = vmatmul.mubr.msk.f32.vlgmr.msra.gmra.mrb[20].mxu1 %vm949_vm4, %v2443_v55 }
0x108b   : > { %6293 = vmatpush3.xpose.msk.msra.mxu1 %vm949_vm4, %v2596_v54  ;;  %6294 = vmatprep.mubr.msk.f32.mxu1 %vm6783_vm0, %v6782_v0  ;;  %v3111_v54 = vld [vmem:[%s7754_s17 + $0x18] sm:$0xff]  ;;  %v3193_v56 = vld [vmem:[%s7684_s19] sm:$0xff] }
0x108c   : > { %6302 = vmatprep.subr.mxu1 %v6782_v0 }
0x108e   : > { %6295 = vmatmul.mubr.msk.f32.vlgmr.msra.gmra.mrb[22].mxu1 %vm949_vm4, %v2594_v57  ;;  %v3194_v57 = vld [vmem:[%s7684_s19 + $0x8] sm:$0xff] }
0x108f   : > { %6304 = vmatprep.mubr.msk.f32.mxu1 %vm6783_vm0, %v6782_v0  ;;  %6303 = vmatpush3.msra.mxu1 %v2116_v19  ;;  %v5915_v19 = vld [vmem:[%s7683_s18] ss:$0 sm:$0xff] }
0x1090   : > { %6312 = vmatprep.subr.mxu1 %v6782_v0 }
0x10ea   : > { %v2589_v58 = vpop.f32.mrb[20].mxu0 }
0x10eb   : > { %v6291_v59 = vpop.f32.mrb[21].mxu0 }
0x10ec   : > { %v6560_v59 = vpack.c.bf16 %v3194_v57, %v3193_v56 }
0x115d   : > { %v2516_v60 = vpop.f32.mrb[20].mxu1 }
0x115e   : > { %v2590_v61 = vadd.f32 %v2589_v58, %v2516_v60  ;;  %v6286_v62 = vpop.f32.mrb[21].mxu1  ;;  %v3195_v58 = vld [vmem:[%s7684_s19 + $0x10] sm:$0xff]  ;;  %v3196_v60 = vld [vmem:[%s7684_s19 + $0x18] sm:$0xff] }
0x115f   : > { %v3197_v62 = vld [vmem:[%s7684_s19 + $0x20] sm:$0xff] }
0x1161   : > { %v2667_v63 = vpop.f32.mrb[22].mxu1 }
0x1162   : > { %v6296_v2 = vpop.f32.mrb[23].mxu1  ;;  %v2671_v3 = vsel %vm949_vm4, %v2667_v63, -inf }
0x1163   : > { %2672 = vmax.xlane.f32.xlu0 %v2671_v3 }
0x1179   : > { %2682 = vrot.lane.b32.xlu0 %v7174_v20, %s7750_s3 }
0x117d   : > { %2832 = vrot.lane.b32.xlu0 %v7181_v24, %s7751_s8 }
0x11f0   : > { %v2673_v4 = vpop.xlane.xlu0 %2672 }
0x11f1   : > { %v2674_v5 = vsub.f32 %v2667_v63, %v2673_v4  ;;  %v3198_v63 = vld [vmem:[%s7684_s19 + $0x28] sm:$0xff] }
0x11f2   : > { %v6566_v2 = vpack.c.bf16 %v3198_v63, %v3197_v62 }
0x11f3   : > { %v2675_v6 = vmul.f32 1.442695, %v2674_v5 }
0x11f4   : > { %v2683_v7 = vpop.permute.xlu0 %2682 }
0x11f5   : > { %6688 = vpow2.f32 %v2675_v6  ;;  %6298 = vmatpush3.msra.mxu0 %v2683_v7  ;;  %v5913_v7 = vld [vmem:[%s7680_s15] ss:$0 sm:$0xff] }
0x11f6   : > { %6307 = vmatprep.subr.mxu0 %v6782_v0 }
0x11f8   : > { %v2833_v17 = vpop.permute.xlu0 %2832 }
0x11ff   : > { %v6689_v8 = vpop.eup %6688 }
0x1200   : > { %v2677_v10 = vsel %vm949_vm4, %v6689_v8, 0.0 }
0x1201   : > { %2678 = vadd.xlane.f32.xlu1 %v2677_v10  ;;  %v5914_v10 = vld [vmem:[%s7681_s16] ss:$0 sm:$0xff] }
0x1212   : > { %2834 = vrot.lane.b32.xlu1 %v7174_v20, %s7751_s8 }
0x128e   : > { %v2679_v11 = vpop.xlane.xlu1 %2678 }
0x128f   : > { %6690 = vrcp.f32 %v2679_v11 }
0x1292   : > { %v2835_v14 = vpop.permute.xlu1 %2834 }
0x1299   : > { %v6691_v12 = vpop.eup %6690 }
0x129a   : > { %v2681_v13 = vmul.f32 %v6691_v12, %v6689_v8 }
0x129c   : > { %6300 = vmatmul.mubr.msk.f32.vlgmr.msra.gmra.mrb[22].mxu0 %vm949_vm4, %v2681_v13  ;;  %v3199_v13 = vld [vmem:[%s7684_s19 + $0x30] sm:$0xff] }
0x129d   : > { %6308 = vmatpush3.xpose.msk.msra.mxu0 %vm949_vm4, %v2835_v14  ;;  %6309 = vmatprep.mubr.msk.f32.mxu0 %vm6783_vm0, %v6782_v0  ;;  %v3200_v14 = vld [vmem:[%s7684_s19 + $0x38] sm:$0xff] }
0x129e   : > { %6317 = vmatprep.subr.mxu0 %v6782_v0 }
0x12a0   : > { %6310 = vmatmul.mubr.msk.f32.vlgmr.msra.gmra.mrb[24].mxu0 %vm949_vm4, %v2833_v17  ;;  %v6569_v17 = vpack.c.bf16 %v3200_v14, %v3199_v13 }
0x12a1   : > { %6319 = vmatprep.mubr.msk.f32.mxu0 %vm6783_vm0, %v6782_v0  ;;  %6318 = vmatpush3.msra.mxu0 %v2117_v32 }
0x12a2   : > { %6559 = vmatprep.subr.bf16.mxu0 %v6784_v1 }
0x136f   : > { %v2754_v21 = vpop.f32.mrb[22].mxu0 }
0x1370   : > { %v6301_v22 = vpop.f32.mrb[23].mxu0  ;;  %6305 = vmatmul.mubr.msk.f32.vlgmr.msra.gmra.mrb[24].mxu1 %vm949_vm4, %v2754_v21 }
0x1371   : > { %6314 = vmatprep.mubr.msk.f32.mxu1 %vm6783_vm0, %v6782_v0 }
0x1373   : > { %v2906_v24 = vpop.f32.mrb[24].mxu0 }
0x1374   : > { %v6311_v25 = vpop.f32.mrb[25].mxu0  ;;  %v2910_v26 = vsel %vm949_vm4, %v2906_v24, -inf }
0x1375   : > { %2911 = vmax.xlane.f32.xlu1 %v2910_v26 }
0x1402   : > { %v2912_v27 = vpop.xlane.xlu1 %2911 }
0x1403   : > { %v2913_v28 = vsub.f32 %v2906_v24, %v2912_v27  ;;  %v5918_v27 = vld [vmem:[%s7685_s20] ss:$0 sm:$0xff] }
0x1405   : > { %v2914_v29 = vmul.f32 1.442695, %v2913_v28 }
0x1407   : > { %6692 = vpow2.f32 %v2914_v29 }
0x1411   : > { %v6693_v30 = vpop.eup %6692 }
0x1412   : > { %v2916_v31 = vsel %vm949_vm4, %v6693_v30, 0.0 }
0x1413   : > { %2917 = vadd.xlane.f32.xlu0 %v2916_v31 }
0x1429   : > { %2921 = vrot.lane.b32.xlu0 %v7174_v20, %s7752_s29 }
0x1443   : > { %v2827_v18 = vpop.f32.mrb[24].mxu1 }
0x1444   : > { %v2831_v33 = vadd.f32 %v2827_v18, %v2590_v61  ;;  %v6306_v34 = vpop.f32.mrb[25].mxu1  ;;  %v6563_v61 = vpack.c.bf16 %v3196_v60, %v3195_v58 }
0x14a0   : > { %v2918_v35 = vpop.xlane.xlu0 %2917 }
0x14a1   : > { %6694 = vrcp.f32 %v2918_v35 }
0x14a4   : > { %v2922_v36 = vpop.permute.xlu0 %2921 }
0x14a5   : > { %6313 = vmatpush3.msra.mxu1 %v2922_v36  ;;  %v5921_v36 = vld [vmem:[%s7740_s27 + $0x20] sm:$0xff] }
0x14a6   : > { %6553 = vmatprep.subr.bf16.mxu1 %v6784_v1 }
0x14ab   : > { %v6695_v37 = vpop.eup %6694 }
0x14ac   : > { %v2920_v38 = vmul.f32 %v6695_v37, %v6693_v30  ;;  %v5922_v37 = vld [vmem:[%s7740_s27 + $0x28] sm:$0xff] }
0x14ae   : > { %6315 = vmatmul.mubr.msk.f32.vlgmr.msra.gmra.mrb[26].mxu1 %vm949_vm4, %v2920_v38  ;;  %v6572_v38 = vpack.c.bf16 %v5922_v37, %v5921_v36  ;;  %v6738_v37 = vld [vmem:[%s7688_s23] sm:$0xff] }
0x14af   : > { %6330 = vmatprep.mubr.msk.f32.mxu1 %vm6783_vm0, %v6782_v0  ;;  %6555 = vmatpush3.bf16.msra.mxu1 %v6554_v53 }
0x14b0   : > { %6556 = vmatprep.subr.bf16.mxu1 %v6784_v1 }
0x1581   : > { %v2993_v20 = vpop.f32.mrb[26].mxu1 }
0x1582   : > { %v6316_v39 = vpop.f32.mrb[27].mxu1  ;;  %6320 = vmatmul.mubr.msk.f32.vlgmr.msra.gmra.mrb[26].mxu0 %vm949_vm4, %v2993_v20  ;;  %v5923_v20 = vld [vmem:[%s7740_s27 + $0x30] sm:$0xff] }
0x1583   : > { %6349 = vmatprep.mubr.msk.f32.mxu0 %vm6783_vm0, %v6782_v0  ;;  %6561 = vmatpush3.bf16.msra.mxu0 %v6560_v59  ;;  %v5924_v39 = vld [vmem:[%s7740_s27 + $0x38] sm:$0xff] }
0x1584   : > { %6562 = vmatprep.subr.bf16.mxu0 %v6784_v1 }
0x1587   : > { %6564 = vmatpush3.bf16.msra.mxu0 %v6563_v61 }
0x1588   : > { %6565 = vmatprep.subr.bf16.mxu0 %v6784_v1 }
0x158b   : > { %6567 = vmatpush3.bf16.msra.mxu0 %v6566_v2 }
0x158c   : > { %6568 = vmatprep.subr.bf16.mxu0 %v6784_v1 }
0x158f   : > { %6570 = vmatpush3.bf16.msra.mxu0 %v6569_v17 }
0x1590   : > { %6368 = vmatprep.subr.mxu0 %v6782_v0 }
0x1655   : > { %v3066_v41 = vpop.f32.mrb[26].mxu0 }
0x1656   : > { %v3070_v42 = vadd.f32 %v3066_v41, %v2831_v33  ;;  %v6321_v43 = vpop.f32.mrb[27].mxu0 }
0x1658   : > { %v3077_v44 = vadd.f32 %v5912_v40, %v3070_v42  ;;  %v6575_v40 = vpack.c.bf16 %v5924_v39, %v5923_v20 }
0x165a   : > { %v3078_v45 = vadd.f32 %v3077_v44, %v7168_v16  ;;  %v3110_v16 = vld [vmem:[%s7754_s17 + $0x10] sm:$0xff] }
0x165b   : > { %v6557_v55 = vpack.c.bf16 %v3111_v54, %v3110_v16 }
0x165c   : > { %v3081_v46 = vsel %vm867_vm3, %v3078_v45, 0.0 }
0x165d   : > { %3082 = vadd.xlane.f32.xlu1 %v3081_v46  ;;  %6558 = vmatpush3.bf16.msra.mxu1 %v6557_v55 }
0x165e   : > { %6571 = vmatprep.subr.bf16.mxu1 %v6784_v1 }
0x16ea   : > { %v3083_v47 = vpop.xlane.xlu1 %3082 }
0x16eb   : > { %v3084_v48 = vmul.f32 0.03125, %v3083_v47  ;;  %v5920_v47 = vld [vmem:[%s7687_s22] ss:$0 sm:$0xff] }
0x16ed   : > { %v3085_v49 = vsub.f32 %v3078_v45, %v3084_v48  ;;  %v5919_v45 = vld [vmem:[%s7686_s21] ss:$0 sm:$0xff] }
0x16ef   : > { %v3086_v50 = vmul.f32 %v3085_v49, %v3085_v49 }
0x16f1   : > { %v3087_v15 = vsel %vm867_vm3, %v3086_v50, 0.0  ;;  %v5926_v50 = vld [vmem:[%s7743_s0 + $0x1] ss:$0 sm:$0xff] }
0x16f2   : > { %3088 = vadd.xlane.f32.xlu1 %v3087_v15 }
0x177f   : > { %v3089_v3 = vpop.xlane.xlu1 %3088 }
0x1780   : > { %v3090_v4 = vmul.f32 0.03125, %v3089_v3 }
0x1782   : > { %v3091_v5 = vadd.f32 1e-05, %v3090_v4 }
0x1784   : > { %6696 = vrsqrt.f32 %v3091_v5 }
0x178e   : > { %v6697_v6 = vpop.eup %6696 }
0x178f   : > { %v3093_v8 = vmul.f32 %v6697_v6, %v3085_v49 }
0x1791   : > { %v3100_v11 = vmul.f32 %v5913_v7, %v3093_v8 }
0x1793   : > { %v3107_v12 = vadd.f32 %v5914_v10, %v3100_v11  ;;  %v5929_v11 = vld [vmem:[%s7744_s30 + $0x28] sm:$0xff] }
0x1795   : > { %6331 = vmatmul.mubr.msk.f32.vlgmr.msra.gmra.mrb[28].mxu1 %vm867_vm3, %v3107_v12 }
0x1796   : > { %6360 = vmatprep.mubr.msk.f32.mxu1 %vm6783_vm0, %v6782_v0  ;;  %6573 = vmatpush3.bf16.msra.mxu1 %v6572_v38 }
0x1797   : > { %6574 = vmatprep.subr.bf16.mxu1 %v6784_v1 }
0x179a   : > { %6576 = vmatpush3.bf16.msra.mxu1 %v6575_v40 }
0x179b   : > { %6363 = vmatprep.subr.mxu1 %v6782_v0 }
0x1868   : > { %v3188_v21 = vpop.f32.mrb[28].mxu1 }
0x1869   : > { %v3189_v22 = vadd.f32 %v5915_v19, %v3188_v21  ;;  %v6332_v24 = vpop.f32.mrb[29].mxu1 }
0x186b   : > { %v3192_v25 = vmax.f32 %v3189_v22, 0.0 }
0x186d   : > { %6350 = vmatmul.mubr.msk.f32.vlgmr.msra.gmra.mrb[28].mxu0 %vm3201_vm5, %v3192_v25  ;;  %v5928_v25 = vld [vmem:[%s7744_s30 + $0x20] sm:$0xff] }
0x186e   : > { %6370 = vmatprep.mubr.msk.f32.mxu0 %vm6783_vm0, %v6782_v0 }
0x1940   : > { %v3271_v26 = vpop.f32.mrb[28].mxu0 }
0x1941   : > { %v3275_v28 = vadd.f32 %v3271_v26, %v3107_v12  ;;  %v6351_v29 = vpop.f32.mrb[29].mxu0 }
0x1943   : > { %v3283_v30 = vadd.f32 %v5918_v27, %v3275_v28 }
0x1945   : > { %v3286_v31 = vsel %vm867_vm3, %v3283_v30, 0.0 }
0x1946   : > { %3287 = vadd.xlane.f32.xlu1 %v3286_v31 }
0x19d3   : > { %v3288_v32 = vpop.xlane.xlu1 %3287 }
0x19d4   : > { %v3289_v18 = vmul.f32 0.03125, %v3288_v32 }
0x19d6   : > { %v3290_v33 = vsub.f32 %v3283_v30, %v3289_v18 }
0x19d8   : > { %v3291_v34 = vmul.f32 %v3290_v33, %v3290_v33 }
0x19da   : > { %v3292_v35 = vsel %vm867_vm3, %v3291_v34, 0.0 }
0x19db   : > { %3293 = vadd.xlane.f32.xlu1 %v3292_v35 }
0x1a68   : > { %v3294_v41 = vpop.xlane.xlu1 %3293 }
0x1a69   : > { %v3295_v42 = vmul.f32 0.03125, %v3294_v41 }
0x1a6b   : > { %v3296_v43 = vadd.f32 1e-05, %v3295_v42 }
0x1a6d   : > { %6698 = vrsqrt.f32 %v3296_v43 }
0x1a77   : > { %v6699_v44 = vpop.eup %6698 }
0x1a78   : > { %v3298_v46 = vmul.f32 %v6699_v44, %v3290_v33 }
0x1a7a   : > { %v3305_v48 = vmul.f32 %v5919_v45, %v3298_v46 }
0x1a7c   : > { %v7348_v49 = vadd.f32 %v5920_v47, %v3305_v48 }
0x1a7e   : > { %6361 = vmatmul.mubr.msk.f32.vlgmr.msra.gmra.mrb[30].mxu1 %vm867_vm3, %v7348_v49 }
0x1a7f   : > { %6365 = vmatprep.mubr.msk.f32.mxu1 %vm6783_vm0, %v6782_v0 }
0x1b51   : > { %v3395_v15 = vpop.f32.mrb[30].mxu1 }
0x1b52   : > { %v7357_v51 = vadd.f32 %v5926_v50, %v3395_v15  ;;  %v6362_v52 = vpop.f32.mrb[31].mxu1 }
0x1b53   : > { %v5930_v52 = vld [vmem:[%s7744_s30 + $0x30] sm:$0xff] }
0x1b54   : > { %3572 = vrot.lane.b32.xlu0 %v7357_v51, %s7749_s26  ;;  %3407 = vrot.lane.b32.xlu1 %v7357_v51, %s7755_s7 }
0x1b58   : > { %3570 = vrot.lane.b32.xlu0 %v7357_v51, %s7747_s6 }
0x1bc6   : > { %v3408_v53 = vpop.permute.xlu1 %3407  ;;  %v3573_v16 = vpop.permute.xlu0 %3572 }
0x1bc7   : > { %6364 = vmatpush3.xpose.msk.msra.mxu1 %vm949_vm4, %v3408_v53 }
0x1bc8   : > { %6373 = vmatprep.subr.mxu1 %v6782_v0 }
0x1bca   : > { %6366 = vmatmul.mubr.msk.f32.vlgmr.msra.gmra.mrb[32].mxu1 %vm949_vm4, %v7357_v51  ;;  %v3571_v54 = vpop.permute.xlu0 %3570 }
0x1bcb   : > { %6374 = vmatpush3.xpose.msk.msra.mxu1 %vm949_vm4, %v3573_v16  ;;  %6375 = vmatprep.mubr.msk.f32.mxu1 %vm6783_vm0, %v6782_v0 }
0x1bcc   : > { %6383 = vmatprep.subr.mxu1 %v6782_v0 }
0x1bce   : > { %6376 = vmatmul.mubr.msk.f32.vlgmr.msra.gmra.mrb[34].mxu1 %vm949_vm4, %v3571_v54 }
0x1bcf   : > { %6385 = vmatprep.mubr.msk.f32.mxu1 %vm6783_vm0, %v6782_v0  ;;  %6384 = vmatpush3.msra.mxu1 %v5929_v11 }
0x1bd0   : > { %6393 = vmatprep.subr.mxu1 %v6782_v0 }
0x1c9d   : > { %v3479_v55 = vpop.f32.mrb[32].mxu1 }
0x1c9e   : > { %v3480_v56 = vadd.f32 %v3479_v55, %v7037_v23  ;;  %v6367_v57 = vpop.f32.mrb[33].mxu1 }
0x1ca0   : > { %v3483_v58 = vsel %vm949_vm4, %v3480_v56, -inf }
0x1ca1   : > { %3484 = vmax.xlane.f32.xlu0 %v3483_v58  ;;  %v3644_v59 = vpop.f32.mrb[34].mxu1 }
0x1ca2   : > { %v3645_v60 = vadd.f32 %v3644_v59, %v7037_v23  ;;  %v6377_v61 = vpop.f32.mrb[35].mxu1 }
0x1ca4   : > { %v3648_v62 = vsel %vm949_vm4, %v3645_v60, -inf }
0x1ca5   : > { %3649 = vmax.xlane.f32.xlu1 %v3648_v62 }
0x1cb6   : > { %3659 = vrot.lane.b32.xlu1 %v7357_v51, %s7756_s4  ;;  %s7758_s4 = smov 48  }
0x1cba   : > { %3883 = vrot.lane.b32.xlu1 %v7357_v51, %s7750_s3 }
0x1d2e   : > { %v3485_v63 = vpop.xlane.xlu0 %3484 }
0x1d2f   : > { %v3486_v2 = vsub.f32 %v3480_v56, %v3485_v63 }
0x1d31   : > { %v3487_v3 = vmul.f32 1.442695, %v3486_v2  ;;  %v5931_v2 = vld [vmem:[%s7744_s30 + $0x38] sm:$0xff] }
0x1d32   : > { %v3650_v4 = vpop.xlane.xlu1 %3649 }
0x1d33   : > { %6700 = vpow2.f32 %v3487_v3  ;;  %v3651_v5 = vsub.f32 %v3645_v60, %v3650_v4 }
0x1d35   : > { %v3652_v6 = vmul.f32 1.442695, %v3651_v5 }
0x1d36   : > { %v3660_v21 = vpop.permute.xlu1 %3659 }
0x1d37   : > { %6702 = vpow2.f32 %v3652_v6 }
0x1d3a   : > { %v3884_v29 = vpop.permute.xlu1 %3883 }
0x1d3d   : > { %v6701_v7 = vpop.eup %6700 }
0x1d3e   : > { %v3489_v23 = vsel %vm949_vm4, %v6701_v7, 0.0 }
0x1d3f   : > { %3490 = vadd.xlane.f32.xlu0 %v3489_v23 }
0x1d41   : > { %v6703_v8 = vpop.eup %6702 }
0x1d42   : > { %v3654_v10 = vsel %vm949_vm4, %v6703_v8, 0.0 }
0x1d43   : > { %3655 = vadd.xlane.f32.xlu0 %v3654_v10  ;;  %v5949_v10 = vld [vmem:[%s7745_s25 + $0x1] ss:$0 sm:$0xff] }
0x1d59   : > { %3494 = vrot.lane.b32.xlu0 %v7357_v51, %s7757_s24 }
0x1d5d   : > { %3881 = vrot.lane.b32.xlu0 %v7357_v51, %s7748_s1 }
0x1dcc   : > { %v3491_v12 = vpop.xlane.xlu0 %3490 }
0x1dcd   : > { %6704 = vrcp.f32 %v3491_v12 }
0x1dd0   : > { %v3656_v13 = vpop.xlane.xlu0 %3655 }
0x1dd1   : > { %6706 = vrcp.f32 %v3656_v13 }
0x1dd4   : > { %v3495_v14 = vpop.permute.xlu0 %3494 }
0x1dd5   : > { %6369 = vmatpush3.msra.mxu0 %v3495_v14 }
0x1dd6   : > { %6378 = vmatprep.subr.mxu0 %v6782_v0 }
0x1dd7   : > { %v6705_v17 = vpop.eup %6704 }
0x1dd8   : > { %v3493_v19 = vmul.f32 %v6705_v17, %v6701_v7  ;;  %v3882_v31 = vpop.permute.xlu0 %3881 }
0x1dda   : > { %6371 = vmatmul.mubr.msk.f32.vlgmr.msra.gmra.mrb[30].mxu0 %vm949_vm4, %v3493_v19 }
0x1ddb   : > { %v6707_v22 = vpop.eup %6706  ;;  %6379 = vmatpush3.msra.mxu0 %v3660_v21  ;;  %6380 = vmatprep.mubr.msk.f32.mxu0 %vm6783_vm0, %v6782_v0  ;;  %v5954_v21 = vld [vmem:[%s7676_s11 + $0x20] sm:$0xff] }
0x1ddc   : > { %v3658_v24 = vmul.f32 %v6707_v22, %v6703_v8  ;;  %6388 = vmatprep.subr.mxu0 %v6782_v0  ;;  %v5955_v22 = vld [vmem:[%s7676_s11 + $0x28] sm:$0xff] }
0x1dde   : > { %6381 = vmatmul.mubr.msk.f32.vlgmr.msra.gmra.mrb[32].mxu0 %vm949_vm4, %v3658_v24  ;;  %v6652_v24 = vpack.i.bf16 %v5955_v22, %v5954_v21 }
0x1ddf   : > { %6390 = vmatprep.mubr.msk.f32.mxu0 %vm6783_vm0, %v6782_v0  ;;  %6389 = vmatpush3.msra.mxu0 %v5928_v25  ;;  %v6578_v25 = vpack.c.bf16 %v5955_v22, %v5954_v21 }
0x1de0   : > { %6398 = vmatprep.subr.mxu0 %v6782_v0 }
0x1ead   : > { %v3566_v26 = vpop.f32.mrb[30].mxu0 }
0x1eae   : > { %v6372_v27 = vpop.f32.mrb[31].mxu0  ;;  %6391 = vmatmul.mubr.msk.f32.vlgmr.msra.gmra.mrb[34].mxu0 %vm949_vm4, %v3566_v26  ;;  %v5957_v26 = vld [vmem:[%s7676_s11 + $0x38] sm:$0xff] }
0x1eaf   : > { %6400 = vmatprep.mubr.msk.f32.mxu0 %vm6783_vm0, %v6782_v0 }
0x1eb1   : > { %v3731_v28 = vpop.f32.mrb[32].mxu0 }
0x1eb2   : > { %v6382_v30 = vpop.f32.mrb[33].mxu0  ;;  %6386 = vmatmul.mubr.msk.f32.vlgmr.msra.gmra.mrb[36].mxu1 %vm949_vm4, %v3731_v28 }
0x1eb3   : > { %6394 = vmatpush3.xpose.msk.msra.mxu1 %vm949_vm4, %v3884_v29  ;;  %6395 = vmatprep.mubr.msk.f32.mxu1 %vm6783_vm0, %v6782_v0 }
0x1eb4   : > { %6403 = vmatprep.subr.mxu1 %v6782_v0 }
0x1eb6   : > { %6396 = vmatmul.mubr.msk.f32.vlgmr.msra.gmra.mrb[38].mxu1 %vm949_vm4, %v3882_v31 }
0x1eb7   : > { %6405 = vmatprep.mubr.msk.f32.mxu1 %vm6783_vm0, %v6782_v0  ;;  %6404 = vmatpush3.msra.mxu1 %v5930_v52 }
0x1eb8   : > { %6413 = vmatprep.subr.mxu1 %v6782_v0 }
0x1f81   : > { %v3877_v32 = vpop.f32.mrb[34].mxu0 }
0x1f82   : > { %v6392_v18 = vpop.f32.mrb[35].mxu0 }
0x1f85   : > { %v3804_v33 = vpop.f32.mrb[36].mxu1 }
0x1f86   : > { %v3878_v34 = vadd.f32 %v3877_v32, %v3804_v33  ;;  %v6387_v35 = vpop.f32.mrb[37].mxu1  ;;  %v5959_v33 = vld [vmem:[%s7677_s12 + $0x1] ss:$0 sm:$0xff] }
0x1f89   : > { %v3955_v36 = vpop.f32.mrb[38].mxu1 }
0x1f8a   : > { %v3956_v38 = vadd.f32 %v6738_v37, %v3955_v36  ;;  %v6397_v20 = vpop.f32.mrb[39].mxu1 }
0x1f8c   : > { %v3959_v39 = vsel %vm949_vm4, %v3956_v38, -inf }
0x1f8d   : > { %3960 = vmax.xlane.f32.xlu1 %v3959_v39 }
0x1f9e   : > { %4122 = vrot.lane.b32.xlu1 %v7357_v51, %s7752_s29 }
0x1fa2   : > { %4120 = vrot.lane.b32.xlu1 %v7357_v51, %s7751_s8 }
0x201a   : > { %v3961_v40 = vpop.xlane.xlu1 %3960 }
0x201b   : > { %v3962_v41 = vsub.f32 %v3956_v38, %v3961_v40 }
0x201d   : > { %v3963_v42 = vmul.f32 1.442695, %v3962_v41 }
0x201e   : > { %v4123_v48 = vpop.permute.xlu1 %4122 }
0x201f   : > { %6708 = vpow2.f32 %v3963_v42 }
0x2022   : > { %v4121_v15 = vpop.permute.xlu1 %4120 }
0x2029   : > { %v6709_v43 = vpop.eup %6708 }
0x202a   : > { %v3965_v44 = vsel %vm949_vm4, %v6709_v43, 0.0 }
0x202b   : > { %3966 = vadd.xlane.f32.xlu0 %v3965_v44 }
0x2041   : > { %3970 = vrot.lane.b32.xlu0 %v7357_v51, %s7758_s4 }
0x20b8   : > { %v3967_v45 = vpop.xlane.xlu0 %3966 }
0x20b9   : > { %6710 = vrcp.f32 %v3967_v45  ;;  %v5952_v45 = vld [vmem:[%s7674_s9 + $0x1] ss:$0 sm:$0xff] }
0x20bc   : > { %v3971_v46 = vpop.permute.xlu0 %3970 }
0x20bd   : > { %6399 = vmatpush3.msra.mxu0 %v3971_v46 }
0x20be   : > { %6408 = vmatprep.subr.mxu0 %v6782_v0 }
0x20c3   : > { %v6711_v47 = vpop.eup %6710 }
0x20c4   : > { %v3969_v50 = vmul.f32 %v6711_v47, %v6709_v43  ;;  %v5953_v47 = vld [vmem:[%s7675_s10 + $0x1] ss:$0 sm:$0xff] }
0x20c6   : > { %6401 = vmatmul.mubr.msk.f32.vlgmr.msra.gmra.mrb[36].mxu0 %vm949_vm4, %v3969_v50 }
0x20c7   : > { %6409 = vmatpush3.xpose.msk.msra.mxu0 %vm949_vm4, %v4123_v48  ;;  %6410 = vmatprep.mubr.msk.f32.mxu0 %vm6783_vm0, %v6782_v0 }
0x20c8   : > { %6418 = vmatprep.subr.mxu0 %v6782_v0 }
0x20ca   : > { %6411 = vmatmul.mubr.msk.f32.vlgmr.msra.gmra.mrb[38].mxu0 %vm949_vm4, %v4121_v15 }
0x20cb   : > { %6420 = vmatprep.mubr.msk.f32.mxu0 %vm6783_vm0, %v6782_v0  ;;  %6419 = vmatpush3.msra.mxu0 %v5931_v2 }
0x20cc   : > { %6583 = vmatprep.subr.bf16.mxu0 %v6784_v1 }
0x2199   : > { %v4042_v53 = vpop.f32.mrb[36].mxu0 }
0x219a   : > { %v6402_v16 = vpop.f32.mrb[37].mxu0  ;;  %6406 = vmatmul.mubr.msk.f32.vlgmr.msra.gmra.mrb[40].mxu1 %vm949_vm4, %v4042_v53 }
0x219b   : > { %6415 = vmatprep.mubr.msk.f32.mxu1 %vm6783_vm0, %v6782_v0 }
0x219d   : > { %v4194_v54 = vpop.f32.mrb[38].mxu0 }
0x219e   : > { %v4195_v55 = vadd.f32 %v6738_v37, %v4194_v54  ;;  %v6412_v56 = vpop.f32.mrb[39].mxu0 }
0x21a0   : > { %v4198_v57 = vsel %vm949_vm4, %v4195_v55, -inf }
0x21a1   : > { %4199 = vmax.xlane.f32.xlu0 %v4198_v57 }
0x21b7   : > { %4209 = vrot.lane.b32.xlu0 %v7357_v51, %s7759_s5 }
0x222e   : > { %v4200_v58 = vpop.xlane.xlu0 %4199 }
0x222f   : > { %v4201_v59 = vsub.f32 %v4195_v55, %v4200_v58 }
0x2231   : > { %v4202_v60 = vmul.f32 1.442695, %v4201_v59 }
0x2232   : > { %v4210_v61 = vpop.permute.xlu0 %4209 }
0x2233   : > { %6712 = vpow2.f32 %v4202_v60  ;;  %6414 = vmatpush3.msra.mxu1 %v4210_v61 }
0x2234   : > { %6577 = vmatprep.subr.bf16.mxu1 %v6784_v1 }
0x223d   : > { %v6713_v62 = vpop.eup %6712 }
0x223e   : > { %v4204_v63 = vsel %vm949_vm4, %v6713_v62, 0.0 }
0x223f   : > { %4205 = vadd.xlane.f32.xlu1 %v4204_v63 }
0x226d   : > { %v4115_v51 = vpop.f32.mrb[40].mxu1 }
0x226e   : > { %v4119_v3 = vadd.f32 %v4115_v51, %v3878_v34  ;;  %v6407_v4 = vpop.f32.mrb[41].mxu1 }
0x22cc   : > { %v4206_v5 = vpop.xlane.xlu1 %4205 }
0x22cd   : > { %6714 = vrcp.f32 %v4206_v5 }
0x22d7   : > { %v6715_v6 = vpop.eup %6714 }
0x22d8   : > { %v4208_v7 = vmul.f32 %v6715_v6, %v6713_v62 }
0x22da   : > { %6416 = vmatmul.mubr.msk.f32.vlgmr.msra.gmra.mrb[42].mxu1 %vm949_vm4, %v4208_v7 }
0x22db   : > { %6431 = vmatprep.mubr.msk.f32.mxu1 %vm6783_vm0, %v6782_v0  ;;  %6579 = vmatpush3.bf16.msra.mxu1 %v6578_v25  ;;  %v4574_v25 = vld [vmem:[#allocation2 + $0x20] sm:$0xff] }
0x22dc   : > { %6580 = vmatprep.subr.bf16.mxu1 %v6784_v1 }
0x23ad   : > { %v4281_v23 = vpop.f32.mrb[42].mxu1 }
0x23ae   : > { %v6417_v8 = vpop.f32.mrb[43].mxu1  ;;  %6421 = vmatmul.mubr.msk.f32.vlgmr.msra.gmra.mrb[40].mxu0 %vm949_vm4, %v4281_v23 }
0x23af   : > { %6442 = vmatprep.mubr.msk.f32.mxu0 %vm6783_vm0, %v6782_v0 }
0x2481   : > { %v4354_v11 = vpop.f32.mrb[40].mxu0 }
0x2482   : > { %v4358_v12 = vadd.f32 %v4354_v11, %v4119_v3  ;;  %v6422_v13 = vpop.f32.mrb[41].mxu0 }
0x2484   : > { %v4365_v14 = vadd.f32 %v5949_v10, %v4358_v12 }
0x2486   : > { %v4366_v17 = vadd.f32 %v4365_v14, %v7348_v49  ;;  %v5956_v49 = vld [vmem:[%s7676_s11 + $0x30] sm:$0xff] }
0x2487   : > { %v6657_v27 = vpack.i.bf16 %v5957_v26, %v5956_v49  ;;  %v6581_v28 = vpack.c.bf16 %v5957_v26, %v5956_v49 }
0x2488   : > { %v4371_v19 = vsel %vm867_vm3, %v4366_v17, 0.0 }
0x2489   : > { %4372 = vadd.xlane.f32.xlu1 %v4371_v19  ;;  %6658 = vrot.lane.b32.xlu0 %v6657_v27, %s7755_s7 }
0x248a   : > { %6582 = vmatpush3.bf16.msra.mxu1 %v6581_v28 }
0x248b   : > { %6445 = vmatprep.subr.mxu1 %v6782_v0 }
0x248d   : > { %4500 = vrot.lane.b32.xlu0 %v5959_v33, %s7755_s7 }
0x24fb   : > { %v6659_v36 = vpop.permute.xlu0 %6658 }
0x24fc   : > { %v6661_v20 = vunpack.i.h.bf16 %v6659_v36  ;;  %v6660_v41 = vunpack.i.l.bf16 %v6659_v36 }
0x24fe   : > { %v6587_v43 = vpack.c.bf16 %v6661_v20, %v6660_v41 }
0x24ff   : > { %v4501_v15 = vpop.permute.xlu0 %4500 }
0x2516   : > { %v4373_v29 = vpop.xlane.xlu1 %4372 }
0x2517   : > { %v4374_v30 = vmul.f32 0.03125, %v4373_v29 }
0x2519   : > { %v4375_v31 = vsub.f32 %v4366_v17, %v4374_v30  ;;  %v4575_v17 = vld [vmem:[#allocation2 + $0x28] sm:$0xff] }
0x251b   : > { %v4376_v32 = vmul.f32 %v4375_v31, %v4375_v31 }
0x251d   : > { %v4377_v18 = vsel %vm867_vm3, %v4376_v32, 0.0 }
0x251e   : > { %4378 = vadd.xlane.f32.xlu1 %v4377_v18 }
0x252f   : > { %6653 = vrot.lane.b32.xlu1 %v6652_v24, %s7755_s7 }
0x25ab   : > { %v4379_v34 = vpop.xlane.xlu1 %4378 }
0x25ac   : > { %v4380_v35 = vmul.f32 0.03125, %v4379_v34 }
0x25ae   : > { %v4381_v37 = vadd.f32 1e-05, %v4380_v35 }
0x25af   : > { %v6654_v38 = vpop.permute.xlu1 %6653 }
0x25b0   : > { %6716 = vrsqrt.f32 %v4381_v37  ;;  %v6656_v39 = vunpack.i.h.bf16 %v6654_v38  ;;  %v6655_v40 = vunpack.i.l.bf16 %v6654_v38 }
0x25b2   : > { %v6584_v42 = vpack.c.bf16 %v6656_v39, %v6655_v40 }
0x25b4   : > { %6585 = vmatpush3.bf16.msra.mxu0 %v6584_v42 }
0x25b5   : > { %6586 = vmatprep.subr.bf16.mxu0 %v6784_v1 }
0x25b8   : > { %6588 = vmatpush3.bf16.msra.mxu0 %v6587_v43 }
0x25b9   : > { %6450 = vmatprep.subr.mxu0 %v6782_v0 }
0x25ba   : > { %v6717_v44 = vpop.eup %6716 }
0x25bb   : > { %v4383_v46 = vmul.f32 %v6717_v44, %v4375_v31  ;;  %6443 = vmatmul.mubr.msk.f32.vlgmr.msra.gmra.mrb[42].mxu0 %vm867_vm3, %v7155_v9 }
0x25bc   : > { %6452 = vmatprep.mubr.msk.f32.mxu0 %vm6783_vm0, %v6782_v0 }
0x25bd   : > { %v4390_v48 = vmul.f32 %v5952_v45, %v4383_v46 }
0x25bf   : > { %v7497_v50 = vadd.f32 %v5953_v47, %v4390_v48  ;;  %v4576_v48 = vld [vmem:[#allocation2 + $0x30] sm:$0xff] }
0x25c1   : > { %6432 = vmatmul.mubr.msk.f32.vlgmr.msra.gmra.mrb[44].mxu1 %vm867_vm3, %v7497_v50 }
0x25c2   : > { %6447 = vmatprep.mubr.msk.f32.mxu1 %vm6783_vm0, %v6782_v0 }
0x268e   : > { %v4569_v52 = vpop.f32.mrb[42].mxu0 }
0x268f   : > { %v7503_v53 = vadd.f32 %v4569_v52, %v4501_v15  ;;  %v6444_v9 = vpop.f32.mrb[43].mxu0 }
0x2691   : > { %4745 = vrot.lane.b32.xlu0 %v7503_v53, %s7747_s6  ;;  %6446 = vmatpush3.xpose.msk.msra.mxu1 %vm949_vm4, %v7503_v53 }
0x2692   : > { %6455 = vmatprep.subr.mxu1 %v6782_v0 }
0x2694   : > { %v4480_v16 = vpop.f32.mrb[44].mxu1 }
0x2695   : > { %v7510_v54 = vadd.f32 %v5959_v33, %v4480_v16  ;;  %v6433_v55 = vpop.f32.mrb[45].mxu1 }
0x2697   : > { %4743 = vrot.lane.b32.xlu1 %v7510_v54, %s7747_s6  ;;  %6448 = vmatmul.mubr.msk.f32.vlgmr.msra.gmra.mrb[46].mxu1 %vm949_vm4, %v7510_v54 }
0x2698   : > { %6457 = vmatprep.mubr.msk.f32.mxu1 %vm6783_vm0, %v6782_v0 }
0x2703   : > { %v4746_v56 = vpop.permute.xlu0 %4745 }
0x2704   : > { %6456 = vmatpush3.xpose.msk.msra.mxu1 %vm949_vm4, %v4746_v56 }
0x2705   : > { %6465 = vmatprep.subr.mxu1 %v6782_v0 }
0x2709   : > { %v4744_v57 = vpop.permute.xlu1 %4743 }
0x270a   : > { %6458 = vmatmul.mubr.msk.f32.vlgmr.msra.gmra.mrb[48].mxu1 %vm949_vm4, %v4744_v57 }
0x270b   : > { %6467 = vmatprep.mubr.msk.f32.mxu1 %vm6783_vm0, %v6782_v0  ;;  %6466 = vmatpush3.msra.mxu1 %v4575_v17 }
0x270c   : > { %6475 = vmatprep.subr.mxu1 %v6782_v0 }
0x276a   : > { %v4652_v58 = vpop.f32.mrb[46].mxu1 }
0x276b   : > { %v6449_v59 = vpop.f32.mrb[47].mxu1  ;;  %v4656_v60 = vsel %vm949_vm4, %v4652_v58, -inf }
0x276c   : > { %4657 = vmax.xlane.f32.xlu0 %v4656_v60  ;;  %v4577_v60 = vld [vmem:[#allocation2 + $0x38] sm:$0xff] }
0x27dd   : > { %v4817_v61 = vpop.f32.mrb[48].mxu1 }
0x27de   : > { %v6459_v62 = vpop.f32.mrb[49].mxu1  ;;  %v4821_v63 = vsel %vm949_vm4, %v4817_v61, -inf }
0x27df   : > { %4822 = vmax.xlane.f32.xlu1 %v4821_v63 }
0x27f0   : > { %4667 = vrot.lane.b32.xlu1 %v7503_v53, %s7755_s7  ;;  %s7762_s7 = sld [smem:[#allocation6_spill]] }
0x27f4   : > { %5056 = vrot.lane.b32.xlu1 %v7503_v53, %s7748_s1 }
0x27f6   : > { %s764_s28 = scalar_lea.vmem %s7763_s14, %s7762_s7 }
0x27f8   : > { %5054 = vrot.lane.b32.xlu1 %v7510_v54, %s7748_s1 }
0x27f9   : > { %v4658_v2 = vpop.xlane.xlu0 %4657 }
0x27fa   : > { %v4659_v51 = vsub.f32 %v4652_v58, %v4658_v2 }
0x27fc   : > { %v4660_v3 = vmul.f32 1.442695, %v4659_v51 }
0x27fe   : > { %6718 = vpow2.f32 %v4660_v3 }
0x2808   : > { %v6719_v4 = vpop.eup %6718 }
0x2809   : > { %v4662_v5 = vsel %vm949_vm4, %v6719_v4, 0.0 }
0x280a   : > { %4663 = vadd.xlane.f32.xlu0 %v4662_v5 }
0x286c   : > { %v4823_v6 = vpop.xlane.xlu1 %4822 }
0x286d   : > { %v4824_v7 = vsub.f32 %v4817_v61, %v4823_v6 }
0x286f   : > { %v4825_v23 = vmul.f32 1.442695, %v4824_v7 }
0x2870   : > { %v4668_v8 = vpop.permute.xlu1 %4667 }
0x2871   : > { %6720 = vpow2.f32 %v4825_v23  ;;  %6451 = vmatpush3.msra.mxu0 %v4668_v8 }
0x2872   : > { %6460 = vmatprep.subr.mxu0 %v6782_v0 }
0x2874   : > { %v5057_v27 = vpop.permute.xlu1 %5056 }
0x2878   : > { %v5055_v30 = vpop.permute.xlu1 %5054 }
0x287b   : > { %v6721_v10 = vpop.eup %6720 }
0x287c   : > { %v4827_v11 = vsel %vm949_vm4, %v6721_v10, 0.0 }
0x287d   : > { %4828 = vadd.xlane.f32.xlu0 %v4827_v11 }
0x2893   : > { %4832 = vrot.lane.b32.xlu0 %v7503_v53, %s7749_s26  ;;  %s7760_s26 = sld [smem:[#allocation17_spill]] }
0x2897   : > { %v4664_v12 = vpop.xlane.xlu0 %4663 }
0x2898   : > { %6722 = vrcp.f32 %v4664_v12 }
0x2899   : > { %v5979_v6 = vld [vmem:[%s7760_s26 + $0x1] ss:$0 sm:$0xff] }
0x28a2   : > { %v6723_v13 = vpop.eup %6722 }
0x28a3   : > { %v4666_v14 = vmul.f32 %v6723_v13, %v6719_v4 }
0x28a5   : > { %6453 = vmatmul.mubr.msk.f32.vlgmr.msra.gmra.mrb[44].mxu0 %vm949_vm4, %v4666_v14 }
0x28a6   : > { %6462 = vmatprep.mubr.msk.f32.mxu0 %vm6783_vm0, %v6782_v0 }
0x290a   : > { %v4829_v19 = vpop.xlane.xlu0 %4828 }
0x290b   : > { %6724 = vrcp.f32 %v4829_v19 }
0x290e   : > { %v4833_v21 = vpop.permute.xlu0 %4832 }
0x290f   : > { %6461 = vmatpush3.msra.mxu0 %v4833_v21 }
0x2910   : > { %6470 = vmatprep.subr.mxu0 %v6782_v0 }
0x2915   : > { %v6725_v22 = vpop.eup %6724 }
0x2916   : > { %v4831_v24 = vmul.f32 %v6725_v22, %v6721_v10 }
0x2918   : > { %6463 = vmatmul.mubr.msk.f32.vlgmr.msra.gmra.mrb[46].mxu0 %vm949_vm4, %v4831_v24 }
0x2919   : > { %6471 = vmatpush3.msra.mxu0 %v4574_v25  ;;  %6472 = vmatprep.mubr.msk.f32.mxu0 %vm6783_vm0, %v6782_v0 }
0x291a   : > { %6480 = vmatprep.subr.mxu0 %v6782_v0 }
0x2978   : > { %v4739_v49 = vpop.f32.mrb[44].mxu0 }
0x2979   : > { %v6454_v26 = vpop.f32.mrb[45].mxu0  ;;  %6473 = vmatmul.mubr.msk.f32.vlgmr.msra.gmra.mrb[48].mxu0 %vm949_vm4, %v4739_v49 }
0x297a   : > { %6482 = vmatprep.mubr.msk.f32.mxu0 %vm6783_vm0, %v6782_v0  ;;  %v5991_v26 = vld [vmem:[%s7684_s19 + $0x40] sm:$0xff] }
0x29eb   : > { %v4904_v28 = vpop.f32.mrb[46].mxu0 }
0x29ec   : > { %v6464_v29 = vpop.f32.mrb[47].mxu0  ;;  %6468 = vmatmul.mubr.msk.f32.vlgmr.msra.gmra.mrb[50].mxu1 %vm949_vm4, %v4904_v28  ;;  %v5993_v28 = vld [vmem:[%s7684_s19 + $0x50] sm:$0xff] }
0x29ed   : > { %6476 = vmatpush3.xpose.msk.msra.mxu1 %vm949_vm4, %v5057_v27  ;;  %6477 = vmatprep.mubr.msk.f32.mxu1 %vm6783_vm0, %v6782_v0  ;;  %v5992_v27 = vld [vmem:[%s7684_s19 + $0x48] sm:$0xff] }
0x29ee   : > { %6485 = vmatprep.subr.mxu1 %v6782_v0  ;;  %v6596_v29 = vpack.c.bf16 %v5992_v27, %v5991_v26 }
0x29f0   : > { %6478 = vmatmul.mubr.msk.f32.vlgmr.msra.gmra.mrb[52].mxu1 %vm949_vm4, %v5055_v30  ;;  %v5994_v30 = vld [vmem:[%s7684_s19 + $0x58] sm:$0xff] }
0x29f1   : > { %6487 = vmatprep.mubr.msk.f32.mxu1 %vm6783_vm0, %v6782_v0  ;;  %6486 = vmatpush3.msra.mxu1 %v4576_v48 }
0x29f2   : > { %6495 = vmatprep.subr.mxu1 %v6782_v0 }
0x2a4c   : > { %v5050_v31 = vpop.f32.mrb[48].mxu0 }
0x2a4d   : > { %v6474_v32 = vpop.f32.mrb[49].mxu0 }
0x2a4e   : > { %v5995_v32 = vld [vmem:[%s7684_s19 + $0x60] sm:$0xff] }
0x2abf   : > { %v4977_v18 = vpop.f32.mrb[50].mxu1 }
0x2ac0   : > { %v5051_v33 = vadd.f32 %v5050_v31, %v4977_v18  ;;  %v6469_v34 = vpop.f32.mrb[51].mxu1  ;;  %v6599_v31 = vpack.c.bf16 %v5994_v30, %v5993_v28  ;;  %v5996_v18 = vld [vmem:[%s7684_s19 + $0x68] sm:$0xff] }
0x2ac3   : > { %v5128_v35 = vpop.f32.mrb[52].mxu1 }
0x2ac4   : > { %v6479_v36 = vpop.f32.mrb[53].mxu1  ;;  %v5132_v37 = vsel %vm949_vm4, %v5128_v35, -inf }
0x2ac5   : > { %5133 = vmax.xlane.f32.xlu0 %v5132_v37 }
0x2adb   : > { %5143 = vrot.lane.b32.xlu0 %v7503_v53, %s7750_s3 }
0x2adf   : > { %5293 = vrot.lane.b32.xlu0 %v7510_v54, %s7751_s8 }
0x2b52   : > { %v5134_v38 = vpop.xlane.xlu0 %5133 }
0x2b53   : > { %v5135_v20 = vsub.f32 %v5128_v35, %v5134_v38  ;;  %v5982_v38 = vld [vmem:[%s7680_s15 + $0x1] ss:$0 sm:$0xff] }
0x2b55   : > { %v5136_v39 = vmul.f32 1.442695, %v5135_v20 }
0x2b56   : > { %v5144_v40 = vpop.permute.xlu0 %5143 }
0x2b57   : > { %6726 = vpow2.f32 %v5136_v39  ;;  %6481 = vmatpush3.msra.mxu0 %v5144_v40  ;;  %v5983_v39 = vld [vmem:[%s7681_s16 + $0x1] ss:$0 sm:$0xff] }
0x2b58   : > { %6490 = vmatprep.subr.mxu0 %v6782_v0 }
0x2b5a   : > { %v5294_v47 = vpop.permute.xlu0 %5293 }
0x2b61   : > { %v6727_v41 = vpop.eup %6726 }
0x2b62   : > { %v5138_v42 = vsel %vm949_vm4, %v6727_v41, 0.0 }
0x2b63   : > { %5139 = vadd.xlane.f32.xlu1 %v5138_v42  ;;  %v5998_v42 = vld [vmem:[%s7684_s19 + $0x78] sm:$0xff] }
0x2b74   : > { %5295 = vrot.lane.b32.xlu1 %v7503_v53, %s7751_s8 }
0x2bf0   : > { %v5140_v43 = vpop.xlane.xlu1 %5139 }
0x2bf1   : > { %6728 = vrcp.f32 %v5140_v43 }
0x2bf4   : > { %v5296_v46 = vpop.permute.xlu1 %5295 }
0x2bfb   : > { %v6729_v44 = vpop.eup %6728 }
0x2bfc   : > { %v5142_v45 = vmul.f32 %v6729_v44, %v6727_v41  ;;  %v5989_v44 = vld [vmem:[%s7683_s18 + $0x1] ss:$0 sm:$0xff] }
0x2bfe   : > { %6483 = vmatmul.mubr.msk.f32.vlgmr.msra.gmra.mrb[50].mxu0 %vm949_vm4, %v5142_v45 }
0x2bff   : > { %6491 = vmatpush3.xpose.msk.msra.mxu0 %vm949_vm4, %v5296_v46  ;;  %6492 = vmatprep.mubr.msk.f32.mxu0 %vm6783_vm0, %v6782_v0 }
0x2c00   : > { %6500 = vmatprep.subr.mxu0 %v6782_v0 }
0x2c02   : > { %6493 = vmatmul.mubr.msk.f32.vlgmr.msra.gmra.mrb[52].mxu0 %vm949_vm4, %v5294_v47 }
0x2c03   : > { %6502 = vmatprep.mubr.msk.f32.mxu0 %vm6783_vm0, %v6782_v0  ;;  %6501 = vmatpush3.msra.mxu0 %v4577_v60 }
0x2c04   : > { %6595 = vmatprep.subr.bf16.mxu0 %v6784_v1 }
0x2cd1   : > { %v5215_v15 = vpop.f32.mrb[50].mxu0 }
0x2cd2   : > { %v6484_v52 = vpop.f32.mrb[51].mxu0  ;;  %6488 = vmatmul.mubr.msk.f32.vlgmr.msra.gmra.mrb[54].mxu1 %vm949_vm4, %v5215_v15 }
0x2cd3   : > { %6497 = vmatprep.mubr.msk.f32.mxu1 %vm6783_vm0, %v6782_v0  ;;  %v6001_v52 = vld [vmem:[%s7685_s20 + $0x1] ss:$0 sm:$0xff] }
0x2cd5   : > { %v5367_v9 = vpop.f32.mrb[52].mxu0 }
0x2cd6   : > { %v6494_v16 = vpop.f32.mrb[53].mxu0  ;;  %v5371_v54 = vsel %vm949_vm4, %v5367_v9, -inf }
0x2cd7   : > { %5372 = vmax.xlane.f32.xlu1 %v5371_v54 }
0x2d64   : > { %v5373_v55 = vpop.xlane.xlu1 %5372 }
0x2d65   : > { %v5374_v56 = vsub.f32 %v5367_v9, %v5373_v55 }
0x2d67   : > { %v5375_v57 = vmul.f32 1.442695, %v5374_v56 }
0x2d69   : > { %6730 = vpow2.f32 %v5375_v57 }
0x2d73   : > { %v6731_v58 = vpop.eup %6730 }
0x2d74   : > { %v5377_v59 = vsel %vm949_vm4, %v6731_v58, 0.0 }
0x2d75   : > { %5378 = vadd.xlane.f32.xlu0 %v5377_v59 }
0x2d8b   : > { %5382 = vrot.lane.b32.xlu0 %v7503_v53, %s7752_s29  ;;  %s7761_s29 = sld [smem:[#allocation18_spill]] }
0x2d91   : > { %v5985_v22 = vld [vmem:[%s7761_s29 + $0x28] sm:$0xff]  ;;  %v5987_v25 = vld [vmem:[%s7761_s29 + $0x38] sm:$0xff] }
0x2da5   : > { %v5288_v61 = vpop.f32.mrb[54].mxu1 }
0x2da6   : > { %v5292_v62 = vadd.f32 %v5288_v61, %v5051_v33  ;;  %v6489_v63 = vpop.f32.mrb[55].mxu1  ;;  %v6602_v33 = vpack.c.bf16 %v5996_v18, %v5995_v32 }
0x2e02   : > { %v5379_v2 = vpop.xlane.xlu0 %5378 }
0x2e03   : > { %6732 = vrcp.f32 %v5379_v2 }
0x2e06   : > { %v5383_v51 = vpop.permute.xlu0 %5382 }
0x2e07   : > { %6496 = vmatpush3.msra.mxu1 %v5383_v51  ;;  %v6004_v51 = vld [vmem:[%s7686_s21 + $0x1] ss:$0 sm:$0xff] }
0x2e08   : > { %6589 = vmatprep.subr.bf16.mxu1 %v6784_v1 }
0x2e0d   : > { %v6733_v3 = vpop.eup %6732 }
0x2e0e   : > { %v5381_v4 = vmul.f32 %v6733_v3, %v6731_v58 }
0x2e10   : > { %6498 = vmatmul.mubr.msk.f32.vlgmr.msra.gmra.mrb[56].mxu1 %vm949_vm4, %v5381_v4  ;;  %v6005_v4 = vld [vmem:[%s7687_s22 + $0x1] ss:$0 sm:$0xff] }
0x2e11   : > { %6513 = vmatprep.mubr.msk.f32.mxu1 %vm6783_vm0, %v6782_v0 }
0x2ee3   : > { %v5454_v53 = vpop.f32.mrb[56].mxu1 }
0x2ee4   : > { %v6499_v5 = vpop.f32.mrb[57].mxu1  ;;  %6503 = vmatmul.mubr.msk.f32.vlgmr.msra.gmra.mrb[54].mxu0 %vm949_vm4, %v5454_v53 }
0x2ee5   : > { %6532 = vmatprep.mubr.msk.f32.mxu0 %vm6783_vm0, %v6782_v0  ;;  %v5984_v0 = vld [vmem:[%s7761_s29 + $0x20] sm:$0xff]  ;;  %6597 = vmatpush3.bf16.msra.mxu0 %v6596_v29 }
0x2ee6   : > { %v6590_v24 = vpack.c.bf16 %v5985_v22, %v5984_v0  ;;  %6598 = vmatprep.subr.bf16.mxu0 %v6784_v1 }
0x2ee8   : > { %6591 = vmatpush3.bf16.msra.mxu1 %v6590_v24 }
0x2ee9   : > { %6592 = vmatprep.subr.bf16.mxu1 %v6784_v1  ;;  %6600 = vmatpush3.bf16.msra.mxu0 %v6599_v31 }
0x2eea   : > { %6601 = vmatprep.subr.bf16.mxu0 %v6784_v1 }
0x2eed   : > { %6603 = vmatpush3.bf16.msra.mxu0 %v6602_v33 }
0x2eee   : > { %6604 = vmatprep.subr.bf16.mxu0 %v6784_v1  ;;  %v5997_v1 = vld [vmem:[%s7684_s19 + $0x70] sm:$0xff] }
0x2eef   : > { %v6605_v43 = vpack.c.bf16 %v5998_v42, %v5997_v1 }
0x2ef1   : > { %6606 = vmatpush3.bf16.msra.mxu0 %v6605_v43 }
0x2fb7   : > { %v5527_v7 = vpop.f32.mrb[54].mxu0 }
0x2fb8   : > { %v5531_v23 = vadd.f32 %v5527_v7, %v5292_v62  ;;  %v6504_v8 = vpop.f32.mrb[55].mxu0 }
0x2fba   : > { %v5538_v10 = vadd.f32 %v5979_v6, %v5531_v23 }
0x2fbc   : > { %v5539_v11 = vadd.f32 %v5538_v10, %v7497_v50  ;;  %v5986_v50 = vld [vmem:[%s7761_s29 + $0x30] sm:$0xff] }
0x2fbd   : > { %v6593_v49 = vpack.c.bf16 %v5987_v25, %v5986_v50 }
0x2fbe   : > { %v5544_v12 = vsel %vm867_vm3, %v5539_v11, 0.0 }
0x2fbf   : > { %5545 = vadd.xlane.f32.xlu1 %v5544_v12  ;;  %6594 = vmatpush3.bf16.msra.mxu1 %v6593_v49 }
0x304c   : > { %v5546_v13 = vpop.xlane.xlu1 %5545 }
0x304d   : > { %v5547_v14 = vmul.f32 0.03125, %v5546_v13 }
0x304f   : > { %v5548_v17 = vsub.f32 %v5539_v11, %v5547_v14 }
0x3051   : > { %v5549_v19 = vmul.f32 %v5548_v17, %v5548_v17 }
0x3053   : > { %v5550_v21 = vsel %vm867_vm3, %v5549_v19, 0.0 }
0x3054   : > { %5551 = vadd.xlane.f32.xlu1 %v5550_v21 }
0x30e1   : > { %v5552_v34 = vpop.xlane.xlu1 %5551 }
0x30e2   : > { %v5553_v35 = vmul.f32 0.03125, %v5552_v34 }
0x30e4   : > { %v5554_v36 = vadd.f32 1e-05, %v5553_v35 }
0x30e6   : > { %6734 = vrsqrt.f32 %v5554_v36 }
0x30f0   : > { %v6735_v37 = vpop.eup %6734 }
0x30f1   : > { %v5556_v20 = vmul.f32 %v6735_v37, %v5548_v17 }
0x30f3   : > { %v5563_v40 = vmul.f32 %v5982_v38, %v5556_v20 }
0x30f5   : > { %v5570_v41 = vadd.f32 %v5983_v39, %v5563_v40 }
0x30f7   : > { %6514 = vmatmul.mubr.msk.f32.vlgmr.msra.gmra.mrb[58].mxu1 %vm867_vm3, %v5570_v41 }
0x31ca   : > { %v5653_v45 = vpop.f32.mrb[58].mxu1 }
0x31cb   : > { %v5654_v46 = vadd.f32 %v5989_v44, %v5653_v45  ;;  %v6515_v47 = vpop.f32.mrb[59].mxu1 }
0x31cd   : > { %v5657_v48 = vmax.f32 %v5654_v46, 0.0 }
0x31cf   : > { %6533 = vmatmul.mubr.msk.f32.vlgmr.msra.gmra.mrb[56].mxu0 %vm3201_vm5, %v5657_v48 }
0x32a2   : > { %v5736_v15 = vpop.f32.mrb[56].mxu0 }
0x32a3   : > { %v5740_v9 = vadd.f32 %v5736_v15, %v5570_v41  ;;  %v6534_v16 = vpop.f32.mrb[57].mxu0 }
0x32a5   : > { %v5749_v54 = vadd.f32 %v6001_v52, %v5740_v9 }
0x32a7   : > { %v5754_v55 = vsel %vm867_vm3, %v5749_v54, 0.0 }
0x32a8   : > { %5755 = vadd.xlane.f32.xlu1 %v5754_v55 }
0x3335   : > { %v5756_v56 = vpop.xlane.xlu1 %5755 }
0x3336   : > { %v5757_v57 = vmul.f32 0.03125, %v5756_v56 }
0x3338   : > { %v5758_v58 = vsub.f32 %v5749_v54, %v5757_v57 }
0x333a   : > { %v5759_v59 = vmul.f32 %v5758_v58, %v5758_v58 }
0x333c   : > { %v5760_v60 = vsel %vm867_vm3, %v5759_v59, 0.0 }
0x333d   : > { %5761 = vadd.xlane.f32.xlu1 %v5760_v60 }
0x33ca   : > { %v5762_v61 = vpop.xlane.xlu1 %5761 }
0x33cb   : > { %v5763_v62 = vmul.f32 0.03125, %v5762_v61 }
0x33cd   : > { %v5764_v63 = vadd.f32 1e-05, %v5763_v62 }
0x33cf   : > { %6736 = vrsqrt.f32 %v5764_v63 }
0x33d9   : > { %v6737_v2 = vpop.eup %6736 }
0x33da   : > { %v5766_v3 = vmul.f32 %v6737_v2, %v5758_v58 }
0x33dc   : > { %v5773_v53 = vmul.f32 %v6004_v51, %v5766_v3 }
0x33de   : > { %v5780_v5 = vadd.f32 %v6005_v4, %v5773_v53 }
0x33e0   : > { %5781 = vst.msk [vmem:[%s764_s28] sm:$0xff] %vm867_vm3, %v5780_v5 }
0x33e1 PF: > { %s7764_s6 = sld [smem:[#allocation5_spill]] }
0x33e7   : > { %s35_s5 = sadd.s32 1, %s7764_s6  }
0x33e8   : > { %p32_p3 = scmp.ge.s32.totalorder %s35_s5, 4  }
0x33ea   :  { %34 = sbr.rel (!%p32_p3) target bundleno = 15 (0xf), region = 172 }
0x33f1   :  { %5801 = vsyncpa [#allocation3], 1 }
0x33f2   :  { %5803 = vsyncpa [#allocation3 + $0x1], 1 }

</bundles_post_ra>
